<compile_context>
chip_gen: v5e
topology: v5e:2x2
jax: 0.10.0
libtpu: 0.0.40
codegen_flags: <defaults>
</compile_context>

<pallas_src>
import jax
import jax.numpy as jnp
from jax.experimental import pallas as pl
from jax.experimental.pallas import tpu as pltpu


def _make_global_pool_kernel(num_layers, num_segments, c_pos, compute_dtype):
    """x/pos/batch tile + per-layer (W, b) -> per-tile per-segment max."""

    def kernel(x_ref, pos_ref, batch_ref, *refs):
        out_ref = refs[-1]           # (1, num_segments, C_out)
        params = refs[:-1]           # w1x(bf16), w1p(f32), b1, (w_l(bf16), b_l), ...

        # ---- layer 0: fused torch.cat([x, pos], dim=1) @ W1^T + b1 ----
        h = jnp.dot(x_ref[...].astype(compute_dtype),
                    params[0][...],
                    preferred_element_type=jnp.float32)          # (tn, C1) f32
        # pos contribution: K = 3 would be heavily padded on the MXU -> 3 VPU FMAs.
        p = pos_ref[...].astype(jnp.float32)                     # (tn, 3)
        w1p = params[1][...]                                     # (3, C1) f32
        for j in range(c_pos):
            h = h + p[:, j:j + 1] * w1p[j:j + 1, :]
        h = h + params[2][...]                                   # bias (1, C1) f32

        # ---- remaining layers: ReLU between layers, last layer linear ----
        idx = 3
        for _ in range(1, num_layers):
            h = jnp.maximum(h, 0.0)
            h = jnp.dot(h.astype(compute_dtype), params[idx][...],
                        preferred_element_type=jnp.float32) + params[idx + 1][...]
            idx += 2

        # ---- per-tile global_max_pool: segment max over this tile's point rows ----
        seg_ids = batch_ref[...]                                 # (tn, 1) int32
        neg_inf = jnp.float32(-jnp.inf)
        seg_rows = []
        for s in range(num_segments):
            mask = seg_ids == s                                  # padded rows never match
            seg_rows.append(
                jnp.max(jnp.where(mask, h, neg_inf), axis=0, keepdims=True))  # (1, C_out)
        tile_max = jnp.concatenate(seg_rows, axis=0)             # (num_segments, C_out)
        out_ref[...] = tile_max[None].astype(out_ref.dtype)      # single lane-dense store

    return kernel


def global_pool_pallas(x, pos, batch, weights, biases, num_segments, *,
                       tn=512, compute_dtype=jnp.bfloat16):
    """GlobalPool.forward.

    x: (N, C_x) f32, pos: (N, C_pos) f32, batch: (N,) int in [0, num_segments).
    weights[l]: (C_out_l, C_in_l) (nn.Linear layout), biases[l]: (C_out_l,).
    Returns (out (B, C_out_last), pos_out (B, C_pos), batch_out (B,)).
    """
    N, C_x = x.shape
    _, C_pos = pos.shape
    L = len(weights)
    C_out = weights[-1].shape[0]
    assert weights[0].shape[1] == C_x + C_pos
    assert tn % 8 == 0

    # Pad the point dimension to a multiple of the row tile; padded rows get an
    # out-of-range segment id so they never contribute to any segment max.
    n_tiles = pl.cdiv(N, tn)
    n_pad = n_tiles * tn
    if n_pad != N:
        pad = n_pad - N
        x = jnp.pad(x, ((0, pad), (0, 0)))
        pos = jnp.pad(pos, ((0, pad), (0, 0)))
        batch = jnp.pad(batch, ((0, pad),), constant_values=num_segments)
    batch2d = batch.reshape(n_pad, 1).astype(jnp.int32)

    # Split the first-layer weight so the concat never materializes; pre-transpose to
    # (C_in, C_out) for the h @ W orientation and pre-cast MXU operands to bf16
    # (one-time, halves weight DMA and removes per-iteration casts).  The tiny pos
    # weight stays f32 since it runs on the VPU.
    w0 = weights[0]
    flat_params = [
        jnp.transpose(w0[:, :C_x]).astype(compute_dtype),    # (C_x,  C1)  MXU
        jnp.transpose(w0[:, C_x:]).astype(jnp.float32),       # (C_pos, C1) VPU
        biases[0].reshape(1, -1).astype(jnp.float32),          # (1, C1)
    ]
    for l in range(1, L):
        flat_params.append(jnp.transpose(weights[l]).astype(compute_dtype))
        flat_params.append(biases[l].reshape(1, -1).astype(jnp.float32))

    in_specs = [
        pl.BlockSpec((tn, C_x), lambda i: (i, 0)),
        pl.BlockSpec((tn, C_pos), lambda i: (i, 0)),
        pl.BlockSpec((tn, 1), lambda i: (i, 0)),
    ]
    for prm in flat_params:
        in_specs.append(pl.BlockSpec(prm.shape, lambda i: (0, 0)))

    out_spec = pl.BlockSpec((1, num_segments, C_out), lambda i: (i, 0, 0))

    partials = pl.pallas_call(
        _make_global_pool_kernel(L, num_segments, C_pos, compute_dtype),
        out_shape=jax.ShapeDtypeStruct((n_tiles, num_segments, C_out), jnp.float32),
        grid_spec=pltpu.PrefetchScalarGridSpec(
            num_scalar_prefetch=0,
            grid=(n_tiles,),
            in_specs=in_specs,
            out_specs=out_spec,
        ),
        compiler_params=pltpu.CompilerParams(
            dimension_semantics=("parallel",)),
    )(x, pos, batch2d, *flat_params)

    out = jnp.max(partials, axis=0).astype(x.dtype)       # tiny (n_tiles, B, C_out) reduce
    pos_out = jnp.zeros((num_segments, C_pos), pos.dtype)
    batch_out = jnp.arange(num_segments, dtype=jnp.int32)
    return out, pos_out, batch_out


def init_mlp_params(key, in_dim, layer_dims):
    """Deterministic synthetic parameters matching nn.Linear(c_in, c_out)."""
    weights, biases = [], []
    last = in_dim
    for out_c in layer_dims:
        key, kw, kb = jax.random.split(key, 3)
        bound = float(last) ** -0.5
        weights.append(jax.random.uniform(kw, (out_c, last), jnp.float32, -bound, bound))
        biases.append(jax.random.uniform(kb, (out_c,), jnp.float32, -bound, bound))
        last = out_c
    return weights, biases


def global_pool_reference(x, pos, batch, weights, biases, num_segments):
    """Plain-JAX reference of GlobalPool.forward (f32 throughout)."""
    h = jnp.concatenate([x, pos], axis=1)
    L = len(weights)
    for l in range(L):
        h = h @ weights[l].T + biases[l][None, :]
        if l < L - 1:
            h = jnp.maximum(h, 0.0)
    out = jnp.full((num_segments, h.shape[1]), -jnp.inf, dtype=h.dtype)
    out = out.at[batch].max(h)                           # global_max_pool
    pos_out = jnp.zeros((num_segments, pos.shape[1]), dtype=pos.dtype)
    batch_out = jnp.arange(num_segments, dtype=jnp.int32)
    return out, pos_out, batch_out


if __name__ == "__main__":
    key = jax.random.PRNGKey(0)
    k_x, k_pos, k_w = jax.random.split(key, 3)

    N, C_x, C_pos = 2000, 61, 3           # 2000 points (exercises padding), 61 feats + 3D coords
    num_segments = 2                       # two point clouds in the batch
    layer_dims = [128, 128]                # nn = MLP: 64 -> 128 -> 128 (ReLU between)

    x = jax.random.normal(k_x, (N, C_x), jnp.float32)
    pos = jax.random.normal(k_pos, (N, C_pos), jnp.float32)
    batch = jnp.arange(N, dtype=jnp.int32) % num_segments   # interleaved segment ids

    weights, biases = init_mlp_params(k_w, C_x + C_pos, layer_dims)

    out, pos_out, batch_out = global_pool_pallas(
        x, pos, batch, weights, biases, num_segments, tn=512)
    out = jax.block_until_ready(out)

    ref_out, ref_pos, ref_batch = global_pool_reference(
        x, pos, batch, weights, biases, num_segments)

    assert out.shape == (num_segments, layer_dims[-1]), out.shape
    assert pos_out.shape == (num_segments, C_pos), pos_out.shape
    assert batch_out.shape == (num_segments,), batch_out.shape
    # Tolerance accounts for bf16 matmul inputs (f32 accumulation) vs the f32 reference.
    assert jnp.allclose(out, ref_out, atol=5e-2, rtol=5e-2), \
        float(jnp.max(jnp.abs(out - ref_out)))
    assert jnp.array_equal(pos_out, ref_pos)
    assert jnp.array_equal(batch_out, ref_batch)

    print("KERNEL_OK")
</pallas_src>

<mosaic_0001>
module attributes {stable_mosaic.version = 11 : i64} {
  func.func @kernel(%arg0: i32, %arg1: memref<512x61xf32, #tpu.memory_space<vmem>>, %arg2: memref<512x3xf32, #tpu.memory_space<vmem>>, %arg3: memref<512x1xi32, #tpu.memory_space<vmem>>, %arg4: memref<61x128xbf16, #tpu.memory_space<vmem>>, %arg5: memref<3x128xf32, #tpu.memory_space<vmem>>, %arg6: memref<1x128xf32, #tpu.memory_space<vmem>>, %arg7: memref<128x128xbf16, #tpu.memory_space<vmem>>, %arg8: memref<1x128xf32, #tpu.memory_space<vmem>>, %arg9: memref<1x2x128xf32, #tpu.memory_space<vmem>>) attributes {dimension_semantics = [#tpu.dimension_semantics<parallel>], iteration_bounds = array<i64: 4>, scalar_prefetch = 0 : i64, scratch_operands = 0 : i64, tpu.core_type = #tpu.core_type<tc>, window_params = [{transform_indices = @transform_0, window_bounds = array<i64: 512, 61>}, {transform_indices = @transform_1, window_bounds = array<i64: 512, 3>}, {transform_indices = @transform_2, window_bounds = array<i64: 512, 1>}, {pipeline_mode = #tpu.pipeline_mode<synchronous>, transform_indices = @transform_3, window_bounds = array<i64: 61, 128>}, {pipeline_mode = #tpu.pipeline_mode<synchronous>, transform_indices = @transform_4, window_bounds = array<i64: 3, 128>}, {pipeline_mode = #tpu.pipeline_mode<synchronous>, transform_indices = @transform_5, window_bounds = array<i64: 1, 128>}, {pipeline_mode = #tpu.pipeline_mode<synchronous>, transform_indices = @transform_6, window_bounds = array<i64: 128, 128>}, {pipeline_mode = #tpu.pipeline_mode<synchronous>, transform_indices = @transform_7, window_bounds = array<i64: 1, 128>}, {transform_indices = @transform_8, window_bounds = array<i64: 1, 2, 128>}]} {
    %c0 = arith.constant 0 : index
    %c0_0 = arith.constant 0 : index
    %0 = vector.load %arg1[%c0, %c0_0] : memref<512x61xf32, #tpu.memory_space<vmem>>, vector<512x61xf32>
    %1 = arith.truncf %0 : vector<512x61xf32> to vector<512x61xbf16>
    %c0_1 = arith.constant 0 : index
    %c0_2 = arith.constant 0 : index
    %2 = vector.load %arg4[%c0_1, %c0_2] : memref<61x128xbf16, #tpu.memory_space<vmem>>, vector<61x128xbf16>
    %cst = arith.constant dense<0.000000e+00> : vector<512x128xf32>
    %3 = tpu.matmul %1, %2, %cst {dimension_numbers = #tpu.dot_dimension_numbers<[1], [0], [0], [1], [0, 0, 1, 1], [], []>} : vector<512x61xbf16>, vector<61x128xbf16>, vector<512x128xf32> -> vector<512x128xf32>
    %c0_3 = arith.constant 0 : index
    %c0_4 = arith.constant 0 : index
    %4 = vector.load %arg2[%c0_3, %c0_4] : memref<512x3xf32, #tpu.memory_space<vmem>>, vector<512x3xf32>
    %c0_5 = arith.constant 0 : index
    %c0_6 = arith.constant 0 : index
    %5 = vector.load %arg5[%c0_5, %c0_6] : memref<3x128xf32, #tpu.memory_space<vmem>>, vector<3x128xf32>
    %6 = vector.extract_strided_slice %4 {offsets = [0, 0], sizes = [512, 1], strides = [1, 1]} : vector<512x3xf32> to vector<512x1xf32>
    %7 = vector.extract_strided_slice %5 {offsets = [0, 0], sizes = [1, 128], strides = [1, 1]} : vector<3x128xf32> to vector<1x128xf32>
    %8 = vector.broadcast %6 : vector<512x1xf32> to vector<512x128xf32>
    %9 = vector.broadcast %7 : vector<1x128xf32> to vector<512x128xf32>
    %10 = arith.mulf %8, %9 : vector<512x128xf32>
    %11 = arith.addf %3, %10 : vector<512x128xf32>
    %12 = vector.extract_strided_slice %4 {offsets = [0, 1], sizes = [512, 1], strides = [1, 1]} : vector<512x3xf32> to vector<512x1xf32>
    %13 = vector.extract_strided_slice %5 {offsets = [1, 0], sizes = [1, 128], strides = [1, 1]} : vector<3x128xf32> to vector<1x128xf32>
    %14 = vector.broadcast %12 : vector<512x1xf32> to vector<512x128xf32>
    %15 = vector.broadcast %13 : vector<1x128xf32> to vector<512x128xf32>
    %16 = arith.mulf %14, %15 : vector<512x128xf32>
    %17 = arith.addf %11, %16 : vector<512x128xf32>
    %18 = vector.extract_strided_slice %4 {offsets = [0, 2], sizes = [512, 1], strides = [1, 1]} : vector<512x3xf32> to vector<512x1xf32>
    %19 = vector.extract_strided_slice %5 {offsets = [2, 0], sizes = [1, 128], strides = [1, 1]} : vector<3x128xf32> to vector<1x128xf32>
    %20 = vector.broadcast %18 : vector<512x1xf32> to vector<512x128xf32>
    %21 = vector.broadcast %19 : vector<1x128xf32> to vector<512x128xf32>
    %22 = arith.mulf %20, %21 : vector<512x128xf32>
    %23 = arith.addf %17, %22 : vector<512x128xf32>
    %c0_7 = arith.constant 0 : index
    %c0_8 = arith.constant 0 : index
    %24 = vector.load %arg6[%c0_7, %c0_8] : memref<1x128xf32, #tpu.memory_space<vmem>>, vector<1x128xf32>
    %25 = vector.broadcast %24 : vector<1x128xf32> to vector<512x128xf32>
    %26 = arith.addf %23, %25 : vector<512x128xf32>
    %cst_9 = arith.constant 0.000000e+00 : f32
    %27 = vector.broadcast %cst_9 : f32 to vector<512x128xf32>
    %28 = arith.maximumf %26, %27 : vector<512x128xf32>
    %29 = arith.truncf %28 : vector<512x128xf32> to vector<512x128xbf16>
    %c0_10 = arith.constant 0 : index
    %c0_11 = arith.constant 0 : index
    %30 = vector.load %arg7[%c0_10, %c0_11] : memref<128x128xbf16, #tpu.memory_space<vmem>>, vector<128x128xbf16>
    %cst_12 = arith.constant dense<0.000000e+00> : vector<512x128xf32>
    %31 = tpu.matmul %29, %30, %cst_12 {dimension_numbers = #tpu.dot_dimension_numbers<[1], [0], [0], [1], [0, 0, 1, 1], [], []>} : vector<512x128xbf16>, vector<128x128xbf16>, vector<512x128xf32> -> vector<512x128xf32>
    %c0_13 = arith.constant 0 : index
    %c0_14 = arith.constant 0 : index
    %32 = vector.load %arg8[%c0_13, %c0_14] : memref<1x128xf32, #tpu.memory_space<vmem>>, vector<1x128xf32>
    %33 = vector.broadcast %32 : vector<1x128xf32> to vector<512x128xf32>
    %34 = arith.addf %31, %33 : vector<512x128xf32>
    %c0_15 = arith.constant 0 : index
    %c0_16 = arith.constant 0 : index
    %35 = vector.load %arg3[%c0_15, %c0_16] : memref<512x1xi32, #tpu.memory_space<vmem>>, vector<512x1xi32>
    %c0_i32 = arith.constant 0 : i32
    %36 = vector.broadcast %c0_i32 : i32 to vector<512x1xi32>
    %37 = arith.cmpi eq, %35, %36 : vector<512x1xi32>
    %cst_17 = arith.constant 0xFF800000 : f32
    %38 = vector.shape_cast %37 : vector<512x1xi1> to vector<512x1xi1>
    %39 = vector.broadcast %38 : vector<512x1xi1> to vector<512x128xi1>
    %40 = vector.broadcast %cst_17 : f32 to vector<512x128xf32>
    %41 = arith.select %39, %34, %40 : vector<512x128xi1>, vector<512x128xf32>
    %cst_18 = arith.constant dense<0xFF800000> : vector<128xf32>
    %42 = vector.multi_reduction <maximumf>, %41, %cst_18 [0] : vector<512x128xf32> to vector<128xf32>
    %43 = vector.shape_cast %42 : vector<128xf32> to vector<1x128xf32>
    %c1_i32 = arith.constant 1 : i32
    %44 = vector.broadcast %c1_i32 : i32 to vector<512x1xi32>
    %45 = arith.cmpi eq, %35, %44 : vector<512x1xi32>
    %cst_19 = arith.constant 0xFF800000 : f32
    %46 = vector.shape_cast %45 : vector<512x1xi1> to vector<512x1xi1>
    %47 = vector.broadcast %46 : vector<512x1xi1> to vector<512x128xi1>
    %48 = vector.broadcast %cst_19 : f32 to vector<512x128xf32>
    %49 = arith.select %47, %34, %48 : vector<512x128xi1>, vector<512x128xf32>
    %cst_20 = arith.constant dense<0xFF800000> : vector<128xf32>
    %50 = vector.multi_reduction <maximumf>, %49, %cst_20 [0] : vector<512x128xf32> to vector<128xf32>
    %51 = vector.shape_cast %50 : vector<128xf32> to vector<1x128xf32>
    %52 = tpu.concatenate %43, %51 in 0 : vector<1x128xf32>, vector<1x128xf32> -> vector<2x128xf32>
    %53 = vector.shape_cast %52 : vector<2x128xf32> to vector<1x2x128xf32>
    %c0_21 = arith.constant 0 : index
    %c0_22 = arith.constant 0 : index
    %c0_23 = arith.constant 0 : index
    %54 = vector.load %arg9[%c0_21, %c0_22, %c0_23] : memref<1x2x128xf32, #tpu.memory_space<vmem>>, vector<1x2x128xf32>
    tpu.vector_store %arg9[%c0_21, %c0_22, %c0_23], %53 {strides = array<i32>} : memref<1x2x128xf32, #tpu.memory_space<vmem>>, vector<1x2x128xf32>,
    return
  }
  func.func @transform_0(%arg0: i32) -> (i32, i32) {
    %c0_i32 = arith.constant 0 : i32
    %c0_i32_0 = arith.constant 0 : i32
    return %arg0, %c0_i32 : i32, i32
  }
  func.func @transform_1(%arg0: i32) -> (i32, i32) {
    %c0_i32 = arith.constant 0 : i32
    %c0_i32_0 = arith.constant 0 : i32
    return %arg0, %c0_i32 : i32, i32
  }
  func.func @transform_2(%arg0: i32) -> (i32, i32) {
    %c0_i32 = arith.constant 0 : i32
    %c0_i32_0 = arith.constant 0 : i32
    return %arg0, %c0_i32 : i32, i32
  }
  func.func @transform_3(%arg0: i32) -> (i32, i32) {
    %c0_i32 = arith.constant 0 : i32
    %c0_i32_0 = arith.constant 0 : i32
    %c0_i32_1 = arith.constant 0 : i32
    return %c0_i32, %c0_i32_0 : i32, i32
  }
  func.func @transform_4(%arg0: i32) -> (i32, i32) {
    %c0_i32 = arith.constant 0 : i32
    %c0_i32_0 = arith.constant 0 : i32
    %c0_i32_1 = arith.constant 0 : i32
    return %c0_i32, %c0_i32_0 : i32, i32
  }
  func.func @transform_5(%arg0: i32) -> (i32, i32) {
    %c0_i32 = arith.constant 0 : i32
    %c0_i32_0 = arith.constant 0 : i32
    %c0_i32_1 = arith.constant 0 : i32
    return %c0_i32, %c0_i32_0 : i32, i32
  }
  func.func @transform_6(%arg0: i32) -> (i32, i32) {
    %c0_i32 = arith.constant 0 : i32
    %c0_i32_0 = arith.constant 0 : i32
    %c0_i32_1 = arith.constant 0 : i32
    return %c0_i32, %c0_i32_0 : i32, i32
  }
  func.func @transform_7(%arg0: i32) -> (i32, i32) {
    %c0_i32 = arith.constant 0 : i32
    %c0_i32_0 = arith.constant 0 : i32
    %c0_i32_1 = arith.constant 0 : i32
    return %c0_i32, %c0_i32_0 : i32, i32
  }
  func.func @transform_8(%arg0: i32) -> (i32, i32, i32) {
    %c0_i32 = arith.constant 0 : i32
    %c0_i32_0 = arith.constant 0 : i32
    %c0_i32_1 = arith.constant 0 : i32
    return %arg0, %c0_i32, %c0_i32_0 : i32, i32, i32
  }
}

</mosaic_0001>

<bundles_post_ra>
// kernel: tpu_custom_call.1
= control target key start
LH: loop header
LB: loop body
LE: loop exit
PB: predicated region body
PF: predicated region fallthrough
CT: control target
= control target key end

     0   :  { %13 = vsyncpa [#allocation3], 0  ;;  %s6440_s0 = inlined_call_operand.vmem [shape: f32[2048,61], index: 0, kind: input, shape index: {}]   ;;  %s6441_s1 = inlined_call_operand.vmem [shape: f32[2048,3], index: 1, kind: input, shape index: {}]   ;;  %s6442_s2 = inlined_call_operand.vmem [shape: s32[2048,1], index: 2, kind: input, shape index: {}]   ;;  %s6443_s3 = inlined_call_operand.vmem [shape: bf16[61,128], index: 3, kind: input, shape index: {}]   ;;  %s6444_s4 = inlined_call_operand.vmem [shape: f32[3,128], index: 4, kind: input, shape index: {}]   ;;  %s6445_s5 = inlined_call_operand.vmem [shape: f32[1,128], index: 5, kind: input, shape index: {}]   ;;  %s6446_s6 = inlined_call_operand.vmem [shape: bf16[128,128], index: 6, kind: input, shape index: {}]   ;;  %s6447_s7 = inlined_call_operand.vmem [shape: f32[1,128], index: 7, kind: input, shape index: {}]   ;;  %s6448_s8 = inlined_call_operand.hbm [shape: f32[4,2,128], index: 8, kind: output, shape index: {}]  }
   0x1   :  { %15 = vsyncpa [#allocation3 + $0x1], 0  ;;  %s3932_s27 = smov 0   ;;  %s3934_s28 = smov 0  }
   0x2   :  { %s3936_s29 = smov 0   ;;  %s3938_s30 = smov 0  }
   0x3 LB: > { %s3953_s9 = sadd.s32 4294967295, %s3881_s30   ;;  %s3572_s10 = sadd.s32 4294967294, %s3881_s30   ;;  %s3881_s30 = sphi %s3938_s30, %s6823_s30   ;;  %s3877_s29 = sphi %s3936_s29, %s6822_s29   ;;  %s3873_s28 = sphi %s3934_s28, %s6821_s28   ;;  %s3869_s27 = sphi %s3932_s27, %s6820_s27  }
   0x4   : > { %s3957_s11 = sadd.s32 1, %s3881_s30   ;;  %s211_s12 = sadd.s32 1, %s3877_s29 }
   0x5   : > { %s208_s13 = ssub.s32 %s3881_s30, %s3957_s11  ;;  %p221_p0 = scmp.ne.s32.totalorder %s3877_s29, %s3873_s28 }
   0x6   : > { %p209_p1 = scmp.eq.s32.totalorder %s208_s13, 0  ;;  %p222_p2 = scmp.eq.s32.totalorder %s3953_s9, 3 }
   0x7   : > { %p227_p3 = scmp.ne.s32.totalorder %s3873_s28, %s3869_s27  ;;  %p228_p4 = scmp.eq.s32.totalorder %s3572_s10, 3 }
   0x8   : > { %s3968_s14 = scalar_select %p209_p1, %s3877_s29, %s211_s12  }
   0x9   : > { %p3970_p5 = por %p222_p2, %p221_p0  ;;  %p3974_p6 = por %p228_p4, %p227_p3 }
   0xa   : > { %p3575_p7 = scmp.ge.s32.totalorder %s3881_s30, 1  ;;  %p288_p8 = scmp.lt.s32.totalorder %s3881_s30, 5 }
   0xc   : > { %p289_p9 = pnand %p3575_p7, %p288_p8 }
   0xe   : > { %292 = sbr.rel (%p289_p9) target bundleno = 1026 (0x402), region = 52 }
  0x13   : > { %v3597_v0 = vld [vmem:[%s6443_s3 + $0x18] sm:$0xf]  ;;  %v3670_v1 = vld [vmem:[%s6443_s3 + $0x18] sm:$0x70]  ;;  %vm1025_vm0 = vcmask 1045504   ;;  %vm1026_vm1 = vcmask 1046528  }
  0x14   : > { %v3598_v2 = vor.u32 %v3670_v1, %v3597_v0  ;;  %s3577_s21 = sshll.u32 %s3953_s9, 6  ;;  %v3883_v3 = vmov 65535   ;;  %v6451_v5 = vmov 1   ;;  %v6449_v6 = vmov 0   ;;  %v3669_v9 = vld [vmem:[%s6443_s3 + $0x10] sm:$0xff]  ;;  %v3668_v12 = vld [vmem:[%s6443_s3 + $0x8] sm:$0xff] }
  0x15   : > { %v1027_v4 = vsel %vm1025_vm0, 4294967295, %v3883_v3  ;;  %3738 = vset.pattern.permute.xlu0 %v6451_v5  ;;  %3735 = vset.pattern.permute.xlu2 %v6449_v6  ;;  %p333_p10 = scmp.lt.s32.totalorder %s3577_s21, 255  ;;  %v3667_v14 = vld [vmem:[%s6443_s3] sm:$0xff]  ;;  %vm928_vm2 = vcmask 498688   ;;  %s329_s18 = sand.u32 1, %s3873_s28  }
  0x16   : > { %v1028_v7 = vsel %vm1026_vm1, %v1027_v4, 0  ;;  %3734 = vset.pattern.permute.xlu1 %v6449_v6  ;;  %s3664_s20 = sshll.u32 %s3953_s9, 1  ;;  %s3474_s9 = scalar_lea.sflag [#allocation3], %s329_s18 }
  0x17   : > { %v1030_v8 = vand.u32 %v3598_v2, %v1028_v7  ;;  %s6825_s21 = smov (!%p333_p10, %s3577_s21), 255 }
  0x18   : > { %s3990_s22 = sshll.u32 %s6825_s21, 3 }
  0x19   : > { %1036 = vmatpush.bf16.msra.mxu0 %v1030_v8  ;;  %3679 = vmatpush.bf16.msra.mxu3 %v1030_v8  ;;  %s3999_s10 = scalar_lea.vmem %s6441_s1, %s3990_s22  ;;  %s4017_s19 = scalar_lea.vmem %s6440_s0, %s3990_s22 }
  0x1a   : > { %v4002_v10 = vld [vmem:[%s3999_s10 + $0x20] sm:$0xff]  ;;  %v4005_v11 = vld [vmem:[%s3999_s10 + $0x10] sm:$0xff]  ;;  %v4020_v13 = vld [vmem:[%s3999_s10 + $0x28] sm:$0xff]  ;;  %s4973_s23 = scalar_lea.vmem %s6442_s2, %s3990_s22  ;;  %s3484_s22 = scalar_lea.hbm %s6448_s8, %s3664_s20 }
  0x1b   : > { %542 = vperm.xlu2 %3735, %v4002_v10   ;;  %1210 = vperm.xlu0 %3738, %v4005_v11   ;;  %v4026_v15 = vld [vmem:[%s3999_s10 + $0x38] sm:$0xff]  ;;  %v351_v16 = vld [vmem:[%s4017_s19] sm:$0xff]  ;;  %v352_v17 = vld [vmem:[%s4017_s19 + $0x8] sm:$0xff]  ;;  %s3488_s25 = sshll.u32 %s3484_s22, 4  ;;  %s3489_s25 = int_to_ptr.hbm [resolvable:$true] %s3488_s25 }
  0x1c   : > { %532 = vperm.xlu1 %3734, %v4005_v11   ;;  %v4031_v18 = vld [vmem:[%s3999_s10 + $0x18] sm:$0xff]  ;;  %v385_v19 = vld [vmem:[%s4017_s19 + $0x110] sm:$0xff]  ;;  %v415_v21 = vpack.c.bf16 %v352_v17, %v351_v16  ;;  %v4041_v23 = vld [vmem:[%s3999_s10 + $0x40] sm:$0xff]  ;;  %s3833_s26 = sshra.s32 %s3489_s25, 4  ;;  %s3834_s26 = int_to_ptr.hbm [resolvable:$true] %s3833_s26 }
  0x1d   : > { %1037 = vmatpush.bf16.msra.mxu0 %v3669_v9  ;;  %3680 = vmatpush.bf16.msra.mxu3 %v3669_v9  ;;  %v386_v20 = vld [vmem:[%s4017_s19 + $0x118] sm:$0xff]  ;;  %v4044_v24 = vld [vmem:[%s3999_s10 + $0x50] sm:$0xff]  ;;  %v4053_v26 = vld [vmem:[%s3999_s10 + $0x68] sm:$0xff]  ;;  %s3835_s12 = scalar_lea.hbm %s3834_s26, 2  ;;  %p3840_p0 = scmp.lt.s32.totalorder %s3834_s26, %s6448_s8 }
  0x1e   : > { %v432_v22 = vpack.c.bf16 %v386_v20, %v385_v19  ;;  %v4050_v25 = vld [vmem:[%s3999_s10 + $0x58] sm:$0xff]  ;;  %v353_v27 = vld [vmem:[%s4017_s19 + $0x10] sm:$0xff]  ;;  %v387_v29 = vld [vmem:[%s4017_s19 + $0x120] sm:$0xff]  ;;  %p3836_p11 = scmp.ne.s32.totalorder %s3834_s26, %s3835_s12 }
  0x1f   : > { %v354_v28 = vld [vmem:[%s4017_s19 + $0x18] sm:$0xff]  ;;  %v388_v30 = vld [vmem:[%s4017_s19 + $0x128] sm:$0xff]  ;;  %v4065_v33 = vld [vmem:[%s3999_s10 + $0x70] sm:$0xff] }
  0x20   : > { %v416_v31 = vpack.c.bf16 %v354_v28, %v353_v27  ;;  %v433_v32 = vpack.c.bf16 %v388_v30, %v387_v29  ;;  %v4068_v34 = vld [vmem:[%s3999_s10 + $0x80] sm:$0xff]  ;;  %v4074_v35 = vld [vmem:[%s3999_s10 + $0x88] sm:$0xff]  ;;  %v4077_v36 = vld [vmem:[%s3999_s10 + $0x98] sm:$0xff]  ;;  %p3837_p12 = pnand %p3836_p11, %p3970_p5 }
  0x21   : > { %1038 = vmatpush.bf16.msra.mxu0 %v3668_v12  ;;  %3681 = vmatpush.bf16.msra.mxu3 %v3668_v12  ;;  %v355_v37 = vld [vmem:[%s4017_s19 + $0x20] sm:$0xff]  ;;  %v356_v38 = vld [vmem:[%s4017_s19 + $0x28] sm:$0xff]  ;;  %v389_v39 = vld [vmem:[%s4017_s19 + $0x130] sm:$0xff] }
  0x22   : > { %v390_v40 = vld [vmem:[%s4017_s19 + $0x138] sm:$0xff]  ;;  %v417_v41 = vpack.c.bf16 %v356_v38, %v355_v37  ;;  %v4089_v43 = vld [vmem:[%s3999_s10 + $0xa0] sm:$0xff]  ;;  %v4092_v44 = vld [vmem:[%s3999_s10 + $0xb0] sm:$0xff]  ;;  %p3838_p13 = pneg %p3837_p12 }
  0x23   : > { %547 = vperm.xlu2 %3735, %v4020_v13   ;;  %1230 = vperm.xlu0 %3738, %v4026_v15   ;;  %v434_v42 = vpack.c.bf16 %v390_v40, %v389_v39  ;;  %v4098_v45 = vld [vmem:[%s3999_s10 + $0xb8] sm:$0xff]  ;;  %v4101_v46 = vld [vmem:[%s3999_s10 + $0xc8] sm:$0xff]  ;;  %v357_v47 = vld [vmem:[%s4017_s19 + $0x30] sm:$0xff] }
  0x24   : > { %537 = vperm.xlu1 %3734, %v4031_v18   ;;  %v358_v48 = vld [vmem:[%s4017_s19 + $0x38] sm:$0xff]  ;;  %v391_v49 = vld [vmem:[%s4017_s19 + $0x140] sm:$0xff]  ;;  %v392_v50 = vld [vmem:[%s4017_s19 + $0x148] sm:$0xff] }
  0x25   : > { %1039 = vmatpush.bf16.msra.mxu0 %v3667_v14  ;;  %3682 = vmatpush.bf16.msra.mxu3 %v3667_v14  ;;  %v418_v51 = vpack.c.bf16 %v358_v48, %v357_v47  ;;  %v435_v52 = vpack.c.bf16 %v392_v50, %v391_v49  ;;  %v4113_v53 = vld [vmem:[%s3999_s10 + $0xd0] sm:$0xff]  ;;  %v4116_v54 = vld [vmem:[%s3999_s10 + $0xe0] sm:$0xff]  ;;  %v4122_v55 = vld [vmem:[%s3999_s10 + $0xe8] sm:$0xff] }
  0x26   : > { %v4125_v56 = vld [vmem:[%s3999_s10 + $0xf8] sm:$0xff]  ;;  %v359_v57 = vld [vmem:[%s4017_s19 + $0x40] sm:$0xff]  ;;  %v360_v58 = vld [vmem:[%s4017_s19 + $0x48] sm:$0xff] }
  0x27   : > { %v393_v59 = vld [vmem:[%s4017_s19 + $0x150] sm:$0xff]  ;;  %v394_v60 = vld [vmem:[%s4017_s19 + $0x158] sm:$0xff]  ;;  %v419_v61 = vpack.c.bf16 %v360_v58, %v359_v57  ;;  %v4137_v63 = vld [vmem:[%s3999_s10 + $0x100] sm:$0xff] }
  0x28   : > { %3599 = vmatmul.msk.bf16.vlgmr.msra.gmra.mxu0 %vm928_vm2, %v415_v21  ;;  %3616 = vmatmul.msk.bf16.vlgmr.msra.gmra.mxu3 %vm928_vm2, %v432_v22  ;;  %v436_v62 = vpack.c.bf16 %v394_v60, %v393_v59  ;;  %v4140_v0 = vld [vmem:[%s3999_s10 + $0x110] sm:$0xff]  ;;  %v4146_v1 = vld [vmem:[%s3999_s10 + $0x118] sm:$0xff]  ;;  %v4149_v2 = vld [vmem:[%s3999_s10 + $0x128] sm:$0xff] }
  0x29   : > { %v361_v3 = vld [vmem:[%s4017_s19 + $0x50] sm:$0xff]  ;;  %v362_v4 = vld [vmem:[%s4017_s19 + $0x58] sm:$0xff]  ;;  %v395_v7 = vld [vmem:[%s4017_s19 + $0x160] sm:$0xff] }
  0x2a   : > { %v396_v8 = vld [vmem:[%s4017_s19 + $0x168] sm:$0xff]  ;;  %v420_v9 = vpack.c.bf16 %v362_v4, %v361_v3  ;;  %v4163_v16 = vld [vmem:[%s3999_s10 + $0x130] sm:$0xff]  ;;  %v4166_v17 = vld [vmem:[%s3999_s10 + $0x140] sm:$0xff] }
  0x2b   : > { %562 = vperm.xlu2 %3735, %v4041_v23   ;;  %1242 = vperm.xlu0 %3738, %v4044_v24   ;;  %v437_v12 = vpack.c.bf16 %v396_v8, %v395_v7  ;;  %v4174_v20 = vld [vmem:[%s3999_s10 + $0x148] sm:$0xff]  ;;  %v4177_v21 = vld [vmem:[%s3999_s10 + $0x158] sm:$0xff]  ;;  %v363_v22 = vld [vmem:[%s4017_s19 + $0x60] sm:$0xff] }
  0x2c   : > { %557 = vperm.xlu1 %3734, %v4026_v15   ;;  %v364_v27 = vld [vmem:[%s4017_s19 + $0x68] sm:$0xff]  ;;  %v397_v28 = vld [vmem:[%s4017_s19 + $0x170] sm:$0xff]  ;;  %v398_v29 = vld [vmem:[%s4017_s19 + $0x178] sm:$0xff] }
  0x2d   : > { %v421_v30 = vpack.c.bf16 %v364_v27, %v363_v22  ;;  %v4191_v37 = vld [vmem:[%s3999_s10 + $0x160] sm:$0xff]  ;;  %v4194_v38 = vld [vmem:[%s3999_s10 + $0x170] sm:$0xff]  ;;  %v504_v47 = vld [vmem:[%s3999_s10 + $0x188] sm:$0xff] }
  0x2e   : > { %6481 = vst [vmem:[#allocation6_spill] sm:$0xff] %v4194_v38  ;;  %v365_v48 = vld [vmem:[%s4017_s19 + $0x70] sm:$0xff]  ;;  %v366_v49 = vld [vmem:[%s4017_s19 + $0x78] sm:$0xff]  ;;  %v399_v50 = vld [vmem:[%s4017_s19 + $0x180] sm:$0xff] }
  0x2f   : > { %v4235_v8 = vld [vmem:[%s3999_s10 + $0x1a8] sm:$0xff]  ;;  %v401_v27 = vld [vmem:[%s4017_s19 + $0x190] sm:$0xff] }
  0x30   : > { %v368_v22 = vld [vmem:[%s4017_s19 + $0x88] sm:$0xff] }
  0x33   : > { %577 = vperm.xlu2 %3735, %v4050_v25   ;;  %1254 = vperm.xlu0 %3738, %v4053_v26  }
  0x34   : > { %572 = vperm.xlu1 %3734, %v4044_v24  }
  0x38   : > { %3600 = vmatmul.msk.bf16.gmra.mxu0 %vm928_vm2, %v416_v31  ;;  %3617 = vmatmul.msk.bf16.gmra.mxu3 %vm928_vm2, %v433_v32  ;;  %v438_v31 = vpack.c.bf16 %v398_v29, %v397_v28  ;;  %v402_v28 = vld [vmem:[%s4017_s19 + $0x198] sm:$0xff] }
  0x3b   : > { %592 = vperm.xlu2 %3735, %v4065_v33   ;;  %1266 = vperm.xlu0 %3738, %v4068_v34  }
  0x3c   : > { %587 = vperm.xlu1 %3734, %v4053_v26  }
  0x43   : > { %607 = vperm.xlu2 %3735, %v4074_v35   ;;  %1278 = vperm.xlu0 %3738, %v4077_v36  }
  0x44   : > { %602 = vperm.xlu1 %3734, %v4068_v34  }
  0x48   : > { %3601 = vmatmul.msk.bf16.gmra.mxu0 %vm928_vm2, %v417_v41  ;;  %3618 = vmatmul.msk.bf16.gmra.mxu3 %vm928_vm2, %v434_v42  ;;  %v4206_v42 = vld [vmem:[%s3999_s10 + $0x178] sm:$0xff] }
  0x4b   : > { %622 = vperm.xlu2 %3735, %v4089_v43   ;;  %1290 = vperm.xlu0 %3738, %v4092_v44  }
  0x4c   : > { %617 = vperm.xlu1 %3734, %v4077_v36  }
  0x53   : > { %637 = vperm.xlu2 %3735, %v4098_v45   ;;  %1302 = vperm.xlu0 %3738, %v4101_v46  }
  0x54   : > { %632 = vperm.xlu1 %3734, %v4092_v44  }
  0x58   : > { %3602 = vmatmul.msk.bf16.gmra.mxu0 %vm928_vm2, %v418_v51  ;;  %3619 = vmatmul.msk.bf16.gmra.mxu3 %vm928_vm2, %v435_v52  ;;  %v400_v51 = vld [vmem:[%s4017_s19 + $0x188] sm:$0xff]  ;;  %v422_v52 = vpack.c.bf16 %v366_v49, %v365_v48  ;;  %v4252_v49 = vld [vmem:[%s3999_s10 + $0x1c0] sm:$0xff] }
  0x59   : > { %v439_v57 = vpack.c.bf16 %v400_v51, %v399_v50  ;;  %v513_v50 = vld [vmem:[%s3999_s10 + $0x1d0] sm:$0xff] }
  0x5b   : > { %652 = vperm.xlu2 %3735, %v4113_v53   ;;  %1314 = vperm.xlu0 %3738, %v4116_v54  }
  0x5c   : > { %647 = vperm.xlu1 %3734, %v4101_v46  }
  0x63   : > { %667 = vperm.xlu2 %3735, %v4122_v55   ;;  %1326 = vperm.xlu0 %3738, %v4125_v56  }
  0x64   : > { %662 = vperm.xlu1 %3734, %v4116_v54  }
  0x68   : > { %3603 = vmatmul.msk.bf16.gmra.mxu0 %vm928_vm2, %v419_v61  ;;  %3620 = vmatmul.msk.bf16.gmra.mxu3 %vm928_vm2, %v436_v62  ;;  %v4224_v61 = vld [vmem:[%s3999_s10 + $0x190] sm:$0xff]  ;;  %v507_v62 = vld [vmem:[%s3999_s10 + $0x1a0] sm:$0xff] }
  0x6b   : > { %682 = vperm.xlu2 %3735, %v4137_v63   ;;  %1338 = vperm.xlu0 %3738, %v4140_v0  }
  0x6c   : > { %677 = vperm.xlu1 %3734, %v4125_v56  }
  0x73   : > { %697 = vperm.xlu2 %3735, %v4146_v1   ;;  %1350 = vperm.xlu0 %3738, %v4149_v2  }
  0x74   : > { %692 = vperm.xlu1 %3734, %v4140_v0  }
  0x75   : > { %v4158_v14 = vpop.permute.xlu2 %542 }
  0x78   : > { %3604 = vmatmul.msk.bf16.gmra.mxu0 %vm928_vm2, %v420_v9  ;;  %3621 = vmatmul.msk.bf16.gmra.mxu3 %vm928_vm2, %v437_v12  ;;  %v510_v9 = vld [vmem:[%s3999_s10 + $0x1b8] sm:$0xff]  ;;  %v367_v12 = vld [vmem:[%s4017_s19 + $0x80] sm:$0xff] }
  0x79   : > { %v423_v29 = vpack.c.bf16 %v368_v22, %v367_v12  ;;  %v516_v12 = vld [vmem:[%s3999_s10 + $0x1e8] sm:$0xff]  ;;  %v369_v22 = vld [vmem:[%s4017_s19 + $0x90] sm:$0xff] }
  0x7b   : > { %712 = vperm.xlu2 %3735, %v4163_v16   ;;  %1362 = vperm.xlu0 %3738, %v4166_v17  }
  0x7c   : > { %707 = vperm.xlu1 %3734, %v4149_v2  }
  0x7d   : > { %v4171_v19 = vpop.permute.xlu2 %547 }
  0x83   : > { %727 = vperm.xlu2 %3735, %v4174_v20   ;;  %1374 = vperm.xlu0 %3738, %v4177_v21  }
  0x84   : > { %722 = vperm.xlu1 %3734, %v4166_v17  }
  0x85   : > { %v4186_v32 = vpop.permute.xlu2 %562 }
  0x86   : > { %6480 = vst [vmem:[#allocation5_spill] sm:$0xff] %v4186_v32 }
  0x88   : > { %3605 = vmatmul.msk.bf16.gmra.mxu0 %vm928_vm2, %v421_v30  ;;  %3622 = vmatmul.msk.bf16.gmra.mxu3 %vm928_vm2, %v438_v31  ;;  %v440_v30 = vpack.c.bf16 %v402_v28, %v401_v27  ;;  %v370_v27 = vld [vmem:[%s4017_s19 + $0x98] sm:$0xff]  ;;  %v403_v28 = vld [vmem:[%s4017_s19 + $0x1a0] sm:$0xff] }
  0x8b   : > { %742 = vperm.xlu2 %3735, %v4191_v37   ;;  %1386 = vperm.xlu0 %3738, %v4194_v38  }
  0x8c   : > { %737 = vperm.xlu1 %3734, %v4177_v21  }
  0x8d   : > { %v4199_v39 = vpop.permute.xlu2 %577  ;;  %v4201_v40 = vpop.permute.xlu0 %1210 }
  0x8e   : > { %6482 = vst [vmem:[#allocation7_spill] sm:$0xff] %v4201_v40  ;;  %v4203_v41 = vpop.permute.xlu1 %532  ;;  %v6567_v40 = vmov 0  }
  0x93   : > { %757 = vperm.xlu2 %3735, %v4206_v42   ;;  %1398 = vperm.xlu0 %3738, %v504_v47  }
  0x94   : > { %752 = vperm.xlu1 %3734, %v4194_v38   ;;  %v4580_v38 = vld [vmem:[%s3999_s10 + $0x1b0] sm:$0xff] }
  0x95   : > { %v4215_v58 = vpop.permute.xlu2 %592  ;;  %v4217_v59 = vpop.permute.xlu0 %1230  ;;  %6559 = vst [vmem:[#allocation83_spill] sm:$0xff] %v4580_v38 }
  0x96   : > { %6483 = vst [vmem:[#allocation8_spill] sm:$0xff] %v4215_v58  ;;  %v4219_v60 = vpop.permute.xlu1 %537  ;;  %v4280_v58 = vld [vmem:[%s3999_s10 + $0x1f0] sm:$0xff] }
  0x97   : > { %6484 = vst [vmem:[#allocation9_spill] sm:$0xff] %v4217_v59 }
  0x98   : > { %6485 = vst [vmem:[#allocation10_spill] sm:$0xff] %v4219_v60  ;;  %3606 = vmatmul.msk.bf16.gmra.mxu0 %vm928_vm2, %v422_v52  ;;  %3623 = vmatmul.msk.bf16.gmra.mxu3 %vm928_vm2, %v439_v57 }
  0x9b   : > { %772 = vperm.xlu2 %3735, %v4224_v61   ;;  %1410 = vperm.xlu0 %3738, %v507_v62  }
  0x9c   : > { %767 = vperm.xlu1 %3734, %v504_v47  }
  0x9d   : > { %v4228_v3 = vpop.permute.xlu2 %607  ;;  %v4230_v4 = vpop.permute.xlu0 %1242 }
  0x9e   : > { %6486 = vst [vmem:[#allocation11_spill] sm:$0xff] %v4228_v3  ;;  %v4232_v7 = vpop.permute.xlu1 %557 }
  0x9f   : > { %6487 = vst [vmem:[#allocation12_spill] sm:$0xff] %v4232_v7 }
  0xa3   : > { %787 = vperm.xlu2 %3735, %v4235_v8   ;;  %1422 = vperm.xlu0 %3738, %v510_v9  }
  0xa4   : > { %782 = vperm.xlu1 %3734, %v507_v62   ;;  %v4263_v62 = vld [vmem:[%s3999_s10 + $0x1d8] sm:$0xff] }
  0xa5   : > { %v4243_v31 = vpop.permute.xlu2 %622  ;;  %v4245_v47 = vpop.permute.xlu0 %1254 }
  0xa6   : > { %6488 = vst [vmem:[#allocation13_spill] sm:$0xff] %v4243_v31  ;;  %v4247_v48 = vpop.permute.xlu1 %572 }
  0xa7   : > { %6489 = vst [vmem:[#allocation14_spill] sm:$0xff] %v4245_v47  ;;  %v406_v47 = vld [vmem:[%s4017_s19 + $0x1b8] sm:$0xff] }
  0xa8   : > { %3607 = vmatmul.msk.bf16.gmra.mxu0 %vm928_vm2, %v423_v29  ;;  %3624 = vmatmul.msk.bf16.gmra.mxu3 %vm928_vm2, %v440_v30  ;;  %v404_v29 = vld [vmem:[%s4017_s19 + $0x1a8] sm:$0xff]  ;;  %v424_v30 = vpack.c.bf16 %v370_v27, %v369_v22  ;;  %v4283_v22 = vld [vmem:[%s3999_s10] sm:$0xff] }
  0xab   : > { %802 = vperm.xlu2 %3735, %v4252_v49   ;;  %1434 = vperm.xlu0 %3738, %v513_v50  }
  0xac   : > { %797 = vperm.xlu1 %3734, %v510_v9   ;;  %v441_v9 = vpack.c.bf16 %v404_v29, %v403_v28 }
  0xad   : > { %v4256_v51 = vpop.permute.xlu2 %637  ;;  %v4258_v52 = vpop.permute.xlu0 %1266 }
  0xae   : > { %6490 = vst [vmem:[#allocation15_spill] sm:$0xff] %v4256_v51  ;;  %v4260_v57 = vpop.permute.xlu1 %587 }
  0xaf   : > { %6491 = vst [vmem:[#allocation16_spill] sm:$0xff] %v4258_v52 }
  0xb0   : > { %6492 = vst [vmem:[#allocation17_spill] sm:$0xff] %v4260_v57  ;;  %v6499_v57 = vmov 1  }
  0xb3   : > { %817 = vperm.xlu2 %3735, %v4263_v62   ;;  %1446 = vperm.xlu0 %3738, %v516_v12  }
  0xb4   : > { %812 = vperm.xlu1 %3734, %v513_v50   ;;  %v6453_v50 = vmov 2  }
  0xb5   : > { %v4271_v6 = vpop.permute.xlu2 %652  ;;  %v4273_v5 = vpop.permute.xlu0 %1278 }
  0xb6   : > { %6493 = vst [vmem:[#allocation18_spill] sm:$0xff] %v4271_v6  ;;  %v4275_v31 = vpop.permute.xlu1 %602  ;;  %v4297_v6 = vld [vmem:[%s3999_s10 + $0x8] sm:$0xff] }
  0xb7   : > { %6494 = vst [vmem:[#allocation19_spill] sm:$0xff] %v4273_v5  ;;  %v405_v5 = vld [vmem:[%s4017_s19 + $0x1b0] sm:$0xff] }
  0xb8   : > { %6495 = vst [vmem:[#allocation20_spill] sm:$0xff] %v4275_v31  ;;  %3608 = vmatmul.msk.bf16.gmra.mxu0 %vm928_vm2, %v424_v30  ;;  %3625 = vmatmul.msk.bf16.gmra.mxu3 %vm928_vm2, %v441_v9  ;;  %v371_v30 = vld [vmem:[%s4017_s19 + $0xa0] sm:$0xff]  ;;  %v372_v9 = vld [vmem:[%s4017_s19 + $0xa8] sm:$0xff] }
  0xb9   : > { %v425_v32 = vpack.c.bf16 %v372_v9, %v371_v30  ;;  %v373_v9 = vld [vmem:[%s4017_s19 + $0xb0] sm:$0xff] }
  0xbb   : > { %832 = vperm.xlu2 %3735, %v4280_v58   ;;  %3739 = vset.pattern.permute.xlu0 %v6453_v50 }
  0xbc   : > { %827 = vperm.xlu1 %3734, %v516_v12   ;;  %1587 = vperm.xlu0 %3739, %v4283_v22   ;;  %v442_v12 = vpack.c.bf16 %v406_v47, %v405_v5 }
  0xbd   : > { %v4288_v27 = vpop.permute.xlu2 %667  ;;  %v4290_v28 = vpop.permute.xlu0 %1290 }
  0xbe   : > { %6496 = vst [vmem:[#allocation21_spill] sm:$0xff] %v4288_v27  ;;  %v4292_v29 = vpop.permute.xlu1 %617  ;;  %v4332_v27 = vpop.f32.mrf.mxu3 }
  0xbf   : > { %6497 = vst [vmem:[#allocation22_spill] sm:$0xff] %v4290_v28 }
  0xc0   : > { %6498 = vst [vmem:[#allocation23_spill] sm:$0xff] %v4292_v29 }
  0xc1   : > { %6506 = vst [vmem:[#allocation30_spill] sm:$0xff] %v4332_v27  ;;  %v4366_v27 = vld [vmem:[%s3999_s10 + $0x60] sm:$0xff] }
  0xc3   : > { %3737 = vset.pattern.permute.xlu2 %v6499_v57 }
  0xc4   : > { %3736 = vset.pattern.permute.xlu1 %v6499_v57  ;;  %1206 = vperm.xlu2 %3737, %v4297_v6   ;;  %v4314_v57 = vpop.f32.mrf.mxu0 }
  0xc5   : > { %1607 = vperm.xlu0 %3739, %v4020_v13   ;;  %1202 = vperm.xlu1 %3736, %v4283_v22   ;;  %v4306_v50 = vpop.permute.xlu2 %682  ;;  %v4308_v29 = vpop.permute.xlu0 %1302 }
  0xc6   : > { %6500 = vst [vmem:[#allocation24_spill] sm:$0xff] %v4306_v50  ;;  %v4310_v59 = vpop.permute.xlu1 %632  ;;  %v408_v50 = vld [vmem:[%s4017_s19 + $0x1c8] sm:$0xff] }
  0xc7   : > { %6501 = vst [vmem:[#allocation25_spill] sm:$0xff] %v4308_v29  ;;  %v374_v29 = vld [vmem:[%s4017_s19 + $0xb8] sm:$0xff] }
  0xc8   : > { %6502 = vst [vmem:[#allocation26_spill] sm:$0xff] %v4310_v59  ;;  %3609 = vmatmul.msk.bf16.gmra.mxu0 %vm928_vm2, %v425_v32  ;;  %3626 = vmatmul.msk.bf16.gmra.mxu3 %vm928_vm2, %v442_v12  ;;  %v4328_v32 = vld [vmem:[%s3999_s10 + $0x30] sm:$0xff]  ;;  %v407_v12 = vld [vmem:[%s4017_s19 + $0x1c0] sm:$0xff]  ;;  %v426_v7 = vpack.c.bf16 %v374_v29, %v373_v9  ;;  %v410_v59 = vld [vmem:[%s4017_s19 + $0x1d8] sm:$0xff] }
  0xc9   : > { %v443_v28 = vpack.c.bf16 %v408_v50, %v407_v12  ;;  %v4348_v50 = vld [vmem:[%s3999_s10 + $0x48] sm:$0xff] }
  0xcc   : > { %1218 = vperm.xlu2 %3737, %v4002_v10  }
  0xcd   : > { %1619 = vperm.xlu0 %3739, %v4041_v23   ;;  %1214 = vperm.xlu1 %3736, %v4031_v18   ;;  %v4319_v5 = vpop.permute.xlu2 %697  ;;  %v4321_v47 = vpop.permute.xlu0 %1314 }
  0xce   : > { %6503 = vst [vmem:[#allocation27_spill] sm:$0xff] %v4319_v5  ;;  %v4323_v30 = vpop.permute.xlu1 %647 }
  0xcf   : > { %6504 = vst [vmem:[#allocation28_spill] sm:$0xff] %v4321_v47  ;;  %v4341_v47 = vpop.f32.mrf.mxu0 }
  0xd0   : > { %6505 = vst [vmem:[#allocation29_spill] sm:$0xff] %v4323_v30 }
  0xd4   : > { %1226 = vperm.xlu2 %3737, %v4328_v32  }
  0xd5   : > { %1631 = vperm.xlu0 %3739, %v4050_v25   ;;  %1222 = vperm.xlu1 %3736, %v4020_v13   ;;  %v4337_v5 = vpop.permute.xlu2 %712  ;;  %v4339_v30 = vpop.permute.xlu0 %1326 }
  0xd6   : > { %6507 = vst [vmem:[#allocation31_spill] sm:$0xff] %v4337_v5  ;;  %v4343_v29 = vpop.permute.xlu1 %662 }
  0xd7   : > { %6508 = vst [vmem:[#allocation32_spill] sm:$0xff] %v4339_v30  ;;  %v4359_v30 = vpop.f32.mrf.mxu3  ;;  %v4361_v5 = vpop.f32.mrf.mxu0 }
  0xd8   : > { %6509 = vst [vmem:[#allocation33_spill] sm:$0xff] %v4343_v29  ;;  %3610 = vmatmul.msk.bf16.gmra.mxu0 %vm928_vm2, %v426_v7  ;;  %3627 = vmatmul.msk.bf16.gmra.mxu3 %vm928_vm2, %v443_v28  ;;  %v375_v7 = vld [vmem:[%s4017_s19 + $0xc0] sm:$0xff]  ;;  %v376_v28 = vld [vmem:[%s4017_s19 + $0xc8] sm:$0xff]  ;;  %v409_v29 = vld [vmem:[%s4017_s19 + $0x1d0] sm:$0xff] }
  0xd9   : > { %6513 = vst [vmem:[#allocation37_spill] sm:$0xff] %v4359_v30  ;;  %v427_v51 = vpack.c.bf16 %v376_v28, %v375_v7 }
  0xdc   : > { %1238 = vperm.xlu2 %3737, %v4348_v50  }
  0xdd   : > { %1643 = vperm.xlu0 %3739, %v4065_v33   ;;  %1234 = vperm.xlu1 %3736, %v4041_v23   ;;  %v4353_v13 = vpop.permute.xlu2 %727  ;;  %v4355_v9 = vpop.permute.xlu0 %1338  ;;  %v444_v23 = vpack.c.bf16 %v410_v59, %v409_v29  ;;  %v4382_v59 = vld [vmem:[%s3999_s10 + $0x78] sm:$0xff] }
  0xde   : > { %6510 = vst [vmem:[#allocation34_spill] sm:$0xff] %v4353_v13  ;;  %v4357_v12 = vpop.permute.xlu1 %677 }
  0xdf   : > { %6511 = vst [vmem:[#allocation35_spill] sm:$0xff] %v4355_v9  ;;  %v4384_v29 = vpop.f32.mrf.mxu3  ;;  %v4386_v7 = vpop.f32.mrf.mxu0 }
  0xe0   : > { %6512 = vst [vmem:[#allocation36_spill] sm:$0xff] %v4357_v12 }
  0xe1   : > { %6517 = vst [vmem:[#allocation41_spill] sm:$0xff] %v4384_v29  ;;  %v411_v29 = vld [vmem:[%s4017_s19 + $0x1e0] sm:$0xff] }
  0xe2   : > { %6518 = vst [vmem:[#allocation42_spill] sm:$0xff] %v4386_v7 }
  0xe4   : > { %1250 = vperm.xlu2 %3737, %v4366_v27  }
  0xe5   : > { %1655 = vperm.xlu0 %3739, %v4074_v35   ;;  %1246 = vperm.xlu1 %3736, %v4050_v25   ;;  %v4373_v12 = vpop.permute.xlu2 %742  ;;  %v4375_v13 = vpop.permute.xlu0 %1350 }
  0xe6   : > { %6514 = vst [vmem:[#allocation38_spill] sm:$0xff] %v4373_v12  ;;  %v4377_v9 = vpop.permute.xlu1 %692 }
  0xe7   : > { %6515 = vst [vmem:[#allocation39_spill] sm:$0xff] %v4375_v13  ;;  %v4400_v13 = vld [vmem:[%s3999_s10 + $0x90] sm:$0xff]  ;;  %v4404_v52 = vpop.f32.mrf.mxu3  ;;  %v4406_v31 = vpop.f32.mrf.mxu0 }
  0xe8   : > { %6516 = vst [vmem:[#allocation40_spill] sm:$0xff] %v4377_v9  ;;  %3611 = vmatmul.msk.bf16.gmra.mxu0 %vm928_vm2, %v427_v51  ;;  %3628 = vmatmul.msk.bf16.gmra.mxu3 %vm928_vm2, %v444_v23  ;;  %v377_v51 = vld [vmem:[%s4017_s19 + $0xd0] sm:$0xff]  ;;  %v378_v23 = vld [vmem:[%s4017_s19 + $0xd8] sm:$0xff]  ;;  %v412_v9 = vld [vmem:[%s4017_s19 + $0x1e8] sm:$0xff] }
  0xe9   : > { %v428_v30 = vpack.c.bf16 %v378_v23, %v377_v51  ;;  %6522 = vst [vmem:[#allocation46_spill] sm:$0xff] %v4404_v52  ;;  %v413_v52 = vld [vmem:[%s4017_s19 + $0x1f0] sm:$0xff] }
  0xec   : > { %1262 = vperm.xlu2 %3737, %v4382_v59  }
  0xed   : > { %1667 = vperm.xlu0 %3739, %v4089_v43   ;;  %1258 = vperm.xlu1 %3736, %v4065_v33   ;;  %v4391_v25 = vpop.permute.xlu2 %757  ;;  %v4393_v28 = vpop.permute.xlu0 %1362  ;;  %v445_v33 = vpack.c.bf16 %v412_v9, %v411_v29  ;;  %v4420_v9 = vld [vmem:[%s3999_s10 + $0xa8] sm:$0xff] }
  0xee   : > { %6519 = vst [vmem:[#allocation43_spill] sm:$0xff] %v4391_v25  ;;  %v4395_v12 = vpop.permute.xlu1 %707 }
  0xef   : > { %6520 = vst [vmem:[#allocation44_spill] sm:$0xff] %v4393_v28  ;;  %v4429_v23 = vpop.f32.mrf.mxu3 }
  0xf0   : > { %6521 = vst [vmem:[#allocation45_spill] sm:$0xff] %v4395_v12  ;;  %v414_v12 = vld [vmem:[%s4017_s19 + $0x1f8] sm:$0xff] }
  0xf1   : > { %6528 = vst [vmem:[#allocation52_spill] sm:$0xff] %v4429_v23 }
  0xf4   : > { %1274 = vperm.xlu2 %3737, %v4400_v13  }
  0xf5   : > { %1679 = vperm.xlu0 %3739, %v4098_v45   ;;  %1270 = vperm.xlu1 %3736, %v4074_v35   ;;  %v4411_v25 = vpop.permute.xlu2 %772  ;;  %v4413_v28 = vpop.permute.xlu0 %1374 }
  0xf6   : > { %6523 = vst [vmem:[#allocation47_spill] sm:$0xff] %v4411_v25  ;;  %v4415_v51 = vpop.permute.xlu1 %722 }
  0xf7   : > { %6524 = vst [vmem:[#allocation48_spill] sm:$0xff] %v4413_v28  ;;  %v4433_v28 = vpop.f32.mrf.mxu0  ;;  %v4452_v23 = vpop.f32.mrf.mxu3 }
  0xf8   : > { %6525 = vst [vmem:[#allocation49_spill] sm:$0xff] %v4415_v51  ;;  %3612 = vmatmul.msk.bf16.gmra.mxu0 %vm928_vm2, %v428_v30  ;;  %3629 = vmatmul.msk.bf16.gmra.mxu3 %vm928_vm2, %v445_v33  ;;  %v379_v30 = vld [vmem:[%s4017_s19 + $0xe0] sm:$0xff]  ;;  %v380_v33 = vld [vmem:[%s4017_s19 + $0xe8] sm:$0xff] }
  0xf9   : > { %v4438_v51 = vld [vmem:[%s3999_s10 + $0xc0] sm:$0xff]  ;;  %v429_v7 = vpack.c.bf16 %v380_v33, %v379_v30  ;;  %6533 = vst [vmem:[#allocation57_spill] sm:$0xff] %v4452_v23  ;;  %v381_v33 = vld [vmem:[%s4017_s19 + $0xf0] sm:$0xff] }
  0xfc   : > { %1286 = vperm.xlu2 %3737, %v4420_v9  }
  0xfd   : > { %1691 = vperm.xlu0 %3739, %v4113_v53   ;;  %1282 = vperm.xlu1 %3736, %v4089_v43   ;;  %v4425_v35 = vpop.permute.xlu2 %787  ;;  %v4427_v29 = vpop.permute.xlu0 %1386  ;;  %v446_v43 = vpack.c.bf16 %v414_v12, %v413_v52  ;;  %v4458_v12 = vld [vmem:[%s3999_s10 + $0xd8] sm:$0xff] }
  0xfe   : > { %6526 = vst [vmem:[#allocation50_spill] sm:$0xff] %v4425_v35  ;;  %v4431_v25 = vpop.permute.xlu1 %737 }
  0xff   : > { %6527 = vst [vmem:[#allocation51_spill] sm:$0xff] %v4427_v29  ;;  %v4455_v52 = vpop.f32.mrf.mxu0 }
 0x100   : > { %6529 = vst [vmem:[#allocation53_spill] sm:$0xff] %v4431_v25 }
 0x101   : > { %6534 = vst [vmem:[#allocation58_spill] sm:$0xff] %v4455_v52 }
 0x104   : > { %1298 = vperm.xlu2 %3737, %v4438_v51  }
 0x105   : > { %1703 = vperm.xlu0 %3739, %v4122_v55   ;;  %1294 = vperm.xlu1 %3736, %v4098_v45   ;;  %v4445_v35 = vpop.permute.xlu2 %802  ;;  %v4447_v29 = vpop.permute.xlu0 %1398 }
 0x106   : > { %6530 = vst [vmem:[#allocation54_spill] sm:$0xff] %v4445_v35  ;;  %v4449_v25 = vpop.permute.xlu1 %752  ;;  %v382_v35 = vld [vmem:[%s4017_s19 + $0xf8] sm:$0xff] }
 0x107   : > { %6531 = vst [vmem:[#allocation55_spill] sm:$0xff] %v4447_v29  ;;  %v430_v23 = vpack.c.bf16 %v382_v35, %v381_v33  ;;  %v4487_v29 = vld [vmem:[%s3999_s10 + $0x108] sm:$0xff] }
 0x108   : > { %6532 = vst [vmem:[#allocation56_spill] sm:$0xff] %v4449_v25  ;;  %3613 = vmatmul.msk.bf16.gmra.mxu0 %vm928_vm2, %v429_v7  ;;  %3630 = vmatmul.msk.bf16.gmra.mxu3 %vm928_vm2, %v446_v43  ;;  %v4472_v43 = vld [vmem:[%s3999_s10 + $0xf0] sm:$0xff]  ;;  %v4474_v25 = vpop.f32.mrf.mxu0 }
 0x109   : > { %6538 = vst [vmem:[#allocation62_spill] sm:$0xff] %v4474_v25  ;;  %v4518_v25 = vld [vmem:[%s3999_s10 + $0x138] sm:$0xff] }
 0x10c   : > { %1310 = vperm.xlu2 %3737, %v4458_v12  }
 0x10d   : > { %1715 = vperm.xlu0 %3739, %v4137_v63   ;;  %1306 = vperm.xlu1 %3736, %v4113_v53   ;;  %v4463_v45 = vpop.permute.xlu2 %817  ;;  %v4465_v30 = vpop.permute.xlu0 %1410 }
 0x10e   : > { %6535 = vst [vmem:[#allocation59_spill] sm:$0xff] %v4463_v45  ;;  %v4467_v7 = vpop.permute.xlu1 %767 }
 0x10f   : > { %6536 = vst [vmem:[#allocation60_spill] sm:$0xff] %v4465_v30 }
 0x110   : > { %6537 = vst [vmem:[#allocation61_spill] sm:$0xff] %v4467_v7  ;;  %v4490_v35 = vpop.f32.mrf.mxu0 }
 0x111   : > { %6542 = vst [vmem:[#allocation66_spill] sm:$0xff] %v4490_v35 }
 0x114   : > { %1322 = vperm.xlu2 %3737, %v4472_v43  }
 0x115   : > { %1727 = vperm.xlu0 %3739, %v4146_v1   ;;  %1318 = vperm.xlu1 %3736, %v4122_v55   ;;  %v4479_v53 = vpop.permute.xlu2 %832  ;;  %v4481_v45 = vpop.permute.xlu0 %1422 }
 0x116   : > { %6539 = vst [vmem:[#allocation63_spill] sm:$0xff] %v4479_v53  ;;  %v4483_v30 = vpop.permute.xlu1 %782 }
 0x117   : > { %6540 = vst [vmem:[#allocation64_spill] sm:$0xff] %v4481_v45  ;;  %v384_v45 = vld [vmem:[%s4017_s19 + $0x108] sm:$0xff] }
 0x118   : > { %6541 = vst [vmem:[#allocation65_spill] sm:$0xff] %v4483_v30  ;;  %3614 = vmatmul.msk.bf16.gmra.mxu0 %vm928_vm2, %v430_v23  ;;  %v383_v30 = vld [vmem:[%s4017_s19 + $0x100] sm:$0xff]  ;;  %s3576_s19 = sshll.u32 %s329_s18, 1 }
 0x119   : > { %v4503_v23 = vld [vmem:[%s3999_s10 + $0x120] sm:$0xff]  ;;  %v431_v7 = vpack.c.bf16 %v384_v45, %v383_v30 }
 0x11c   : > { %1334 = vperm.xlu2 %3737, %v4487_v29  }
 0x11d   : > { %1739 = vperm.xlu0 %3739, %v4163_v16   ;;  %1330 = vperm.xlu1 %3736, %v4137_v63   ;;  %v4494_v55 = vpop.permute.xlu0 %1434 }
 0x11e   : > { %6543 = vst [vmem:[#allocation67_spill] sm:$0xff] %v4494_v55  ;;  %v4496_v33 = vpop.permute.xlu1 %797  ;;  %v4498_v53 = vpop.permute.xlu2 %1206 }
 0x11f   : > { %6544 = vst [vmem:[#allocation68_spill] sm:$0xff] %v4496_v33  ;;  %v4514_v33 = vpop.f32.mrf.mxu0 }
 0x120   : > { %6547 = vst [vmem:[#allocation71_spill] sm:$0xff] %v4514_v33 }
 0x124   : > { %1346 = vperm.xlu2 %3737, %v4503_v23  }
 0x125   : > { %1751 = vperm.xlu0 %3739, %v4174_v20   ;;  %1342 = vperm.xlu1 %3736, %v4146_v1   ;;  %v4508_v63 = vpop.permute.xlu0 %1446 }
 0x126   : > { %6545 = vst [vmem:[#allocation69_spill] sm:$0xff] %v4508_v63  ;;  %v4510_v35 = vpop.permute.xlu1 %812  ;;  %v4512_v55 = vpop.permute.xlu2 %1218 }
 0x127   : > { %6546 = vst [vmem:[#allocation70_spill] sm:$0xff] %v4510_v35  ;;  %v4530_v35 = vld [vmem:[%s3999_s10 + $0x150] sm:$0xff] }
 0x128   : > { %3615 = vmatmul.msk.bf16.gmra.mxu0 %vm928_vm2, %v431_v7 }
 0x12c   : > { %1358 = vperm.xlu2 %3737, %v4518_v25  }
 0x12d   : > { %1763 = vperm.xlu0 %3739, %v4191_v37   ;;  %1354 = vperm.xlu1 %3736, %v4163_v16  }
 0x12e   : > { %v4523_v1 = vpop.permute.xlu1 %827  ;;  %v4525_v45 = vpop.permute.xlu2 %1226 }
 0x12f   : > { %6548 = vst [vmem:[#allocation72_spill] sm:$0xff] %v4523_v1  ;;  %v4527_v30 = vpop.permute.xlu0 %1587  ;;  %v4542_v1 = vld [vmem:[%s3999_s10 + $0x168] sm:$0xff] }
 0x130   : > { %6549 = vst [vmem:[#allocation73_spill] sm:$0xff] %v4525_v45 }
 0x134   : > { %1370 = vperm.xlu2 %3737, %v4530_v35  }
 0x135   : > { %1775 = vperm.xlu0 %3739, %v4206_v42   ;;  %1366 = vperm.xlu1 %3736, %v4174_v20  }
 0x136   : > { %v4535_v7 = vpop.permute.xlu2 %1238 }
 0x137   : > { %6550 = vst [vmem:[#allocation74_spill] sm:$0xff] %v4535_v7  ;;  %v4537_v63 = vpop.permute.xlu0 %1607  ;;  %v4539_v16 = vpop.permute.xlu1 %1202  ;;  %v4554_v7 = vld [vmem:[%s3999_s10 + $0x180] sm:$0xff] }
 0x13c   : > { %1382 = vperm.xlu2 %3737, %v4542_v1  }
 0x13d   : > { %1787 = vperm.xlu0 %3739, %v4224_v61   ;;  %1378 = vperm.xlu1 %3736, %v4191_v37  }
 0x13e   : > { %v4547_v33 = vpop.permute.xlu2 %1250 }
 0x13f   : > { %6551 = vst [vmem:[#allocation75_spill] sm:$0xff] %v4547_v33  ;;  %v4549_v45 = vpop.permute.xlu0 %1619  ;;  %v4551_v20 = vpop.permute.xlu1 %1214  ;;  %v4566_v33 = vld [vmem:[%s3999_s10 + $0x198] sm:$0xff] }
 0x140   : > { %6552 = vst [vmem:[#allocation76_spill] sm:$0xff] %v4549_v45  ;;  %v4568_v45 = vpop.f32.mrf.mxu0 }
 0x141   : > { %6553 = vst [vmem:[#allocation77_spill] sm:$0xff] %v4551_v20 }
 0x142   : > { %6555 = vst [vmem:[#allocation79_spill] sm:$0xff] %v4566_v33 }
 0x144   : > { %1394 = vperm.xlu2 %3737, %v4554_v7  }
 0x145   : > { %1799 = vperm.xlu0 %3739, %v4235_v8   ;;  %1390 = vperm.xlu1 %3736, %v4206_v42  }
 0x146   : > { %v4559_v52 = vpop.permute.xlu2 %1262 }
 0x147   : > { %6554 = vst [vmem:[#allocation78_spill] sm:$0xff] %v4559_v52  ;;  %v4561_v3 = vpop.permute.xlu0 %1631  ;;  %v4563_v37 = vpop.permute.xlu1 %1222 }
 0x14c   : > { %1406 = vperm.xlu2 %3737, %v4566_v33   ;;  %v4585_v33 = vpop.f32.mrf.mxu0 }
 0x14d   : > { %1811 = vperm.xlu0 %3739, %v4252_v49   ;;  %1402 = vperm.xlu1 %3736, %v4224_v61  }
 0x14e   : > { %v4573_v20 = vpop.permute.xlu2 %1274 }
 0x14f   : > { %6556 = vst [vmem:[#allocation80_spill] sm:$0xff] %v4573_v20  ;;  %v4575_v42 = vpop.permute.xlu0 %1643  ;;  %v4577_v52 = vpop.permute.xlu1 %1234 }
 0x150   : > { %6557 = vst [vmem:[#allocation81_spill] sm:$0xff] %v4575_v42  ;;  %v4594_v42 = vld [vmem:[%s3999_s10 + $0x1c8] sm:$0xff] }
 0x151   : > { %6558 = vst [vmem:[#allocation82_spill] sm:$0xff] %v4577_v52 }
 0x152   : > { %6562 = vst [vmem:[#allocation86_spill] sm:$0xff] %v4594_v42 }
 0x154   : > { %1418 = vperm.xlu2 %3737, %v4580_v38  }
 0x155   : > { %1823 = vperm.xlu0 %3739, %v4263_v62   ;;  %1414 = vperm.xlu1 %3736, %v4235_v8  }
 0x156   : > { %v4587_v60 = vpop.permute.xlu2 %1286 }
 0x157   : > { %6560 = vst [vmem:[#allocation84_spill] sm:$0xff] %v4587_v60  ;;  %v4589_v61 = vpop.permute.xlu0 %1655  ;;  %v4591_v20 = vpop.permute.xlu1 %1246 }
 0x158   : > { %6561 = vst [vmem:[#allocation85_spill] sm:$0xff] %v4589_v61  ;;  %v4605_v60 = vpop.f32.mrf.mxu0  ;;  %v4608_v61 = vld [vmem:[%s3999_s10 + $0x1e0] sm:$0xff] }
 0x159   : > { %6566 = vst [vmem:[#allocation90_spill] sm:$0xff] %v4605_v60 }
 0x15c   : > { %1430 = vperm.xlu2 %3737, %v4594_v42  }
 0x15d   : > { %1835 = vperm.xlu0 %3739, %v4280_v58   ;;  %1426 = vperm.xlu1 %3736, %v4252_v49  }
 0x15e   : > { %v4599_v52 = vpop.permute.xlu2 %1298 }
 0x15f   : > { %6563 = vst [vmem:[#allocation87_spill] sm:$0xff] %v4599_v52  ;;  %v4601_v8 = vpop.permute.xlu0 %1667  ;;  %v4603_v38 = vpop.permute.xlu1 %1258 }
 0x160   : > { %6564 = vst [vmem:[#allocation88_spill] sm:$0xff] %v4601_v8  ;;  %v4621_v8 = vld [vmem:[%s3999_s10 + $0x1f8] sm:$0xff] }
 0x161   : > { %6565 = vst [vmem:[#allocation89_spill] sm:$0xff] %v4603_v38  ;;  %v4623_v38 = vpop.f32.mrf.mxu0 }
 0x162   : > { %6569 = vst [vmem:[#allocation92_spill] sm:$0xff] %v4623_v38 }
 0x164   : > { %1442 = vperm.xlu2 %3737, %v4608_v61  }
 0x165   : > { %3742 = vset.pattern.permute.xlu0 %v6567_v40  ;;  %1438 = vperm.xlu1 %3736, %v4263_v62   ;;  %v6574_v40 = vmov 2  }
 0x166   : > { %522 = vperm.xlu0 %3742, %v4283_v22   ;;  %v4614_v42 = vpop.permute.xlu2 %1310 }
 0x167   : > { %6568 = vst [vmem:[#allocation91_spill] sm:$0xff] %v4614_v42  ;;  %v4616_v49 = vpop.permute.xlu0 %1679  ;;  %v4618_v52 = vpop.permute.xlu1 %1270 }
 0x169   : > { %v4634_v42 = vpop.f32.mrf.mxu0 }
 0x16a   : > { %6573 = vst [vmem:[#allocation96_spill] sm:$0xff] %v4634_v42 }
 0x16c   : > { %1454 = vperm.xlu2 %3737, %v4621_v8  }
 0x16d   : > { %1450 = vperm.xlu1 %3736, %v4280_v58  }
 0x16e   : > { %527 = vperm.xlu0 %3742, %v4297_v6   ;;  %v4628_v60 = vpop.permute.xlu2 %1322 }
 0x16f   : > { %6570 = vst [vmem:[#allocation93_spill] sm:$0xff] %v4628_v60  ;;  %v4630_v62 = vpop.permute.xlu0 %1691  ;;  %v4632_v22 = vpop.permute.xlu1 %1282 }
 0x170   : > { %6571 = vst [vmem:[#allocation94_spill] sm:$0xff] %v4630_v62 }
 0x171   : > { %6572 = vst [vmem:[#allocation95_spill] sm:$0xff] %v4632_v22  ;;  %v4648_v62 = vpop.f32.mrf.mxu0 }
 0x172   : > { %6575 = vst [vmem:[#allocation97_spill] sm:$0xff] %v4648_v62 }
 0x174   : > { %3741 = vset.pattern.permute.xlu2 %v6574_v40 }
 0x175   : > { %3740 = vset.pattern.permute.xlu1 %v6574_v40  ;;  %1595 = vperm.xlu2 %3741, %v4005_v11  }
 0x176   : > { %552 = vperm.xlu0 %3742, %v4328_v32   ;;  %1591 = vperm.xlu1 %3740, %v4297_v6   ;;  %v4641_v58 = vpop.permute.xlu2 %1334 }
 0x177   : > { %v4643_v38 = vpop.permute.xlu0 %1703  ;;  %v4645_v60 = vpop.permute.xlu1 %1294 }
 0x179   : > { %v4667_v62 = vpop.f32.mrf.mxu0 }
 0x17d   : > { %1603 = vperm.xlu2 %3741, %v4002_v10  }
 0x17e   : > { %567 = vperm.xlu0 %3742, %v4348_v50   ;;  %1599 = vperm.xlu1 %3740, %v4031_v18   ;;  %v4652_v40 = vpop.permute.xlu2 %1346 }
 0x17f   : > { %6576 = vst [vmem:[#allocation98_spill] sm:$0xff] %v4652_v40  ;;  %v4654_v11 = vpop.permute.xlu0 %1715  ;;  %v4656_v22 = vpop.permute.xlu1 %1306 }
 0x180   : > { %6577 = vst [vmem:[#allocation99_spill] sm:$0xff] %v4656_v22 }
 0x185   : > { %1615 = vperm.xlu2 %3741, %v4026_v15  }
 0x186   : > { %582 = vperm.xlu0 %3742, %v4366_v27   ;;  %1611 = vperm.xlu1 %3740, %v4328_v32   ;;  %v4661_v6 = vpop.permute.xlu2 %1358  ;;  %v4678_v32 = vpop.f32.mrf.mxu0 }
 0x187   : > { %6578 = vst [vmem:[#allocation100_spill] sm:$0xff] %v4661_v6  ;;  %v4663_v10 = vpop.permute.xlu0 %1727  ;;  %v4665_v42 = vpop.permute.xlu1 %1318 }
 0x18d   : > { %1627 = vperm.xlu2 %3741, %v4044_v24  }
 0x18e   : > { %597 = vperm.xlu0 %3742, %v4382_v59   ;;  %1623 = vperm.xlu1 %3740, %v4348_v50   ;;  %v4672_v18 = vpop.permute.xlu2 %1370  ;;  %v4689_v50 = vpop.f32.mrf.mxu0 }
 0x18f   : > { %6579 = vst [vmem:[#allocation101_spill] sm:$0xff] %v4672_v18  ;;  %v4674_v15 = vpop.permute.xlu0 %1739  ;;  %v4676_v22 = vpop.permute.xlu1 %1330 }
 0x190   : > { %6580 = vst [vmem:[#allocation102_spill] sm:$0xff] %v4674_v15 }
 0x191   : > { %6583 = vst [vmem:[#allocation105_spill] sm:$0xff] %v4689_v50 }
 0x195   : > { %1639 = vperm.xlu2 %3741, %v4053_v26  }
 0x196   : > { %612 = vperm.xlu0 %3742, %v4400_v13   ;;  %1635 = vperm.xlu1 %3740, %v4366_v27   ;;  %v4683_v6 = vpop.permute.xlu2 %1382  ;;  %v4700_v27 = vpop.f32.mrf.mxu3 }
 0x197   : > { %6581 = vst [vmem:[#allocation103_spill] sm:$0xff] %v4683_v6  ;;  %v4685_v24 = vpop.permute.xlu0 %1751  ;;  %v4687_v40 = vpop.permute.xlu1 %1342 }
 0x198   : > { %6582 = vst [vmem:[#allocation104_spill] sm:$0xff] %v4685_v24  ;;  %v4703_v6 = vpop.f32.mrf.mxu0 }
 0x199   : > { %6585 = vst [vmem:[#allocation107_spill] sm:$0xff] %v4703_v6 }
 0x19d   : > { %1651 = vperm.xlu2 %3741, %v4068_v34  }
 0x19e   : > { %627 = vperm.xlu0 %3742, %v4420_v9   ;;  %1647 = vperm.xlu1 %3740, %v4382_v59   ;;  %v4694_v18 = vpop.permute.xlu2 %1394 }
 0x19f   : > { %v4696_v26 = vpop.permute.xlu0 %1763  ;;  %v4698_v15 = vpop.permute.xlu1 %1354 }
 0x1a0   : > { %6584 = vst [vmem:[#allocation106_spill] sm:$0xff] %v4696_v26  ;;  %v4714_v26 = vpop.f32.mrf.mxu3 }
 0x1a5   : > { %1663 = vperm.xlu2 %3741, %v4077_v36  }
 0x1a6   : > { %642 = vperm.xlu0 %3742, %v4438_v51   ;;  %1659 = vperm.xlu1 %3740, %v4400_v13   ;;  %v4707_v34 = vpop.permute.xlu2 %1406  ;;  %v4724_v13 = vpop.f32.mrf.mxu0 }
 0x1a7   : > { %v4709_v24 = vpop.permute.xlu0 %1775  ;;  %v4711_v59 = vpop.permute.xlu1 %1366  ;;  %6591 = vst [vmem:[#allocation113_spill] sm:$0xff] %v4724_v13 }
 0x1a8   : > { %6586 = vst [vmem:[#allocation108_spill] sm:$0xff] %v4709_v24  ;;  %v3678_v24 = vld [vmem:[%s6446_s6 + $0x38] sm:$0xff] }
 0x1a9   : > { %6587 = vst [vmem:[#allocation109_spill] sm:$0xff] %v4711_v59  ;;  %2203 = vmatpush.bf16.msra.mxu1 %v3678_v24  ;;  %3683 = vmatpush.bf16.msra.mxu2 %v3678_v24 }
 0x1ad   : > { %1675 = vperm.xlu2 %3741, %v4092_v44  }
 0x1ae   : > { %657 = vperm.xlu0 %3742, %v4458_v12   ;;  %1671 = vperm.xlu1 %3740, %v4420_v9   ;;  %v4718_v36 = vpop.permute.xlu2 %1418  ;;  %v3677_v9 = vld [vmem:[%s6446_s6 + $0x30] sm:$0xff]  ;;  %v4743_v24 = vpop.f32.mrf.mxu0 }
 0x1af   : > { %6588 = vst [vmem:[#allocation110_spill] sm:$0xff] %v4718_v36  ;;  %v4720_v50 = vpop.permute.xlu0 %1787  ;;  %v4722_v6 = vpop.permute.xlu1 %1378  ;;  %2204 = vmatpush.bf16.msra.mxu1 %v3677_v9  ;;  %3684 = vmatpush.bf16.msra.mxu2 %v3677_v9  ;;  %v3675_v9 = vld [vmem:[%s6446_s6 + $0x20] sm:$0xff] }
 0x1b0   : > { %6589 = vst [vmem:[#allocation111_spill] sm:$0xff] %v4720_v50  ;;  %v4741_v36 = vpop.f32.mrf.mxu3 }
 0x1b1   : > { %6590 = vst [vmem:[#allocation112_spill] sm:$0xff] %v4722_v6 }
 0x1b2   : > { %6595 = vst [vmem:[#allocation117_spill] sm:$0xff] %v4741_v36 }
 0x1b3   : > { %6596 = vst [vmem:[#allocation118_spill] sm:$0xff] %v4743_v24 }
 0x1b5   : > { %1687 = vperm.xlu2 %3741, %v4101_v46   ;;  %v3676_v46 = vld [vmem:[%s6446_s6 + $0x28] sm:$0xff] }
 0x1b6   : > { %672 = vperm.xlu0 %3742, %v4472_v43   ;;  %1683 = vperm.xlu1 %3740, %v4438_v51   ;;  %v4732_v44 = vpop.permute.xlu2 %1430  ;;  %v4765_v36 = vpop.f32.mrf.mxu0 }
 0x1b7   : > { %6592 = vst [vmem:[#allocation114_spill] sm:$0xff] %v4732_v44  ;;  %v4737_v50 = vpop.permute.xlu0 %1799  ;;  %v4739_v6 = vpop.permute.xlu1 %1390  ;;  %2205 = vmatpush.bf16.msra.mxu1 %v3676_v46  ;;  %3685 = vmatpush.bf16.msra.mxu2 %v3676_v46 }
 0x1b8   : > { %6593 = vst [vmem:[#allocation115_spill] sm:$0xff] %v4737_v50  ;;  %v4763_v46 = vpop.f32.mrf.mxu3 }
 0x1b9   : > { %6594 = vst [vmem:[#allocation116_spill] sm:$0xff] %v4739_v6 }
 0x1ba   : > { %6600 = vst [vmem:[#allocation122_spill] sm:$0xff] %v4763_v46 }
 0x1bb   : > { %2206 = vmatpush.bf16.msra.mxu1 %v3675_v9  ;;  %3686 = vmatpush.bf16.msra.mxu2 %v3675_v9  ;;  %v3673_v9 = vld [vmem:[%s6446_s6 + $0x10] sm:$0xff] }
 0x1bd   : > { %1699 = vperm.xlu2 %3741, %v4116_v54   ;;  %v3674_v54 = vld [vmem:[%s6446_s6 + $0x18] sm:$0xff] }
 0x1be   : > { %687 = vperm.xlu0 %3742, %v4487_v29   ;;  %1695 = vperm.xlu1 %3740, %v4458_v12   ;;  %v4751_v51 = vpop.permute.xlu2 %1442 }
 0x1bf   : > { %6597 = vst [vmem:[#allocation119_spill] sm:$0xff] %v4751_v51  ;;  %v4756_v50 = vpop.permute.xlu0 %1811  ;;  %v4758_v6 = vpop.permute.xlu1 %1402  ;;  %2207 = vmatpush.bf16.msra.mxu1 %v3674_v54  ;;  %3687 = vmatpush.bf16.msra.mxu2 %v3674_v54 }
 0x1c0   : > { %6598 = vst [vmem:[#allocation120_spill] sm:$0xff] %v4756_v50  ;;  %v4789_v51 = vpop.f32.mrf.mxu3 }
 0x1c1   : > { %6599 = vst [vmem:[#allocation121_spill] sm:$0xff] %v4758_v6 }
 0x1c2   : > { %6604 = vst [vmem:[#allocation126_spill] sm:$0xff] %v4789_v51 }
 0x1c3   : > { %2208 = vmatpush.bf16.msra.mxu1 %v3673_v9  ;;  %3688 = vmatpush.bf16.msra.mxu2 %v3673_v9  ;;  %v3671_v9 = vld [vmem:[%s6446_s6] sm:$0xff] }
 0x1c5   : > { %1711 = vperm.xlu2 %3741, %v4125_v56   ;;  %v519_v56 = vld [vmem:[%s6444_s4] sm:$0x7] }
 0x1c6   : > { %702 = vperm.xlu0 %3742, %v4503_v23   ;;  %1707 = vperm.xlu1 %3740, %v4472_v43   ;;  %v4770_v12 = vpop.permute.xlu2 %1454  ;;  %v3672_v43 = vld [vmem:[%s6446_s6 + $0x8] sm:$0xff]  ;;  %v4785_v54 = vperm.slane %v519_v56, 0  ;;  %v4801_v46 = vperm.slane %v519_v56, 2 }
 0x1c7   : > { %6601 = vst [vmem:[#allocation123_spill] sm:$0xff] %v4770_v12  ;;  %v4775_v50 = vpop.permute.xlu0 %1823  ;;  %v4777_v6 = vpop.permute.xlu1 %1414  ;;  %v4787_v12 = vperm.slane %v519_v56, 1  ;;  %2209 = vmatpush.bf16.msra.mxu1 %v3672_v43  ;;  %3689 = vmatpush.bf16.msra.mxu2 %v3672_v43 }
 0x1c8   : > { %6602 = vst [vmem:[#allocation124_spill] sm:$0xff] %v4775_v50  ;;  %v4792_v50 = vpop.f32.mrf.mxu0  ;;  %v1848_v59 = vmul.f32 %v4801_v46, %v4537_v63 }
 0x1c9   : > { %6603 = vst [vmem:[#allocation125_spill] sm:$0xff] %v4777_v6  ;;  %v846_v6 = vmul.f32 %v4785_v54, %v4171_v19  ;;  %v1463_v51 = vmul.f32 %v4787_v12, %v4563_v37  ;;  %v845_v19 = vmul.f32 %v4785_v54, %v4158_v14  ;;  %v1462_v37 = vmul.f32 %v4787_v12, %v4512_v55  ;;  %v4829_v14 = vld [vmem:[%s6445_s5] ss:$0 sm:$0xff] }
 0x1cb   : > { %2210 = vmatpush.bf16.msra.mxu1 %v3671_v9  ;;  %3690 = vmatpush.bf16.msra.mxu2 %v3671_v9 }
 0x1cd   : > { %1723 = vperm.xlu2 %3741, %v4140_v0  }
 0x1ce   : > { %717 = vperm.xlu0 %3742, %v4518_v25   ;;  %1719 = vperm.xlu1 %3740, %v4487_v29   ;;  %v1054_v29 = vadd.f32 %v4433_v28, %v846_v6  ;;  %v1052_v28 = vadd.f32 %v4406_v31, %v845_v19  ;;  %v4822_v6 = vpop.f32.mrf.mxu3  ;;  %v1469_v19 = vmul.f32 %v4787_v12, %v4591_v20 }
 0x1cf   : > { %v4805_v0 = vpop.permute.xlu0 %1835  ;;  %v4807_v24 = vpop.permute.xlu1 %1426 }
 0x1d0   : > { %6605 = vst [vmem:[#allocation127_spill] sm:$0xff] %v4805_v0  ;;  %v4809_v44 = vpop.permute.xlu2 %1595  ;;  %v1527_v13 = vadd.f32 %v1463_v51, %v1054_v29  ;;  %v1526_v43 = vadd.f32 %v1462_v37, %v1052_v28  ;;  %v6637_v0 = vmov 0  }
 0x1d1   : > { %6606 = vst [vmem:[#allocation128_spill] sm:$0xff] %v4807_v24 }
 0x1d2   : > { %v1912_v56 = vadd.f32 %v1848_v59, %v1527_v13  ;;  %v852_v13 = vmul.f32 %v4785_v54, %v4199_v39  ;;  %v1458_v39 = vmul.f32 %v4787_v12, %v4539_v16 }
 0x1d4   : > { %v1980_v31 = vadd.f32 %v4829_v14, %v1912_v56 }
 0x1d5   : > { %1735 = vperm.xlu2 %3741, %v4149_v2   ;;  %v4831_v2 = vpop.f32.mrf.mxu0 }
 0x1d6   : > { %732 = vperm.xlu0 %3742, %v4530_v35   ;;  %1731 = vperm.xlu1 %3740, %v4503_v23   ;;  %v2044_v56 = vmax.f32 %v1980_v31, 0.0 }
 0x1d7   : > { %v4824_v63 = vpop.permute.xlu1 %1438 }
 0x1d8   : > { %6607 = vst [vmem:[#allocation129_spill] sm:$0xff] %v4824_v63  ;;  %v1604_v51 = vpop.permute.xlu2 %1603  ;;  %v523_v55 = vpop.permute.xlu0 %522  ;;  %v6638_v63 = vld [vmem:[#allocation9_spill] sm:$0xff] }
 0x1d9   : > { %v1847_v9 = vmul.f32 %v4801_v46, %v1604_v51  ;;  %v841_v29 = vmul.f32 %v4785_v54, %v523_v55 }
 0x1db   : > { %v1911_v23 = vadd.f32 %v1847_v9, %v1526_v43  ;;  %v1042_v51 = vadd.f32 %v4314_v57, %v841_v29  ;;  %v1069_v43 = vadd.f32 %v4585_v33, %v852_v13  ;;  %v4850_v9 = vpop.f32.mrf.mxu3  ;;  %v1854_v33 = vmul.f32 %v4801_v46, %v4561_v3 }
 0x1dc   : > { %v1843_v13 = vmul.f32 %v4801_v46, %v4527_v30  ;;  %v1459_v3 = vmul.f32 %v4787_v12, %v4498_v53 }
 0x1dd   : > { %1747 = vperm.xlu2 %3741, %v4166_v17   ;;  %v1979_v59 = vadd.f32 %v4829_v14, %v1911_v23  ;;  %v851_v23 = vmul.f32 %v4785_v54, %v4247_v48  ;;  %v1533_v31 = vadd.f32 %v1469_v19, %v1069_v43  ;;  %v1522_v57 = vadd.f32 %v1458_v39, %v1042_v51 }
 0x1de   : > { %747 = vperm.xlu0 %3742, %v4542_v1   ;;  %1743 = vperm.xlu1 %3740, %v4518_v25   ;;  %v1468_v48 = vmul.f32 %v4787_v12, %v4230_v4 }
 0x1df   : > { %v4844_v37 = vpop.permute.xlu1 %1450  ;;  %v2043_v28 = vmax.f32 %v1979_v59, 0.0  ;;  %v4859_v59 = vpop.f32.mrf.mxu0  ;;  %v1067_v29 = vadd.f32 %v4568_v45, %v851_v23  ;;  %v1918_v19 = vadd.f32 %v1854_v33, %v1533_v31  ;;  %v843_v45 = vmul.f32 %v4785_v54, %v4203_v41 }
 0x1e0   : > { %6608 = vst [vmem:[#allocation130_spill] sm:$0xff] %v4844_v37  ;;  %v4847_v55 = vpop.permute.xlu2 %1615  ;;  %v528_v17 = vpop.permute.xlu0 %527  ;;  %v1907_v30 = vadd.f32 %v1843_v13, %v1522_v57  ;;  %v1845_v23 = vmul.f32 %v4801_v46, %v4809_v44  ;;  %v6614_v13 = vld [vmem:[#allocation6_spill] sm:$0xff] }
 0x1e1   : > { %v4852_v25 = vpack.c.bf16 %v2044_v56, %v2043_v28  ;;  %v842_v20 = vmul.f32 %v4785_v54, %v528_v17  ;;  %6609 = vst [vmem:[#allocation131_spill] sm:$0xff] %v4859_v59  ;;  %v1532_v56 = vadd.f32 %v1468_v48, %v1067_v29  ;;  %v1986_v41 = vadd.f32 %v4829_v14, %v1918_v19  ;;  %v6612_v29 = vld [vmem:[#allocation10_spill] sm:$0xff]  ;;  %v6615_v19 = vld [vmem:[#allocation77_spill] sm:$0xff] }
 0x1e2   : > { %v1975_v57 = vadd.f32 %v4829_v14, %v1907_v30 }
 0x1e3   : > { %v1044_v16 = vadd.f32 %v4341_v47, %v842_v20  ;;  %v4881_v43 = vpop.f32.mrf.mxu3  ;;  %v6611_v20 = vld [vmem:[#allocation7_spill] sm:$0xff] }
 0x1e4   : > { %6610 = vst [vmem:[#allocation132_spill] sm:$0xff] %v4881_v43  ;;  %v1460_v53 = vmul.f32 %v4787_v12, %v6611_v20 }
 0x1e5   : > { %1759 = vperm.xlu2 %3741, %v4177_v21   ;;  %v1523_v17 = vadd.f32 %v1459_v3, %v1044_v16  ;;  %v6616_v3 = vld [vmem:[#allocation79_spill] sm:$0xff] }
 0x1e6   : > { %762 = vperm.xlu0 %3742, %v4554_v7   ;;  %1755 = vperm.xlu1 %3740, %v4530_v35   ;;  %v1047_v35 = vadd.f32 %v4361_v5, %v843_v45  ;;  %v844_v5 = vmul.f32 %v4785_v54, %v6612_v29  ;;  %v1461_v45 = vmul.f32 %v4787_v12, %v6615_v19 }
 0x1e7   : > { %v4891_v33 = vpop.f32.mrf.mxu0 }
 0x1e8   : > { %v1628_v21 = vpop.permute.xlu2 %1627  ;;  %v4876_v28 = vpop.permute.xlu0 %552  ;;  %6613 = vst [vmem:[#allocation7_spill] sm:$0xff] %v4891_v33  ;;  %v1524_v48 = vadd.f32 %v1460_v53, %v1047_v35  ;;  %v2039_v53 = vmax.f32 %v1975_v57, 0.0  ;;  %v6675_v33 = vld [vmem:[#allocation45_spill] sm:$0xff] }
 0x1e9   : > { %v1853_v47 = vmul.f32 %v4801_v46, %v1628_v21  ;;  %v1592_v51 = vpop.permute.xlu1 %1591  ;;  %v6617_v21 = vld [vmem:[#allocation11_spill] sm:$0xff] }
 0x1ea   : > { %v1844_v4 = vmul.f32 %v4801_v46, %v1592_v51  ;;  %v858_v30 = vmul.f32 %v4785_v54, %v6617_v21  ;;  %v2050_v51 = vmax.f32 %v1986_v41, 0.0  ;;  %v1909_v35 = vadd.f32 %v1845_v23, %v1524_v48  ;;  %v6619_v41 = vld [vmem:[#allocation20_spill] sm:$0xff] }
 0x1eb   : > { %v1917_v39 = vadd.f32 %v1853_v47, %v1532_v56  ;;  %v1475_v56 = vmul.f32 %v4787_v12, %v4618_v52  ;;  %v4916_v57 = vpop.f32.mrf.mxu3 }
 0x1ec   : > { %v1908_v31 = vadd.f32 %v1844_v4, %v1523_v17  ;;  %v6618_v17 = vld [vmem:[#allocation42_spill] sm:$0xff]  ;;  %v1977_v21 = vadd.f32 %v4829_v14, %v1909_v35 }
 0x1ed   : > { %1771 = vperm.xlu2 %3741, %v6614_v13   ;;  %v1985_v16 = vadd.f32 %v4829_v14, %v1917_v39  ;;  %v1049_v4 = vadd.f32 %v6618_v17, %v844_v5  ;;  %v857_v5 = vmul.f32 %v4785_v54, %v6619_v41 }
 0x1ee   : > { %777 = vperm.xlu0 %3742, %v6616_v3   ;;  %1767 = vperm.xlu1 %3740, %v4542_v1   ;;  %v1976_v44 = vadd.f32 %v4829_v14, %v1908_v31  ;;  %v1084_v31 = vadd.f32 %v4678_v32, %v858_v30  ;;  %v6620_v32 = vld [vmem:[#allocation85_spill] sm:$0xff] }
 0x1ef   : > { %v2049_v47 = vmax.f32 %v1985_v16, 0.0  ;;  %v1525_v19 = vadd.f32 %v1461_v45, %v1049_v4  ;;  %v1860_v30 = vmul.f32 %v4801_v46, %v6620_v32  ;;  %v6621_v45 = vld [vmem:[#allocation83_spill] sm:$0xff]  ;;  %v4927_v35 = vpop.f32.mrf.mxu0 }
 0x1f0   : > { %v4905_v39 = vpop.permute.xlu2 %1639  ;;  %v4907_v20 = vpop.permute.xlu0 %567  ;;  %v2040_v1 = vmax.f32 %v1976_v44, 0.0  ;;  %v1539_v23 = vadd.f32 %v1475_v56, %v1084_v31  ;;  %v1082_v44 = vadd.f32 %v4667_v62, %v857_v5  ;;  %6623 = vst [vmem:[#allocation10_spill] sm:$0xff] %v4927_v35  ;;  %v3748_v5 = vld [vmem:[%s3999_s10 + $0x1a0] sm:$0xff]  ;;  %v6625_v32 = vld [vmem:[#allocation15_spill] sm:$0xff] }
 0x1f1   : > { %v1600_v29 = vpop.permute.xlu1 %1599  ;;  %v4910_v13 = vpack.c.bf16 %v2050_v51, %v2049_v47  ;;  %v3747_v47 = vld [vmem:[%s3999_s10 + $0x188] sm:$0xff]  ;;  %v6622_v51 = vld [vmem:[#allocation16_spill] sm:$0xff] }
 0x1f2   : > { %v1846_v52 = vmul.f32 %v4801_v46, %v1600_v29  ;;  %v2103_v16 = vpack.c.bf16 %v2040_v1, %v2039_v53  ;;  %v1474_v17 = vmul.f32 %v4787_v12, %v6622_v51  ;;  %v1924_v4 = vadd.f32 %v1860_v30, %v1539_v23  ;;  %v6624_v23 = vld [vmem:[#allocation86_spill] sm:$0xff] }
 0x1f3   : > { %v2041_v1 = vmax.f32 %v1977_v21, 0.0  ;;  %v864_v21 = vmul.f32 %v4785_v54, %v6625_v32  ;;  %v1481_v30 = vmul.f32 %v4787_v12, %v4645_v60 }
 0x1f4   : > { %v1910_v48 = vadd.f32 %v1846_v52, %v1525_v19  ;;  %2211 = vmatmul.bf16.vlgmr.msra.gmra.mxu1 %v2103_v16  ;;  %v1538_v29 = vadd.f32 %v1474_v17, %v1082_v44  ;;  %v4939_v44 = vpop.f32.mrf.mxu3 }
 0x1f5   : > { %1783 = vperm.xlu2 %3741, %v3747_v47  }
 0x1f6   : > { %792 = vperm.xlu0 %3742, %v6621_v45   ;;  %1779 = vperm.xlu1 %3740, %v4554_v7   ;;  %v1978_v56 = vadd.f32 %v4829_v14, %v1910_v48  ;;  %v1992_v7 = vadd.f32 %v4829_v14, %v1924_v4  ;;  %v1099_v4 = vadd.f32 %v4792_v50, %v864_v21  ;;  %v6627_v50 = vld [vmem:[#allocation22_spill] sm:$0xff] }
 0x1f8   : > { %v1652_v53 = vpop.permute.xlu2 %1651  ;;  %v4929_v62 = vpop.permute.xlu0 %582  ;;  %v2042_v31 = vmax.f32 %v1978_v56, 0.0  ;;  %v2056_v56 = vmax.f32 %v1992_v7, 0.0  ;;  %v3749_v7 = vld [vmem:[%s3999_s10 + $0x1b8] sm:$0xff] }
 0x1f9   : > { %v1859_v19 = vmul.f32 %v4801_v46, %v1652_v53  ;;  %v1612_v52 = vpop.permute.xlu1 %1611 }
 0x1fa   : > { %v2104_v16 = vpack.c.bf16 %v2042_v31, %v2041_v1  ;;  %v1111_v1 = vpop.f32.mrf.mxu0  ;;  %v6626_v31 = vld [vmem:[#allocation26_spill] sm:$0xff] }
 0x1fb   : > { %v1923_v41 = vadd.f32 %v1859_v19, %v1538_v29  ;;  %v863_v29 = vmul.f32 %v4785_v54, %v6626_v31  ;;  %v1545_v19 = vadd.f32 %v1481_v30, %v1099_v4  ;;  %v847_v4 = vmul.f32 %v4785_v54, %v4876_v28  ;;  %v6629_v31 = vld [vmem:[#allocation21_spill] sm:$0xff] }
 0x1fd   : > { %1795 = vperm.xlu2 %3741, %v3748_v5   ;;  %v1991_v48 = vadd.f32 %v4829_v14, %v1923_v41  ;;  %v1097_v60 = vadd.f32 %v4765_v36, %v863_v29  ;;  %v1866_v41 = vmul.f32 %v4801_v46, %v4616_v49  ;;  %v1480_v5 = vmul.f32 %v4787_v12, %v6627_v50 }
 0x1fe   : > { %807 = vperm.xlu0 %3742, %v6624_v23   ;;  %1791 = vperm.xlu1 %3740, %v6616_v3   ;;  %v870_v29 = vmul.f32 %v4785_v54, %v6629_v31 }
 0x1ff   : > { %v2055_v47 = vmax.f32 %v1991_v48, 0.0  ;;  %v1930_v48 = vadd.f32 %v1866_v41, %v1545_v19  ;;  %v1544_v36 = vadd.f32 %v1480_v5, %v1097_v60  ;;  %v3750_v19 = vld [vmem:[%s3999_s10 + $0x1d0] sm:$0xff]  ;;  %v2373_v60 = vld [vmem:[%s4973_s23 + $0x8] sm:$0xff] }
 0x200   : > { %v4943_v51 = vpop.permute.xlu2 %1663  ;;  %v4945_v17 = vpop.permute.xlu0 %597  ;;  %vm2437_vm3 = vcmp.eq.s32.totalorder %v2373_v60, 0 }
 0x201   : > { %v4948_v53 = vpop.permute.xlu1 %1623  ;;  %v4950_v3 = vpack.c.bf16 %v2056_v56, %v2055_v47  ;;  %v1998_v47 = vadd.f32 %v4829_v14, %v1930_v48  ;;  %v6630_v48 = vld [vmem:[#allocation12_spill] sm:$0xff]  ;;  %v2501_v37 = vsel %vm2437_vm3, 1, %v6637_v0 }
 0x202   : > { %v1113_v56 = vpop.f32.mrf.mxu0 }
 0x203   : > { %v2062_v5 = vmax.f32 %v1998_v47, 0.0 }
 0x204   : > { %2216 = vmatmul.bf16.gmra.mxu1 %v2104_v16  ;;  %v4964_v16 = vpop.f32.mrf.mxu3 }
 0x205   : > { %1807 = vperm.xlu2 %3741, %v3749_v7   ;;  %6628 = vst [vmem:[#allocation6_spill] sm:$0xff] %v4964_v16  ;;  %v1114_v7 = vadd.f32 %v1113_v56, %v870_v29  ;;  %v6634_v56 = vld [vmem:[#allocation62_spill] sm:$0xff]  ;;  %v6635_v29 = vld [vmem:[#allocation73_spill] sm:$0xff] }
 0x206   : > { %822 = vperm.xlu0 %3742, %v4608_v61   ;;  %1803 = vperm.xlu1 %3740, %v6621_v45  }
 0x208   : > { %v1676_v32 = vpop.permute.xlu2 %1675  ;;  %v4962_v21 = vpop.permute.xlu0 %612 }
 0x209   : > { %v1865_v30 = vmul.f32 %v4801_v46, %v1676_v32  ;;  %v4967_v49 = vpop.permute.xlu1 %1635  ;;  %v848_v32 = vmul.f32 %v4785_v54, %v6630_v48  ;;  %v6636_v48 = vld [vmem:[#allocation33_spill] sm:$0xff] }
 0x20b   : > { %v1929_v45 = vadd.f32 %v1865_v30, %v1544_v36  ;;  %v6631_v36 = vld [vmem:[#allocation58_spill] sm:$0xff]  ;;  %v1059_v47 = vadd.f32 %v6634_v56, %v848_v32 }
 0x20c   : > { %v1057_v28 = vadd.f32 %v6631_v36, %v847_v4  ;;  %v1849_v4 = vmul.f32 %v4801_v46, %v1612_v52  ;;  %v869_v36 = vmul.f32 %v4785_v54, %v6636_v48  ;;  %v5004_v60 = vpop.f32.mrf.mxu3  ;;  %v1872_v52 = vmul.f32 %v4801_v46, %v4643_v38  ;;  %v2378_v48 = vld [vmem:[%s4973_s23 + $0x30] sm:$0xff] }
 0x20d   : > { %1819 = vperm.xlu2 %3741, %v3750_v19   ;;  %v1997_v41 = vadd.f32 %v4829_v14, %v1929_v45  ;;  %v1487_v45 = vmul.f32 %v4787_v12, %v4665_v42  ;;  %vm2442_vm4 = vcmp.eq.s32.totalorder %v2378_v48, 0 }
 0x20e   : > { %837 = vperm.xlu0 %3742, %v4621_v8   ;;  %1815 = vperm.xlu1 %3740, %v6624_v23   ;;  %v1112_v56 = vadd.f32 %v1111_v1, %v869_v36 }
 0x20f   : > { %v2061_v50 = vmax.f32 %v1997_v41, 0.0  ;;  %v1464_v41 = vmul.f32 %v4787_v12, %v6635_v29  ;;  %v1551_v42 = vadd.f32 %v1487_v45, %v1114_v7  ;;  %v3751_v29 = vld [vmem:[%s3999_s10 + $0x1e8] sm:$0xff]  ;;  %v2372_v45 = vld [vmem:[%s4973_s23] sm:$0xff]  ;;  %s331_s10 = scalar_lea.vmem [#allocation2], %s3576_s19  ;;  %s3839_s19 = scalar_lea.hbm %s6448_s8, 8 }
 0x210   : > { %v4988_v30 = vpop.permute.xlu2 %1687  ;;  %v4990_v31 = vpop.permute.xlu0 %627  ;;  %vm2436_vm5 = vcmp.eq.s32.totalorder %v2372_v45, 0  ;;  %v2375_v45 = vld [vmem:[%s4973_s23 + $0x18] sm:$0xff]  ;;  %s3486_s24 = sshll.u32 %s331_s10, 4  ;;  %p3841_p1 = scmp.lt.s32.totalorder %s3839_s19, %s3835_s12  ;;  %s3487_s24 = int_to_ptr.vmem [resolvable:$true] %s3486_s24 }
 0x211   : > { %6632 = vst [vmem:[#allocation77_spill] sm:$0xff] %v4988_v30  ;;  %v4994_v19 = vpop.permute.xlu1 %1647  ;;  %v4996_v23 = vpack.c.bf16 %v2062_v5, %v2061_v50  ;;  %v1465_v50 = vmul.f32 %v4787_v12, %v6638_v63  ;;  %v1850_v5 = vmul.f32 %v4801_v46, %v4847_v55  ;;  %v1528_v32 = vadd.f32 %v1464_v41, %v1057_v28  ;;  %v6639_v63 = vld [vmem:[#allocation28_spill] sm:$0xff] }
 0x212   : > { %v1486_v16 = vmul.f32 %v4787_v12, %v6639_v63  ;;  %v1936_v55 = vadd.f32 %v1872_v52, %v1551_v42  ;;  %v6643_v63 = vld [vmem:[#allocation37_spill] sm:$0xff]  ;;  %vm2439_vm7 = vcmp.eq.s32.totalorder %v2375_v45, 0  ;;  %p3842_p2 = por %p3841_p1, %p3840_p0 }
 0x213   : > { %6633 = vst [vmem:[#allocation79_spill] sm:$0xff] %v4996_v23  ;;  %v1529_v24 = vadd.f32 %v1465_v50, %v1059_v47  ;;  %v1913_v7 = vadd.f32 %v1849_v4, %v1528_v32  ;;  %v2500_v50 = vsel %vm2436_vm5, 1, %v6637_v0  ;;  %v2401_v23 = vld [vmem:[%s4973_s23 + $0xe8] sm:$0xff]  ;;  %v2400_v30 = vld [vmem:[%s4973_s23 + $0xe0] sm:$0xff] }
 0x214   : > { %2221 = vmatmul.bf16.gmra.mxu1 %v4852_v25  ;;  %v1550_v38 = vadd.f32 %v1486_v16, %v1112_v56  ;;  %v2004_v42 = vadd.f32 %v4829_v14, %v1936_v55  ;;  %v850_v16 = vmul.f32 %v4785_v54, %v4907_v20  ;;  %v5034_v32 = vpop.f32.mrf.mxu3  ;;  %v2381_v56 = vld [vmem:[%s4973_s23 + $0x48] sm:$0xff]  ;;  %v2374_v20 = vld [vmem:[%s4973_s23 + $0x10] sm:$0xff]  ;;  %p3843_p3 = pnand %p3842_p2, %p3838_p13 }
 0x215   : > { %1831 = vperm.xlu2 %3741, %v3751_v29   ;;  %v1914_v28 = vadd.f32 %v1850_v5, %v1529_v24  ;;  %v2506_v24 = vsel %vm2442_vm4, 1, %v6637_v0  ;;  %6641 = vst [vmem:[#allocation11_spill] sm:$0xff] %v5034_v32  ;;  %v6642_v29 = vld [vmem:[#allocation5_spill] sm:$0xff]  ;;  %vm2445_vm6 = vcmp.eq.s32.totalorder %v2381_v56, 0  ;;  %vm2438_vm8 = vcmp.eq.s32.totalorder %v2374_v20, 0 }
 0x216   : > { %2568 = vperm.xlu0 %3742, %v2501_v37   ;;  %1827 = vperm.xlu1 %3740, %v4608_v61   ;;  %v1981_v37 = vadd.f32 %v4829_v14, %v1913_v7  ;;  %v6640_v61 = vld [vmem:[#allocation27_spill] sm:$0xff]  ;;  %v849_v48 = vmul.f32 %v4785_v54, %v6642_v29  ;;  %v2503_v20 = vsel %vm2439_vm7, 1, %v6637_v0 }
 0x217   : > { %v876_v47 = vmul.f32 %v4785_v54, %v6640_v61  ;;  %v1982_v5 = vadd.f32 %v4829_v14, %v1914_v28  ;;  %v1493_v28 = vmul.f32 %v4787_v12, %v4687_v40  ;;  %v6645_v61 = vld [vmem:[#allocation82_spill] sm:$0xff]  ;;  %v6646_v29 = vld [vmem:[#allocation71_spill] sm:$0xff] }
 0x218   : > { %v1700_v41 = vpop.permute.xlu2 %1699  ;;  %v5020_v25 = vpop.permute.xlu0 %642  ;;  %v2045_v7 = vmax.f32 %v1981_v37, 0.0 }
 0x219   : > { %v1871_v1 = vmul.f32 %v4801_v46, %v1700_v41  ;;  %v5023_v36 = vpop.permute.xlu1 %1659  ;;  %v1129_v55 = vadd.f32 %v6643_v63, %v876_v47  ;;  %v5045_v41 = vpop.f32.mrf.mxu0  ;;  %v2046_v37 = vmax.f32 %v1982_v5, 0.0  ;;  %v6649_v47 = vld [vmem:[#allocation40_spill] sm:$0xff] }
 0x21a   : > { %6644 = vst [vmem:[#allocation42_spill] sm:$0xff] %v5045_v41  ;;  %v875_v63 = vmul.f32 %v4785_v54, %v6649_v47 }
 0x21b   : > { %v1935_v4 = vadd.f32 %v1871_v1, %v1550_v38  ;;  %v2068_v1 = vmax.f32 %v2004_v42, 0.0  ;;  %v6651_v42 = vld [vmem:[#allocation66_spill] sm:$0xff]  ;;  %v2106_v5 = vpack.c.bf16 %v2046_v37, %v2045_v7  ;;  %v1557_v56 = vadd.f32 %v1493_v28, %v1129_v55  ;;  %v2376_v28 = vld [vmem:[%s4973_s23 + $0x20] sm:$0xff] }
 0x21c   : > { %v2377_v55 = vld [vmem:[%s4973_s23 + $0x28] sm:$0xff]  ;;  %vm2440_vm11 = vcmp.eq.s32.totalorder %v2376_v28, 0  ;;  %v2379_v28 = vld [vmem:[%s4973_s23 + $0x38] sm:$0xff] }
 0x21d   : > { %v2003_v52 = vadd.f32 %v4829_v14, %v1935_v4  ;;  %3743 = vset.pattern.permute.xlu2 %v6637_v0  ;;  %v1466_v4 = vmul.f32 %v4787_v12, %v6645_v61  ;;  %v1852_v61 = vmul.f32 %v4801_v46, %v4948_v53  ;;  %v6654_v53 = vld [vmem:[#allocation76_spill] sm:$0xff]  ;;  %vm2441_vm10 = vcmp.eq.s32.totalorder %v2377_v55, 0 }
 0x21e   : > { %2583 = vperm.xlu0 %3742, %v2506_v24   ;;  %1839 = vperm.xlu1 %3740, %v4621_v8   ;;  %v1064_v24 = vadd.f32 %v6646_v29, %v850_v16  ;;  %v2509_v29 = vsel %vm2445_vm6, 1, %v6637_v0  ;;  %v1851_v7 = vmul.f32 %v4801_v46, %v6654_v53  ;;  %v2387_v53 = vld [vmem:[%s4973_s23 + $0x78] sm:$0xff]  ;;  %v2380_v55 = vld [vmem:[%s4973_s23 + $0x40] sm:$0xff]  ;;  %vm2443_vm14 = vcmp.eq.s32.totalorder %v2379_v28, 0 }
 0x21f   : > { %2565 = vperm.xlu2 %3743, %v2500_v50   ;;  %v2067_v38 = vmax.f32 %v2003_v52, 0.0  ;;  %v1062_v50 = vadd.f32 %v6651_v42, %v849_v48  ;;  %v6652_v52 = vld [vmem:[#allocation74_spill] sm:$0xff]  ;;  %v1878_v42 = vmul.f32 %v4801_v46, %v4663_v10  ;;  %vm2451_vm12 = vcmp.eq.s32.totalorder %v2387_v53, 0 }
 0x220   : > { %v5052_v32 = vpop.permute.xlu2 %1711  ;;  %v5054_v8 = vpop.permute.xlu0 %657  ;;  %v1467_v16 = vmul.f32 %v4787_v12, %v6652_v52  ;;  %v6653_v48 = vld [vmem:[#allocation30_spill] sm:$0xff]  ;;  %v2384_v52 = vld [vmem:[%s4973_s23 + $0x60] sm:$0xff]  ;;  %vm2444_vm13 = vcmp.eq.s32.totalorder %v2380_v55, 0 }
 0x221   : > { %6647 = vst [vmem:[#allocation20_spill] sm:$0xff] %v5052_v32  ;;  %v5058_v41 = vpop.permute.xlu1 %1671  ;;  %v5060_v40 = vpack.c.bf16 %v2068_v1, %v2067_v38  ;;  %v1530_v47 = vadd.f32 %v1466_v4, %v1062_v50  ;;  %v2502_v38 = vsel %vm2438_vm8, 1, %v6637_v0  ;;  %v1127_v1 = vadd.f32 %v6653_v48, %v875_v63  ;;  %v6655_v4 = vld [vmem:[#allocation35_spill] sm:$0xff]  ;;  %v5081_v50 = vpop.f32.mrf.mxu3  ;;  %v6662_v32 = vld [vmem:[#allocation17_spill] sm:$0xff] }
 0x222   : > { %6648 = vst [vmem:[#allocation85_spill] sm:$0xff] %v5054_v8  ;;  %v1531_v45 = vadd.f32 %v1467_v16, %v1064_v24  ;;  %v1492_v24 = vmul.f32 %v4787_v12, %v6655_v4  ;;  %v1942_v16 = vadd.f32 %v1878_v42, %v1557_v56  ;;  %vm2448_vm9 = vcmp.eq.s32.totalorder %v2384_v52, 0  ;;  %v6683_v8 = vld [vmem:[#allocation13_spill] sm:$0xff] }
 0x223   : > { %6650 = vst [vmem:[#allocation83_spill] sm:$0xff] %v5060_v40  ;;  %v1915_v63 = vadd.f32 %v1851_v7, %v1530_v47  ;;  %v2512_v47 = vsel %vm2448_vm9, 1, %v6637_v0  ;;  %v2505_v42 = vsel %vm2441_vm10, 1, %v6637_v0  ;;  %v2504_v52 = vsel %vm2440_vm11, 1, %v6637_v0  ;;  %v2382_v40 = vld [vmem:[%s4973_s23 + $0x50] sm:$0xff] }
 0x224   : > { %2226 = vmatmul.bf16.gmra.mxu1 %v2106_v5  ;;  %v1916_v37 = vadd.f32 %v1852_v61, %v1531_v45  ;;  %6656 = vst [vmem:[#allocation16_spill] sm:$0xff] %v5081_v50  ;;  %v5085_v61 = vpop.f32.mrf.mxu0  ;;  %v2383_v50 = vld [vmem:[%s4973_s23 + $0x58] sm:$0xff]  ;;  %vm2446_vm1 = vcmp.eq.s32.totalorder %v2382_v40, 0 }
 0x225   : > { %6658 = vst [vmem:[#allocation15_spill] sm:$0xff] %v5085_v61  ;;  %vm2447_vm0 = vcmp.eq.s32.totalorder %v2383_v50, 0  ;;  %v2393_v50 = vld [vmem:[%s4973_s23 + $0xa8] sm:$0xff] }
 0x226   : > { %2592 = vperm.xlu0 %3742, %v2509_v29   ;;  %3744 = vset.pattern.permute.xlu1 %v6637_v0  ;;  %v1556_v29 = vadd.f32 %v1492_v24, %v1127_v1  ;;  %v1984_v56 = vadd.f32 %v4829_v14, %v1916_v37  ;;  %v1983_v1 = vadd.f32 %v4829_v14, %v1915_v63  ;;  %vm2457_vm2 = vcmp.eq.s32.totalorder %v2393_v50, 0 }
 0x227   : > { %2574 = vperm.xlu2 %3743, %v2503_v20   ;;  %2571 = vperm.xlu1 %3744, %v2502_v38   ;;  %v2010_v38 = vadd.f32 %v4829_v14, %v1942_v16 }
 0x228   : > { %v1724_v10 = vpop.permute.xlu2 %1723  ;;  %v5083_v5 = vpop.permute.xlu0 %672  ;;  %v2048_v4 = vmax.f32 %v1984_v56, 0.0 }
 0x229   : > { %6657 = vst [vmem:[#allocation86_spill] sm:$0xff] %v5083_v5  ;;  %v1877_v45 = vmul.f32 %v4801_v46, %v1724_v10  ;;  %v5088_v48 = vpop.permute.xlu1 %1683  ;;  %v2074_v24 = vmax.f32 %v2010_v38, 0.0  ;;  %v5102_v63 = vpop.f32.mrf.mxu3  ;;  %v2515_v38 = vsel %vm2451_vm12, 1, %v6637_v0 }
 0x22b   : > { %v1941_v20 = vadd.f32 %v1877_v45, %v1556_v29  ;;  %v2047_v29 = vmax.f32 %v1983_v1, 0.0  ;;  %v6660_v1 = vld [vmem:[#allocation24_spill] sm:$0xff] }
 0x22c   : > { %v873_v53 = vmul.f32 %v4785_v54, %v6660_v1  ;;  %v2511_v1 = vsel %vm2447_vm0, 1, %v6637_v0 }
 0x22d   : > { %v2009_v7 = vadd.f32 %v4829_v14, %v1941_v20  ;;  %v2107_v20 = vpack.c.bf16 %v2048_v4, %v2047_v29 }
 0x22e   : > { %2601 = vperm.xlu0 %3742, %v2512_v47   ;;  %v1121_v47 = vpop.f32.mrf.mxu0 }
 0x22f   : > { %2580 = vperm.xlu2 %3743, %v2505_v42   ;;  %2577 = vperm.xlu1 %3744, %v2504_v52   ;;  %v2073_v37 = vmax.f32 %v2009_v7, 0.0  ;;  %v2508_v42 = vsel %vm2444_vm13, 1, %v6637_v0  ;;  %v2507_v52 = vsel %vm2443_vm14, 1, %v6637_v0  ;;  %v2390_v7 = vld [vmem:[%s4973_s23 + $0x90] sm:$0xff]  ;;  %v1122_v55 = vadd.f32 %v1121_v47, %v873_v53 }
 0x230   : > { %v5100_v10 = vpop.permute.xlu2 %1735  ;;  %v688_v16 = vpop.permute.xlu0 %687  ;;  %vm2454_vm15 = vcmp.eq.s32.totalorder %v2390_v7, 0  ;;  %v1875_v53 = vmul.f32 %v4801_v46, %v4654_v11  ;;  %v2385_v7 = vld [vmem:[%s4973_s23 + $0x68] sm:$0xff]  ;;  %v6664_v11 = vld [vmem:[#allocation92_spill] sm:$0xff] }
 0x231   : > { %v5104_v45 = vpop.permute.xlu1 %1695  ;;  %v5106_v56 = vpack.c.bf16 %v2074_v24, %v2073_v37  ;;  %v1490_v37 = vmul.f32 %v4787_v12, %v4676_v22  ;;  %v874_v29 = vmul.f32 %v4785_v54, %v688_v16  ;;  %v2510_v22 = vsel %vm2446_vm1, 1, %v6637_v0  ;;  %v2386_v16 = vld [vmem:[%s4973_s23 + $0x70] sm:$0xff] }
 0x232   : > { %6659 = vst [vmem:[#allocation26_spill] sm:$0xff] %v5104_v45  ;;  %vm2450_vm3 = vcmp.eq.s32.totalorder %v2386_v16, 0  ;;  %vm2449_vm4 = vcmp.eq.s32.totalorder %v2385_v7, 0 }
 0x233   : > { %v1554_v47 = vadd.f32 %v1490_v37, %v1122_v55  ;;  %v854_v55 = vmul.f32 %v4785_v54, %v6662_v32  ;;  %v6665_v32 = vld [vmem:[#allocation75_spill] sm:$0xff] }
 0x234   : > { %2231 = vmatmul.bf16.gmra.mxu1 %v2107_v20  ;;  %v5125_v20 = vpop.f32.mrf.mxu3 }
 0x235   : > { %v1939_v37 = vadd.f32 %v1875_v53, %v1554_v47  ;;  %v1470_v47 = vmul.f32 %v4787_v12, %v6665_v32  ;;  %v2521_v53 = vsel %vm2457_vm2, 1, %v6637_v0  ;;  %v2389_v32 = vld [vmem:[%s4973_s23 + $0x88] sm:$0xff]  ;;  %vm2465_vm2 = vcmp.eq.s32.totalorder %v2401_v23, 0 }
 0x236   : > { %2610 = vperm.xlu0 %3742, %v2515_v38   ;;  %v1123_v38 = vpop.f32.mrf.mxu0  ;;  %vm2453_vm6 = vcmp.eq.s32.totalorder %v2389_v32, 0 }
 0x237   : > { %2589 = vperm.xlu2 %3743, %v2508_v42   ;;  %2586 = vperm.xlu1 %3744, %v2507_v52   ;;  %v2518_v42 = vsel %vm2454_vm15, 1, %v6637_v0  ;;  %v853_v52 = vmul.f32 %v4785_v54, %v4929_v62  ;;  %v1124_v40 = vadd.f32 %v1123_v38, %v874_v29  ;;  %v1491_v62 = vmul.f32 %v4787_v12, %v4641_v58 }
 0x238   : > { %v5116_v28 = vpop.permute.xlu2 %1747  ;;  %v5118_v4 = vpop.permute.xlu0 %702  ;;  %v1074_v29 = vadd.f32 %v6664_v11, %v854_v55  ;;  %v2007_v50 = vadd.f32 %v4829_v14, %v1939_v37 }
 0x239   : > { %v5122_v24 = vpop.permute.xlu1 %1707  ;;  %v1555_v58 = vadd.f32 %v1491_v62, %v1124_v40  ;;  %v2513_v40 = vsel %vm2449_vm4, 1, %v6637_v0  ;;  %v2396_v62 = vld [vmem:[%s4973_s23 + $0xc0] sm:$0xff] }
 0x23a   : > { %6661 = vst [vmem:[#allocation22_spill] sm:$0xff] %v5122_v24  ;;  %v6663_v24 = vld [vmem:[#allocation90_spill] sm:$0xff]  ;;  %vm2460_vm5 = vcmp.eq.s32.totalorder %v2396_v62, 0  ;;  %v2391_v62 = vld [vmem:[%s4973_s23 + $0x98] sm:$0xff] }
 0x23b   : > { %v1072_v61 = vadd.f32 %v6663_v24, %v853_v52  ;;  %v6666_v52 = vld [vmem:[#allocation14_spill] sm:$0xff]  ;;  %vm2455_vm10 = vcmp.eq.s32.totalorder %v2391_v62, 0 }
 0x23c   : > { %v5161_v55 = vpop.f32.mrf.mxu3  ;;  %v2519_v62 = vsel %vm2455_vm10, 1, %v6637_v0 }
 0x23d   : > { %v1534_v16 = vadd.f32 %v1470_v47, %v1072_v61  ;;  %6667 = vst [vmem:[#allocation21_spill] sm:$0xff] %v5161_v55  ;;  %v2071_v47 = vmax.f32 %v2007_v50, 0.0 }
 0x23e   : > { %2619 = vperm.xlu0 %3742, %v2518_v42   ;;  %v1855_v42 = vmul.f32 %v4801_v46, %v4967_v49  ;;  %v2514_v49 = vsel %vm2450_vm3, 1, %v6637_v0  ;;  %vm2464_vm3 = vcmp.eq.s32.totalorder %v2400_v30, 0  ;;  %v2529_v30 = vsel %vm2465_vm2, 1, %v6637_v0 }
 0x23f   : > { %2598 = vperm.xlu2 %3743, %v2511_v1   ;;  %2595 = vperm.xlu1 %3744, %v2510_v22   ;;  %v1471_v1 = vmul.f32 %v4787_v12, %v6666_v52  ;;  %v1856_v22 = vmul.f32 %v4801_v46, %v4905_v39  ;;  %v2388_v52 = vld [vmem:[%s4973_s23 + $0x80] sm:$0xff]  ;;  %v2528_v23 = vsel %vm2464_vm3, 1, %v6637_v0 }
 0x240   : > { %v5142_v5 = vpop.permute.xlu2 %1759  ;;  %v5144_v45 = vpop.permute.xlu0 %717  ;;  %vm2452_vm7 = vcmp.eq.s32.totalorder %v2388_v52, 0 }
 0x241   : > { %v1720_v38 = vpop.permute.xlu1 %1719  ;;  %v1535_v11 = vadd.f32 %v1471_v1, %v1074_v29  ;;  %v2524_v1 = vsel %vm2460_vm5, 1, %v6637_v0  ;;  %v2516_v50 = vsel %vm2452_vm7, 1, %v6637_v0 }
 0x242   : > { %v1876_v24 = vmul.f32 %v4801_v46, %v1720_v38  ;;  %v1919_v38 = vadd.f32 %v1855_v42, %v1534_v16 }
 0x243   : > { %v1920_v61 = vadd.f32 %v1856_v22, %v1535_v11  ;;  %v856_v22 = vmul.f32 %v4785_v54, %v4945_v17  ;;  %v6669_v11 = vld [vmem:[#allocation8_spill] sm:$0xff]  ;;  %v6671_v17 = vld [vmem:[#allocation97_spill] sm:$0xff] }
 0x244   : > { %v1940_v7 = vadd.f32 %v1876_v24, %v1555_v58  ;;  %2236 = vmatmul.bf16.gmra.mxu1 %v4910_v13  ;;  %v1987_v24 = vadd.f32 %v4829_v14, %v1919_v38  ;;  %v855_v38 = vmul.f32 %v4785_v54, %v6669_v11  ;;  %v5185_v52 = vpop.f32.mrf.mxu3  ;;  %v6673_v11 = vld [vmem:[#allocation78_spill] sm:$0xff] }
 0x245   : > { %v1988_v16 = vadd.f32 %v4829_v14, %v1920_v61 }
 0x246   : > { %2628 = vperm.xlu0 %3742, %v2521_v53   ;;  %v2008_v39 = vadd.f32 %v4829_v14, %v1940_v7  ;;  %v2517_v53 = vsel %vm2453_vm6, 1, %v6637_v0  ;;  %v2399_v7 = vld [vmem:[%s4973_s23 + $0xd8] sm:$0xff] }
 0x247   : > { %2607 = vperm.xlu2 %3743, %v2514_v49   ;;  %2604 = vperm.xlu1 %3744, %v2513_v40   ;;  %v2051_v49 = vmax.f32 %v1987_v24, 0.0  ;;  %v2392_v40 = vld [vmem:[%s4973_s23 + $0xa0] sm:$0xff]  ;;  %vm2463_vm8 = vcmp.eq.s32.totalorder %v2399_v7, 0 }
 0x248   : > { %v5167_v37 = vpop.permute.xlu2 %1771  ;;  %v5169_v13 = vpop.permute.xlu0 %732  ;;  %v2072_v58 = vmax.f32 %v2008_v39, 0.0  ;;  %v6670_v39 = vld [vmem:[#allocation89_spill] sm:$0xff]  ;;  %v6672_v24 = vld [vmem:[#allocation96_spill] sm:$0xff]  ;;  %vm2456_vm9 = vcmp.eq.s32.totalorder %v2392_v40, 0 }
 0x249   : > { %6668 = vst [vmem:[#allocation12_spill] sm:$0xff] %v5167_v37  ;;  %v1732_v29 = vpop.permute.xlu1 %1731  ;;  %v1472_v32 = vmul.f32 %v4787_v12, %v6670_v39  ;;  %v2520_v40 = vsel %vm2456_vm9, 1, %v6637_v0 }
 0x24a   : > { %v2119_v42 = vpack.c.bf16 %v2072_v58, %v2071_v47  ;;  %v1079_v47 = vadd.f32 %v6671_v17, %v856_v22  ;;  %v1858_v22 = vmul.f32 %v4801_v46, %v4994_v19  ;;  %v6674_v17 = vld [vmem:[#allocation81_spill] sm:$0xff]  ;;  %v878_v19 = vmul.f32 %v4785_v54, %v6675_v33 }
 0x24c   : > { %2291 = vmatmul.bf16.vlgmr.msra.gmra.mxu2 %v2119_v42  ;;  %v2052_v42 = vmax.f32 %v1988_v16, 0.0  ;;  %v2527_v16 = vsel %vm2463_vm8, 1, %v6637_v0 }
 0x24e   : > { %2637 = vperm.xlu0 %3742, %v2524_v1   ;;  %v1077_v1 = vadd.f32 %v6672_v24, %v855_v38  ;;  %v877_v38 = vmul.f32 %v4785_v54, %v5118_v4  ;;  %v1857_v24 = vmul.f32 %v4801_v46, %v6674_v17  ;;  %v6676_v4 = vld [vmem:[#allocation41_spill] sm:$0xff]  ;;  %v6678_v17 = vld [vmem:[#allocation46_spill] sm:$0xff] }
 0x24f   : > { %2616 = vperm.xlu2 %3743, %v2517_v53   ;;  %2613 = vperm.xlu1 %3744, %v2516_v50   ;;  %v1473_v53 = vmul.f32 %v4787_v12, %v6673_v11  ;;  %v2109_v50 = vpack.c.bf16 %v2052_v42, %v2051_v49  ;;  %v2402_v11 = vld [vmem:[%s4973_s23 + $0xf0] sm:$0xff]  ;;  %v1134_v33 = vadd.f32 %v6678_v17, %v878_v19  ;;  %v2405_v17 = vld [vmem:[%s4973_s23 + $0x108] sm:$0xff] }
 0x250   : > { %v5188_v58 = vpop.permute.xlu2 %1783  ;;  %v5190_v61 = vpop.permute.xlu0 %747  ;;  %v1536_v39 = vadd.f32 %v1472_v32, %v1077_v1  ;;  %v2395_v32 = vld [vmem:[%s4973_s23 + $0xb8] sm:$0xff]  ;;  %v2394_v42 = vld [vmem:[%s4973_s23 + $0xb0] sm:$0xff]  ;;  %v1132_v1 = vadd.f32 %v6676_v4, %v877_v38  ;;  %vm2466_vm11 = vcmp.eq.s32.totalorder %v2402_v11, 0  ;;  %v1880_v19 = vmul.f32 %v4801_v46, %v5100_v10  ;;  %v6682_v4 = vld [vmem:[#allocation49_spill] sm:$0xff] }
 0x251   : > { %v5193_v55 = vpop.permute.xlu1 %1743  ;;  %v1537_v7 = vadd.f32 %v1473_v53, %v1079_v47  ;;  %vm2459_vm12 = vcmp.eq.s32.totalorder %v2395_v32, 0  ;;  %vm2458_vm13 = vcmp.eq.s32.totalorder %v2394_v42, 0  ;;  %v5239_v10 = vmul.f32 %v4785_v54, %v6683_v8 }
 0x252   : > { %v1921_v47 = vadd.f32 %v1857_v24, %v1536_v39  ;;  %v2530_v24 = vsel %vm2466_vm11, 1, %v6637_v0  ;;  %v2523_v42 = vsel %vm2459_vm12, 1, %v6637_v0  ;;  %vm2469_vm14 = vcmp.eq.s32.totalorder %v2405_v17, 0  ;;  %v6688_v17 = vld [vmem:[#allocation55_spill] sm:$0xff] }
 0x253   : > { %v1922_v49 = vadd.f32 %v1858_v22, %v1537_v7  ;;  %v5217_v22 = vpop.f32.mrf.mxu3  ;;  %v1879_v7 = vmul.f32 %v4801_v46, %v1732_v29  ;;  %v2522_v29 = vsel %vm2458_vm13, 1, %v6637_v0 }
 0x254   : > { %2241 = vmatmul.bf16.gmra.mxu1 %v2109_v50  ;;  %6679 = vst [vmem:[#allocation62_spill] sm:$0xff] %v5217_v22  ;;  %v1989_v11 = vadd.f32 %v4829_v14, %v1921_v47  ;;  %v2397_v47 = vld [vmem:[%s4973_s23 + $0xc8] sm:$0xff] }
 0x255   : > { %v1990_v38 = vadd.f32 %v4829_v14, %v1922_v49  ;;  %v881_v49 = vmul.f32 %v4785_v54, %v6682_v4  ;;  %vm2461_vm0 = vcmp.eq.s32.totalorder %v2397_v47, 0 }
 0x256   : > { %2646 = vperm.xlu0 %3742, %v2527_v16   ;;  %v6680_v16 = vld [vmem:[#allocation98_spill] sm:$0xff] }
 0x257   : > { %2625 = vperm.xlu2 %3743, %v2520_v40   ;;  %2622 = vperm.xlu1 %3744, %v2519_v62   ;;  %v1494_v39 = vmul.f32 %v4787_v12, %v6680_v16  ;;  %v6681_v40 = vld [vmem:[#allocation39_spill] sm:$0xff]  ;;  %v2054_v22 = vmax.f32 %v1990_v38, 0.0  ;;  %v6686_v38 = vld [vmem:[#allocation34_spill] sm:$0xff]  ;;  %v1142_v8 = vadd.f32 %v4700_v27, %v881_v49  ;;  %v880_v27 = vmul.f32 %v4785_v54, %v5144_v45 }
 0x258   : > { %v5212_v53 = vpop.permute.xlu2 %1795  ;;  %v763_v50 = vpop.permute.xlu0 %762  ;;  %v1495_v62 = vmul.f32 %v4787_v12, %v6681_v40  ;;  %v6691_v45 = vld [vmem:[#allocation23_spill] sm:$0xff] }
 0x259   : > { %6677 = vst [vmem:[#allocation58_spill] sm:$0xff] %v5212_v53  ;;  %v5214_v35 = vpop.permute.xlu1 %1755  ;;  %v1558_v32 = vadd.f32 %v1494_v39, %v1132_v1  ;;  %v2398_v53 = vld [vmem:[%s4973_s23 + $0xd0] sm:$0xff]  ;;  %v6685_v39 = vld [vmem:[#allocation61_spill] sm:$0xff] }
 0x25a   : > { %v1559_v16 = vadd.f32 %v1495_v62, %v1134_v33  ;;  %v6684_v1 = vld [vmem:[#allocation31_spill] sm:$0xff]  ;;  %v890_v37 = vmul.f32 %v4785_v54, %v6685_v39  ;;  %v882_v62 = vmul.f32 %v4785_v54, %v6686_v38  ;;  %vm2462_vm15 = vcmp.eq.s32.totalorder %v2398_v53, 0 }
 0x25b   : > { %v1943_v40 = vadd.f32 %v1879_v7, %v1558_v32  ;;  %v2053_v7 = vmax.f32 %v1989_v11, 0.0  ;;  %v2533_v53 = vsel %vm2469_vm14, 1, %v6637_v0  ;;  %v5262_v49 = vpop.f32.mrf.mxu3  ;;  %v860_v39 = vmul.f32 %v4785_v54, %v6691_v45  ;;  %v6694_v45 = vld [vmem:[#allocation57_spill] sm:$0xff] }
 0x25c   : > { %2296 = vmatmul.bf16.gmra.mxu2 %v5106_v56  ;;  %v879_v56 = vmul.f32 %v4785_v54, %v6684_v1  ;;  %v1944_v4 = vadd.f32 %v1880_v19, %v1559_v16  ;;  %v1164_v32 = vadd.f32 %v4939_v44, %v890_v37  ;;  %v6687_v16 = vld [vmem:[#allocation44_spill] sm:$0xff]  ;;  %v1507_v1 = vmul.f32 %v4787_v12, %v6688_v17 }
 0x25d   : > { %v2011_v19 = vadd.f32 %v4829_v14, %v1943_v40  ;;  %v1498_v11 = vmul.f32 %v4787_v12, %v6687_v16  ;;  %6689 = vst [vmem:[#allocation73_spill] sm:$0xff] %v5262_v49  ;;  %v1892_v44 = vmul.f32 %v4801_v46, %v5188_v58  ;;  %v2526_v37 = vsel %vm2462_vm15, 1, %v6637_v0  ;;  %v6690_v40 = vld [vmem:[#allocation19_spill] sm:$0xff]  ;;  %v2408_v58 = vld [vmem:[%s4973_s23 + $0x120] sm:$0xff] }
 0x25e   : > { %2655 = vperm.xlu0 %3742, %v2530_v24   ;;  %v5271_v47 = vmul.f32 %v4787_v12, %v6690_v40  ;;  %v5277_v16 = vadd.f32 %v4714_v26, %v882_v62  ;;  %v6693_v40 = vld [vmem:[#allocation53_spill] sm:$0xff]  ;;  %v1139_v26 = vadd.f32 %v6694_v45, %v880_v27  ;;  %v1506_v62 = vmul.f32 %v4787_v12, %v4694_v18  ;;  %v6699_v45 = vld [vmem:[#allocation107_spill] sm:$0xff] }
 0x25f   : > { %2634 = vperm.xlu2 %3743, %v2523_v42   ;;  %2631 = vperm.xlu1 %3744, %v2522_v29   ;;  %v889_v42 = vmul.f32 %v4785_v54, %v763_v50  ;;  %v2110_v29 = vpack.c.bf16 %v2054_v22, %v2053_v7  ;;  %v2525_v50 = vsel %vm2461_vm0, 1, %v6637_v0  ;;  %v2012_v22 = vadd.f32 %v4829_v14, %v1944_v4  ;;  %v6692_v7 = vld [vmem:[#allocation52_spill] sm:$0xff] }
 0x260   : > { %v5245_v43 = vpop.permute.xlu2 %1807  ;;  %v778_v33 = vpop.permute.xlu0 %777  ;;  %v1137_v38 = vadd.f32 %v6692_v7, %v879_v56  ;;  %v5280_v17 = vadd.f32 %v1498_v11, %v1142_v8  ;;  %v2075_v4 = vmax.f32 %v2011_v19, 0.0  ;;  %v5287_v59 = vmul.f32 %v4785_v54, %v6693_v40  ;;  %v6695_v19 = vld [vmem:[#allocation100_spill] sm:$0xff] }
 0x261   : > { %v5250_v24 = vpop.permute.xlu1 %1767  ;;  %v1162_v49 = vadd.f32 %v4916_v57, %v889_v42  ;;  %v1496_v56 = vmul.f32 %v4787_v12, %v4698_v15  ;;  %v2076_v42 = vmax.f32 %v2012_v22, 0.0  ;;  %vm2472_vm1 = vcmp.eq.s32.totalorder %v2408_v58, 0 }
 0x262   : > { %v1497_v11 = vmul.f32 %v4787_v12, %v6695_v19  ;;  %v892_v27 = vmul.f32 %v4785_v54, %v778_v33  ;;  %v2536_v7 = vsel %vm2472_vm1, 1, %v6637_v0  ;;  %v6696_v33 = vld [vmem:[#allocation64_spill] sm:$0xff] }
 0x263   : > { %v5318_v19 = vpop.f32.mrf.mxu3 }
 0x264   : > { %2246 = vmatmul.bf16.gmra.mxu1 %v2110_v29  ;;  %v1571_v29 = vadd.f32 %v1507_v1, %v1164_v32  ;;  %v1882_v1 = vmul.f32 %v4801_v46, %v5193_v55  ;;  %v1561_v22 = vadd.f32 %v1497_v11, %v1139_v26  ;;  %v1089_v26 = vadd.f32 %v6699_v45, %v860_v39  ;;  %v2403_v11 = vld [vmem:[%s4973_s23 + $0xf8] sm:$0xff]  ;;  %v6702_v45 = vld [vmem:[#allocation69_spill] sm:$0xff] }
 0x265   : > { %vm2467_vm6 = vcmp.eq.s32.totalorder %v2403_v11, 0  ;;  %v6704_v11 = vld [vmem:[#allocation113_spill] sm:$0xff] }
 0x266   : > { %2664 = vperm.xlu0 %3742, %v2533_v53   ;;  %v1956_v8 = vadd.f32 %v1892_v44, %v1571_v29  ;;  %v1570_v53 = vadd.f32 %v1506_v62, %v1162_v49  ;;  %v2121_v44 = vpack.c.bf16 %v2076_v42, %v2075_v4  ;;  %v1513_v49 = vmul.f32 %v4787_v12, %v6696_v33  ;;  %v6700_v62 = vld [vmem:[#allocation80_spill] sm:$0xff] }
 0x267   : > { %2643 = vperm.xlu2 %3743, %v2526_v37   ;;  %2640 = vperm.xlu1 %3744, %v2525_v50   ;;  %v1560_v37 = vadd.f32 %v1496_v56, %v1137_v38  ;;  %v859_v50 = vmul.f32 %v4785_v54, %v4962_v21  ;;  %v6697_v38 = vld [vmem:[#allocation68_spill] sm:$0xff]  ;;  %v6698_v21 = vld [vmem:[#allocation102_spill] sm:$0xff]  ;;  %v1946_v40 = vadd.f32 %v1882_v1, %v1561_v22 }
 0x268   : > { %v5294_v57 = vpop.permute.xlu2 %1819  ;;  %v793_v32 = vpop.permute.xlu0 %792  ;;  %v2024_v55 = vadd.f32 %v4829_v14, %v1956_v8  ;;  %v896_v29 = vmul.f32 %v4785_v54, %v6697_v38  ;;  %v1881_v4 = vmul.f32 %v4801_v46, %v6698_v21  ;;  %v2411_v56 = vld [vmem:[%s4973_s23 + $0x138] sm:$0xff]  ;;  %v1476_v42 = vmul.f32 %v4787_v12, %v6700_v62  ;;  %v2404_v8 = vld [vmem:[%s4973_s23 + $0x100] sm:$0xff] }
 0x269   : > { %v1780_v15 = vpop.permute.xlu1 %1779  ;;  %v1169_v14 = vadd.f32 %v5004_v60, %v892_v27  ;;  %v1509_v60 = vmul.f32 %v4787_v12, %v4707_v34  ;;  %vm2475_vm4 = vcmp.eq.s32.totalorder %v2411_v56, 0  ;;  %v1861_v38 = vmul.f32 %v4801_v46, %v5023_v36  ;;  %v6703_v62 = vld [vmem:[#allocation72_spill] sm:$0xff] }
 0x26a   : > { %v1891_v18 = vmul.f32 %v4801_v46, %v1780_v15  ;;  %v5326_v15 = vld [vmem:[%s6445_s5] ss:$0 sm:$0xff]  ;;  %v1945_v39 = vadd.f32 %v1881_v4, %v1560_v37  ;;  %v2088_v33 = vmax.f32 %v2024_v55, 0.0  ;;  %vm2468_vm5 = vcmp.eq.s32.totalorder %v2404_v8, 0 }
 0x26b   : > { %v895_v37 = vmul.f32 %v4785_v54, %v793_v32  ;;  %v2539_v36 = vsel %vm2475_vm4, 1, %v6637_v0  ;;  %v1898_v4 = vmul.f32 %v4801_v46, %v5245_v43  ;;  %v2531_v56 = vsel %vm2467_vm6, 1, %v6637_v0  ;;  %v2414_v43 = vld [vmem:[%s4973_s23 + $0x150] sm:$0xff] }
 0x26c   : > { %v1955_v58 = vadd.f32 %v1891_v18, %v1570_v53  ;;  %2301 = vmatmul.bf16.gmra.mxu2 %v2121_v44  ;;  %v1179_v53 = vadd.f32 %v5125_v20, %v896_v29  ;;  %v6701_v18 = vld [vmem:[#allocation105_spill] sm:$0xff]  ;;  %v2014_v20 = vadd.f32 %v5326_v15, %v1946_v40  ;;  %v2013_v29 = vadd.f32 %v5326_v15, %v1945_v39 }
 0x26d   : > { %v1087_v44 = vadd.f32 %v6701_v18, %v859_v50  ;;  %v1573_v50 = vadd.f32 %v1509_v60, %v1169_v14  ;;  %v2532_v40 = vsel %vm2468_vm5, 1, %v6637_v0  ;;  %v1541_v14 = vadd.f32 %v5271_v47, %v1089_v26  ;;  %v2406_v60 = vld [vmem:[%s4973_s23 + $0x110] sm:$0xff]  ;;  %v1193_v47 = vpop.f32.mrf.mxu3 }
 0x26e   : > { %2673 = vperm.xlu0 %3742, %v2536_v7   ;;  %v2023_v1 = vadd.f32 %v5326_v15, %v1955_v58  ;;  %v1577_v39 = vadd.f32 %v1513_v49, %v1179_v53  ;;  %v2078_v18 = vmax.f32 %v2014_v20, 0.0  ;;  %v6707_v26 = vld [vmem:[#allocation110_spill] sm:$0xff]  ;;  %vm2478_vm7 = vcmp.eq.s32.totalorder %v2414_v43, 0 }
 0x26f   : > { %2652 = vperm.xlu2 %3743, %v2529_v30   ;;  %2649 = vperm.xlu1 %3744, %v2528_v23   ;;  %v1862_v23 = vmul.f32 %v4801_v46, %v4943_v51  ;;  %v1540_v55 = vadd.f32 %v1476_v42, %v1087_v44  ;;  %v5357_v51 = vmul.f32 %v4787_v12, %v6702_v45  ;;  %v2407_v44 = vld [vmem:[%s4973_s23 + $0x118] sm:$0xff]  ;;  %vm2470_vm9 = vcmp.eq.s32.totalorder %v2406_v60, 0 }
 0x270   : > { %v5333_v27 = vpop.permute.xlu2 %1831  ;;  %v808_v22 = vpop.permute.xlu0 %807  ;;  %v2087_v7 = vmax.f32 %v2023_v1, 0.0  ;;  %v902_v42 = vmul.f32 %v4785_v54, %v6703_v62  ;;  %v1092_v1 = vadd.f32 %v6704_v11, %v5239_v10  ;;  %v1512_v10 = vmul.f32 %v4787_v12, %v6707_v26  ;;  %v6708_v11 = vld [vmem:[#allocation84_spill] sm:$0xff] }
 0x271   : > { %v1792_v58 = vpop.permute.xlu1 %1791  ;;  %v5337_v21 = vpop.f32.mrf.mxu1  ;;  %v1925_v8 = vadd.f32 %v1861_v38, %v1540_v55  ;;  %v1962_v49 = vadd.f32 %v1898_v4, %v1577_v39  ;;  %v1883_v38 = vmul.f32 %v4801_v46, %v5116_v28  ;;  %vm2471_vm8 = vcmp.eq.s32.totalorder %v2407_v44, 0  ;;  %v6709_v39 = vld [vmem:[#allocation104_spill] sm:$0xff]  ;;  %v2417_v44 = vld [vmem:[%s4973_s23 + $0x168] sm:$0xff] }
 0x272   : > { %v1894_v34 = vmul.f32 %v4801_v46, %v1792_v58  ;;  %v5342_v30 = vpack.c.bf16 %v2088_v33, %v2087_v7  ;;  %v6705_v7 = vld [vmem:[#allocation95_spill] sm:$0xff]  ;;  %v6706_v58 = vld [vmem:[#allocation109_spill] sm:$0xff]  ;;  %v898_v55 = vmul.f32 %v4785_v54, %v808_v22  ;;  %v862_v28 = vmul.f32 %v4785_v54, %v4990_v31 }
 0x273   : > { %v1478_v33 = vmul.f32 %v4787_v12, %v6705_v7  ;;  %v2542_v45 = vsel %vm2478_vm7, 1, %v6637_v0  ;;  %v2535_v22 = vsel %vm2471_vm8, 1, %v6637_v0  ;;  %v2030_v43 = vadd.f32 %v5326_v15, %v1962_v49  ;;  %v6710_v49 = vld [vmem:[#allocation114_spill] sm:$0xff] }
 0x274   : > { %v5350_v32 = vadd.f32 %v1894_v34, %v1573_v50  ;;  %2251 = vmatmul.bf16.gmra.mxu1 %v4950_v3  ;;  %v1177_v3 = vadd.f32 %v5102_v63, %v895_v37  ;;  %v1499_v50 = vmul.f32 %v4787_v12, %v6706_v58  ;;  %v1926_v34 = vadd.f32 %v1862_v23, %v1541_v14 }
 0x275   : > { %v2077_v63 = vmax.f32 %v2013_v29, 0.0  ;;  %v1993_v23 = vadd.f32 %v5326_v15, %v1925_v8  ;;  %v2534_v8 = vsel %vm2470_vm9, 1, %v6637_v0  ;;  %v1884_v31 = vmul.f32 %v4801_v46, %v6709_v39 }
 0x276   : > { %2682 = vperm.xlu0 %3742, %v2539_v36   ;;  %v1576_v36 = vadd.f32 %v1512_v10, %v1177_v3  ;;  %v1994_v62 = vadd.f32 %v5326_v15, %v1926_v34  ;;  %v1947_v3 = vadd.f32 %v1883_v38, %v5280_v17  ;;  %v1542_v60 = vadd.f32 %v1478_v33, %v1092_v1  ;;  %v2409_v34 = vld [vmem:[%s4973_s23 + $0x128] sm:$0xff] }
 0x277   : > { %2661 = vperm.xlu2 %3743, %v2532_v40   ;;  %2658 = vperm.xlu1 %3744, %v2531_v56   ;;  %v2122_v29 = vpack.c.bf16 %v2078_v18, %v2077_v63  ;;  %v1563_v56 = vadd.f32 %v1499_v50, %v5277_v16  ;;  %v1479_v16 = vmul.f32 %v4787_v12, %v6708_v11  ;;  %v2057_v18 = vmax.f32 %v1993_v23, 0.0  ;;  %v2410_v50 = vld [vmem:[%s4973_s23 + $0x130] sm:$0xff] }
 0x278   : > { %v823_v53 = vpop.permute.xlu0 %822  ;;  %v1194_v7 = vadd.f32 %v1193_v47, %v902_v42  ;;  %v1184_v58 = vadd.f32 %v5185_v52, %v898_v55  ;;  %v1515_v63 = vmul.f32 %v4787_v12, %v6710_v49  ;;  %v2058_v17 = vmax.f32 %v1994_v62, 0.0  ;;  %v6714_v49 = vld [vmem:[#allocation122_spill] sm:$0xff] }
 0x279   : > { %v1804_v20 = vpop.permute.xlu1 %1803  ;;  %v5376_v37 = vpop.f32.mrf.mxu1  ;;  %v1948_v10 = vadd.f32 %v1884_v31, %v1563_v56  ;;  %v1864_v1 = vmul.f32 %v4801_v46, %v5058_v41  ;;  %vm2481_vm10 = vcmp.eq.s32.totalorder %v2417_v44, 0  ;;  %v2094_v33 = vmax.f32 %v2030_v43, 0.0  ;;  %v6713_v44 = vld [vmem:[#allocation48_spill] sm:$0xff] }
 0x27a   : > { %v1897_v40 = vmul.f32 %v4801_v46, %v1804_v20  ;;  %v5381_v4 = vpop.permute.xlu2 %2565  ;;  %v6711_v20 = vld [vmem:[#allocation118_spill] sm:$0xff]  ;;  %v2112_v23 = vpack.c.bf16 %v2058_v17, %v2057_v18  ;;  %vm2474_vm11 = vcmp.eq.s32.totalorder %v2410_v50, 0  ;;  %vm2473_vm12 = vcmp.eq.s32.totalorder %v2409_v34, 0  ;;  %v2420_v18 = vld [vmem:[%s4973_s23 + $0x180] sm:$0xff] }
 0x27b   : > { %v2015_v55 = vadd.f32 %v5326_v15, %v1947_v3  ;;  %v2538_v11 = vsel %vm2474_vm11, 1, %v6637_v0  ;;  %v2412_v50 = vld [vmem:[%s4973_s23 + $0x140] sm:$0xff]  ;;  %v1149_v34 = vadd.f32 %v6714_v49, %v5287_v59  ;;  %vm2484_vm13 = vcmp.eq.s32.totalorder %v2420_v18, 0  ;;  %v6718_v49 = vld [vmem:[#allocation123_spill] sm:$0xff] }
 0x27c   : > { %v1961_v14 = vadd.f32 %v1897_v40, %v1576_v36  ;;  %2306 = vmatmul.bf16.gmra.mxu2 %v2122_v29  ;;  %v1094_v36 = vadd.f32 %v6711_v20, %v862_v28  ;;  %v901_v40 = vmul.f32 %v4785_v54, %v823_v53  ;;  %v1579_v29 = vadd.f32 %v1515_v63, %v1184_v58  ;;  %v6715_v20 = vld [vmem:[#allocation117_spill] sm:$0xff] }
 0x27d   : > { %v2016_v53 = vadd.f32 %v5326_v15, %v1948_v10  ;;  %v2079_v3 = vmax.f32 %v2015_v55, 0.0  ;;  %v1501_v58 = vmul.f32 %v4787_v12, %v6713_v44  ;;  %v2413_v10 = vld [vmem:[%s4973_s23 + $0x148] sm:$0xff]  ;;  %vm2476_vm15 = vcmp.eq.s32.totalorder %v2412_v50, 0 }
 0x27e   : > { %2691 = vperm.xlu0 %3742, %v2542_v45   ;;  %v2029_v26 = vadd.f32 %v5326_v15, %v1961_v14  ;;  %v5415_v45 = vpop.f32.mrf.mxu3  ;;  %v1543_v62 = vadd.f32 %v1479_v16, %v1094_v36  ;;  %v883_v14 = vmul.f32 %v4785_v54, %v5169_v13  ;;  %v2537_v16 = vsel %vm2473_vm12, 1, %v6637_v0  ;;  %v6712_v13 = vld [vmem:[#allocation88_spill] sm:$0xff] }
 0x27f   : > { %2670 = vperm.xlu2 %3743, %v2535_v22   ;;  %2667 = vperm.xlu1 %3744, %v2534_v8   ;;  %v2545_v22 = vsel %vm2481_vm10, 1, %v6637_v0  ;;  %v1904_v8 = vmul.f32 %v4801_v46, %v5333_v27  ;;  %v1863_v39 = vmul.f32 %v4801_v46, %v6712_v13  ;;  %v1583_v27 = vadd.f32 %v5357_v51, %v1194_v7 }
 0x280   : > { %v838_v42 = vpop.permute.xlu0 %837  ;;  %v2093_v52 = vmax.f32 %v2029_v26, 0.0  ;;  %v1928_v31 = vadd.f32 %v1864_v1, %v1543_v62  ;;  %v1192_v26 = vadd.f32 %v5318_v19, %v901_v40  ;;  %v1147_v36 = vadd.f32 %v6715_v20, %v883_v14  ;;  %v6716_v1 = vld [vmem:[#allocation101_spill] sm:$0xff] }
 0x281   : > { %v1816_v47 = vpop.permute.xlu1 %1815  ;;  %v5406_v38 = vpop.f32.mrf.mxu1  ;;  %v1927_v63 = vadd.f32 %v1863_v39, %v1542_v60  ;;  %v2080_v17 = vmax.f32 %v2016_v53, 0.0  ;;  %v1968_v7 = vadd.f32 %v1904_v8, %v1583_v27  ;;  %vm2477_vm14 = vcmp.eq.s32.totalorder %v2413_v10, 0  ;;  %v2416_v27 = vld [vmem:[%s4973_s23 + $0x160] sm:$0xff] }
 0x282   : > { %v1900_v56 = vmul.f32 %v4801_v46, %v1816_v47  ;;  %v5411_v28 = vpop.permute.xlu2 %2574  ;;  %v5413_v41 = vpack.c.bf16 %v2094_v33, %v2093_v52  ;;  %v1500_v52 = vmul.f32 %v4787_v12, %v6716_v1  ;;  %v6717_v33 = vld [vmem:[#allocation119_spill] sm:$0xff]  ;;  %v1996_v60 = vadd.f32 %v5326_v15, %v1928_v31 }
 0x283   : > { %v1518_v51 = vmul.f32 %v4787_v12, %v6717_v33  ;;  %v2123_v59 = vpack.c.bf16 %v2080_v17, %v2079_v3  ;;  %v1885_v55 = vmul.f32 %v4801_v46, %v5214_v35  ;;  %v904_v40 = vmul.f32 %v4785_v54, %v838_v42 }
 0x284   : > { %v5424_v43 = vadd.f32 %v1900_v56, %v1579_v29  ;;  %2256 = vmatmul.bf16.gmra.mxu1 %v2112_v23  ;;  %v1886_v14 = vmul.f32 %v4801_v46, %v5142_v5  ;;  %v2548_v8 = vsel %vm2484_vm13, 1, %v6637_v0  ;;  %v2036_v35 = vadd.f32 %v5326_v15, %v1968_v7  ;;  %v2423_v5 = vld [vmem:[%s4973_s23 + $0x198] sm:$0xff] }
 0x285   : > { %v1582_v29 = vadd.f32 %v1518_v51, %v1192_v26  ;;  %v2541_v42 = vsel %vm2477_vm14, 1, %v6637_v0  ;;  %v2540_v13 = vsel %vm2476_vm15, 1, %v6637_v0  ;;  %v2060_v39 = vmax.f32 %v1996_v60, 0.0  ;;  %v2415_v26 = vld [vmem:[%s4973_s23 + $0x158] sm:$0xff] }
 0x286   : > { %2700 = vperm.xlu0 %3742, %v2545_v22   ;;  %v1564_v22 = vadd.f32 %v1500_v52, %v1147_v36  ;;  %v1198_v53 = vpop.f32.mrf.mxu3  ;;  %v1565_v31 = vadd.f32 %v1501_v58, %v1149_v34  ;;  %v2100_v36 = vmax.f32 %v2036_v35, 0.0  ;;  %vm2487_vm0 = vcmp.eq.s32.totalorder %v2423_v5, 0  ;;  %v6721_v35 = vld [vmem:[#allocation25_spill] sm:$0xff]  ;;  %v2418_v5 = vld [vmem:[%s4973_s23 + $0x170] sm:$0xff] }
 0x287   : > { %2679 = vperm.xlu2 %3743, %v2538_v11   ;;  %2676 = vperm.xlu1 %3744, %v2537_v16   ;;  %v1995_v11 = vadd.f32 %v5326_v15, %v1927_v63  ;;  %v1199_v18 = vadd.f32 %v1198_v53, %v904_v40  ;;  %v1521_v63 = vmul.f32 %v4787_v12, %v6718_v49  ;;  %vm2480_vm1 = vcmp.eq.s32.totalorder %v2416_v27, 0 }
 0x288   : > { %v5446_v19 = vpop.permute.xlu0 %2568  ;;  %v1949_v3 = vadd.f32 %v1885_v55, %v1564_v22  ;;  %v1950_v20 = vadd.f32 %v1886_v14, %v1565_v31  ;;  %vm2479_vm2 = vcmp.eq.s32.totalorder %v2415_v26, 0  ;;  %v6720_v55 = vld [vmem:[#allocation112_spill] sm:$0xff]  ;;  %v2544_v22 = vsel %vm2480_vm1, 1, %v6637_v0  ;;  %v6723_v31 = vld [vmem:[#allocation103_spill] sm:$0xff] }
 0x289   : > { %v1828_v47 = vpop.permute.xlu1 %1827  ;;  %v5448_v23 = vpop.f32.mrf.mxu1  ;;  %v2059_v10 = vmax.f32 %v1995_v11, 0.0  ;;  %v1585_v52 = vadd.f32 %v1521_v63, %v1199_v18  ;;  %v1502_v40 = vmul.f32 %v4787_v12, %v6720_v55  ;;  %v2543_v53 = vsel %vm2479_vm2, 1, %v6637_v0  ;;  %v2426_v11 = vld [vmem:[%s4973_s23 + $0x1b0] sm:$0xff]  ;;  %v5510_v26 = vld [vmem:[%s6447_s7] ss:$0 sm:$0xff] }
 0x28a   : > { %v1903_v56 = vmul.f32 %v4801_v46, %v1828_v47  ;;  %v5455_v62 = vpop.permute.xlu2 %2580  ;;  %v2017_v7 = vadd.f32 %v5326_v15, %v1949_v3  ;;  %v1503_v3 = vmul.f32 %v4787_v12, %v6723_v31  ;;  %v6724_v18 = vld [vmem:[#allocation106_spill] sm:$0xff]  ;;  %v865_v63 = vmul.f32 %v4785_v54, %v5020_v25 }
 0x28b   : > { %v2113_v1 = vpack.c.bf16 %v2060_v39, %v2059_v10  ;;  %v2419_v39 = vld [vmem:[%s4973_s23 + $0x178] sm:$0xff]  ;;  %vm2490_vm3 = vcmp.eq.s32.totalorder %v2426_v11, 0  ;;  %vm2757_vm4 = vcmp.eq.s32.totalorder %v5446_v19, 1  ;;  %vm2761_vm5 = vcmp.eq.s32.totalorder %v5455_v62, 1 }
 0x28c   : > { %v1967_v16 = vadd.f32 %v1903_v56, %v1582_v29  ;;  %2311 = vmatmul.bf16.gmra.mxu2 %v2123_v59  ;;  %v6719_v59 = vld [vmem:[#allocation38_spill] sm:$0xff]  ;;  %v886_v29 = vmul.f32 %v4785_v54, %v5190_v61  ;;  %v2551_v56 = vsel %vm2487_vm0, 1, %v6637_v0  ;;  %v2081_v61 = vmax.f32 %v2017_v7, 0.0 }
 0x28d   : > { %v885_v60 = vmul.f32 %v4785_v54, %v6719_v59  ;;  %vm2483_vm6 = vcmp.eq.s32.totalorder %v2419_v39, 0  ;;  %vm2482_vm7 = vcmp.eq.s32.totalorder %v2418_v5, 0  ;;  %v5531_v62 = vadd.f32 %v5510_v26, %v5337_v21  ;;  %v6726_v21 = vld [vmem:[#allocation43_spill] sm:$0xff] }
 0x28e   : > { %v2035_v44 = vadd.f32 %v5326_v15, %v1967_v16  ;;  %2709 = vperm.xlu0 %3742, %v2548_v8   ;;  %v2018_v8 = vadd.f32 %v5326_v15, %v1950_v20  ;;  %v5497_v16 = vmul.f32 %v4787_v12, %v6721_v35  ;;  %v1154_v27 = vadd.f32 %v4822_v6, %v886_v29 }
 0x28f   : > { %2688 = vperm.xlu2 %3743, %v2541_v42   ;;  %2685 = vperm.xlu1 %3744, %v2540_v13   ;;  %v6722_v42 = vld [vmem:[#allocation126_spill] sm:$0xff]  ;;  %vm2756_vm8 = vcmp.eq.s32.totalorder %v5381_v4, 1  ;;  %v2547_v7 = vsel %vm2483_vm6, 1, %v6637_v0  ;;  %v2546_v59 = vsel %vm2482_vm7, 1, %v6637_v0  ;;  %v1102_v4 = vadd.f32 %v4831_v2, %v865_v63  ;;  %v6729_v2 = vld [vmem:[#allocation51_spill] sm:$0xff] }
 0x290   : > { %v2099_v50 = vmax.f32 %v2035_v44, 0.0  ;;  %v5472_v17 = vpop.permute.xlu0 %2583  ;;  %v1152_v13 = vadd.f32 %v6722_v42, %v885_v60  ;;  %v1887_v44 = vmul.f32 %v4801_v46, %v6724_v18  ;;  %v2082_v20 = vmax.f32 %v2018_v8, 0.0  ;;  %v6725_v60 = vld [vmem:[#allocation29_spill] sm:$0xff]  ;;  %v2422_v42 = vld [vmem:[%s4973_s23 + $0x190] sm:$0xff] }
 0x291   : > { %v1840_v58 = vpop.permute.xlu1 %1839  ;;  %v5474_v34 = vpop.f32.mrf.mxu1  ;;  %v866_v55 = vmul.f32 %v4785_v54, %v6725_v60  ;;  %v2820_v35 = vsel %vm2756_vm8, %v5531_v62, -inf  ;;  %v1867_v5 = vmul.f32 %v4801_v46, %v5088_v48  ;;  %vm2486_vm11 = vcmp.eq.s32.totalorder %v2422_v42, 0  ;;  %v6735_v42 = vld [vmem:[#allocation116_spill] sm:$0xff] }
 0x292   : > { %v1906_v33 = vmul.f32 %v4801_v46, %v1840_v58  ;;  %v5477_v51 = vpop.permute.xlu2 %2589  ;;  %v5480_v47 = vpack.c.bf16 %v2100_v36, %v2099_v50  ;;  %v1566_v49 = vadd.f32 %v1502_v40, %v1152_v13  ;;  %v1888_v50 = vmul.f32 %v4801_v46, %v5250_v24  ;;  %v2421_v13 = vld [vmem:[%s4973_s23 + $0x188] sm:$0xff] }
 0x293   : > { %v5522_v58 = vadd.f32 %v5510_v26, %v5376_v37  ;;  %v2124_v19 = vpack.c.bf16 %v2082_v20, %v2081_v61  ;;  %v2554_v24 = vsel %vm2490_vm3, 1, %v6637_v0  ;;  %v888_v40 = vmul.f32 %v4785_v54, %v6726_v21  ;;  %v6728_v61 = vld [vmem:[#allocation87_spill] sm:$0xff] }
 0x294   : > { %v5489_v14 = vadd.f32 %v1906_v33, %v1585_v52  ;;  %2261 = vmatmul.bf16.gmra.mxu1 %v2113_v1  ;;  %v1567_v52 = vadd.f32 %v1503_v3, %v1154_v27  ;;  %v1951_v8 = vadd.f32 %v1887_v44, %v1566_v49  ;;  %v1482_v39 = vmul.f32 %v4787_v12, %v6728_v61  ;;  %v6730_v44 = vld [vmem:[#allocation131_spill] sm:$0xff] }
 0x295   : > { %v2821_v37 = vsel %vm2757_vm4, %v5522_v58, -inf  ;;  %v1504_v3 = vmul.f32 %v4787_v12, %v6729_v2  ;;  %v1104_v27 = vadd.f32 %v6730_v44, %v866_v55  ;;  %vm2485_vm12 = vcmp.eq.s32.totalorder %v2421_v13, 0  ;;  %v6736_v44 = vld [vmem:[#allocation12_spill] sm:$0xff] }
 0x296   : > { %2718 = vperm.xlu0 %3742, %v2551_v56   ;;  %v2429_v56 = vld [vmem:[%s4973_s23 + $0x1c8] sm:$0xff]  ;;  %v1952_v11 = vadd.f32 %v1888_v50, %v1567_v52  ;;  %v1546_v63 = vadd.f32 %v1482_v39, %v1102_v4  ;;  %v5562_v48 = vadd.f32 %v5510_v26, %v5406_v38  ;;  %vm2762_vm13 = vcmp.eq.s32.totalorder %v5472_v17, 1 }
 0x297   : > { %2697 = vperm.xlu2 %3743, %v2544_v22   ;;  %2694 = vperm.xlu1 %3744, %v2543_v53   ;;  %v6727_v22 = vld [vmem:[#allocation56_spill] sm:$0xff]  ;;  %vm2493_vm9 = vcmp.eq.s32.totalorder %v2429_v56, 0  ;;  %v2550_v60 = vsel %vm2486_vm11, 1, %v6637_v0  ;;  %v2549_v55 = vsel %vm2485_vm12, 1, %v6637_v0  ;;  %v1547_v21 = vadd.f32 %v5497_v16, %v1104_v27 }
 0x298   : > { %v5514_v10 = vpop.permute.xlu0 %2592  ;;  %v887_v53 = vmul.f32 %v4785_v54, %v6727_v22  ;;  %v2020_v52 = vadd.f32 %v5326_v15, %v1952_v11  ;;  %v2557_v38 = vsel %vm2493_vm9, 1, %v6637_v0  ;;  %v6734_v56 = vld [vmem:[#allocation132_spill] sm:$0xff]  ;;  %v2425_v11 = vld [vmem:[%s4973_s23 + $0x1a8] sm:$0xff]  ;;  %v1505_v13 = vmul.f32 %v4787_v12, %v6735_v42 }
 0x299   : > { %v2224_v6 = vpop.f32.mrf.mxu1  ;;  %v2572_v36 = vpop.permute.xlu1 %2571  ;;  %v1159_v22 = vadd.f32 %v6734_v56, %v888_v40  ;;  %v5594_v40 = vadd.f32 %v5510_v26, %v5448_v23  ;;  %vm2759_vm0 = vcmp.eq.s32.totalorder %v5411_v28, 1  ;;  %vm2489_vm1 = vcmp.eq.s32.totalorder %v2425_v11, 0  ;;  %v6740_v11 = vld [vmem:[#allocation99_spill] sm:$0xff] }
 0x29a   : > { %v5525_v25 = vadd.f32 %v5510_v26, %v2224_v6  ;;  %v5527_v1 = vpop.permute.xlu2 %2598  ;;  %v1157_v18 = vadd.f32 %v4850_v9, %v887_v53  ;;  %vm2758_vm10 = vcmp.eq.s32.totalorder %v2572_v36, 1  ;;  %v5585_v53 = vadd.f32 %v5510_v26, %v5474_v34 }
 0x29b   : > { %v1889_v27 = vmul.f32 %v4801_v46, %v6736_v44  ;;  %vm2764_vm7 = vcmp.eq.s32.totalorder %v5477_v51, 1  ;;  %vm2765_vm11 = vcmp.eq.s32.totalorder %v5514_v10, 1 }
 0x29c   : > { %v2825_v33 = vsel %vm2761_vm5, %v5525_v25, -inf  ;;  %2316 = vmatmul.bf16.gmra.mxu2 %v2124_v19  ;;  %v2019_v19 = vadd.f32 %v5326_v15, %v1951_v8  ;;  %v1568_v17 = vadd.f32 %v1504_v3, %v1157_v18  ;;  %v2084_v8 = vmax.f32 %v2020_v52, 0.0 }
 0x29d   : > { %v2885_v29 = vmax.f32 %v2821_v37, %v2825_v33  ;;  %v1931_v37 = vadd.f32 %v1867_v5, %v1546_v63  ;;  %v2822_v33 = vsel %vm2758_vm10, %v5562_v48, -inf }
 0x29e   : > { %2727 = vperm.xlu0 %3742, %v2554_v24   ;;  %v6732_v24 = vld [vmem:[#allocation77_spill] sm:$0xff]  ;;  %v2083_v16 = vmax.f32 %v2019_v19, 0.0 }
 0x29f   : > { %v2884_v31 = vmax.f32 %v2820_v35, %v2885_v29  ;;  %2706 = vperm.xlu2 %3743, %v2547_v7   ;;  %2703 = vperm.xlu1 %3744, %v2546_v59   ;;  %v1868_v36 = vmul.f32 %v4801_v46, %v6732_v24  ;;  %v6733_v59 = vld [vmem:[#allocation79_spill] sm:$0xff]  ;;  %v2432_v29 = vld [vmem:[%s4973_s23 + $0x1e0] sm:$0xff]  ;;  %v1999_v5 = vadd.f32 %v5326_v15, %v1931_v37 }
 0x2a0   : > { %v5558_v49 = vpop.permute.xlu0 %2601  ;;  %v2424_v35 = vld [vmem:[%s4973_s23 + $0x1a0] sm:$0xff]  ;;  %vm2496_vm15 = vcmp.eq.s32.totalorder %v2432_v29, 0  ;;  %v1953_v29 = vadd.f32 %v1889_v27, %v1568_v17 }
 0x2a1   : > { %v2227_v20 = vpop.f32.mrf.mxu1  ;;  %v2578_v6 = vpop.permute.xlu1 %2577  ;;  %v1932_v61 = vadd.f32 %v1868_v36, %v1547_v21  ;;  %vm2488_vm2 = vcmp.eq.s32.totalorder %v2424_v35, 0  ;;  %v6737_v19 = vld [vmem:[#allocation85_spill] sm:$0xff]  ;;  %v2560_v24 = vsel %vm2496_vm15, 1, %v6637_v0  ;;  %v2823_v36 = vsel %vm2759_vm0, %v5594_v40, -inf  ;;  %v6739_v21 = vld [vmem:[#allocation18_spill] sm:$0xff] }
 0x2a2   : > { %v5565_v50 = vadd.f32 %v5510_v26, %v2227_v20  ;;  %v5567_v9 = vpop.permute.xlu2 %2607  ;;  %vm2760_vm14 = vcmp.eq.s32.totalorder %v2578_v6, 1  ;;  %v2125_v20 = vpack.c.bf16 %v2084_v8, %v2083_v16  ;;  %v1569_v6 = vadd.f32 %v1505_v13, %v1159_v22  ;;  %v2428_v22 = vld [vmem:[%s4973_s23 + $0x1c0] sm:$0xff]  ;;  %v2427_v8 = vld [vmem:[%s4973_s23 + $0x1b8] sm:$0xff] }
 0x2a3   : > { %v2824_v34 = vsel %vm2760_vm14, %v5585_v53, -inf  ;;  %v2000_v28 = vadd.f32 %v5326_v15, %v1932_v61  ;;  %v868_v52 = vmul.f32 %v4785_v54, %v6737_v19  ;;  %v2063_v56 = vmax.f32 %v1999_v5, 0.0  ;;  %v6741_v61 = vld [vmem:[#allocation10_spill] sm:$0xff] }
 0x2a4   : > { %6731 = vst [vmem:[#allocation33_spill] sm:$0xff] %v5565_v50  ;;  %v2826_v7 = vsel %vm2762_vm13, %v5565_v50, -inf  ;;  %2266 = vmatmul.bf16.gmra.mxu1 %v6733_v59  ;;  %v1484_v35 = vmul.f32 %v4787_v12, %v6740_v11  ;;  %vm2492_vm5 = vcmp.eq.s32.totalorder %v2428_v22, 0  ;;  %vm2491_vm6 = vcmp.eq.s32.totalorder %v2427_v8, 0 }
 0x2a5   : > { %v2886_v4 = vmax.f32 %v2822_v33, %v2826_v7  ;;  %v2552_v33 = vsel %vm2488_vm2, 1, %v6637_v0  ;;  %v6738_v7 = vld [vmem:[#allocation108_spill] sm:$0xff] }
 0x2a6   : > { %2736 = vperm.xlu0 %3742, %v2557_v38   ;;  %v2553_v38 = vsel %vm2489_vm1, 1, %v6637_v0  ;;  %v1890_v59 = vmul.f32 %v4801_v46, %v6738_v7  ;;  %v2556_v7 = vsel %vm2492_vm5, 1, %v6637_v0 }
 0x2a7   : > { %v2888_v39 = vmax.f32 %v2884_v31, %v2886_v4  ;;  %2715 = vperm.xlu2 %3743, %v2550_v60   ;;  %2712 = vperm.xlu1 %3744, %v2549_v55   ;;  %v2435_v55 = vld [vmem:[%s4973_s23 + $0x1f8] sm:$0xff]  ;;  %v867_v4 = vmul.f32 %v4785_v54, %v6739_v21 }
 0x2a8   : > { %v5598_v2 = vpop.permute.xlu0 %2610  ;;  %v1954_v42 = vadd.f32 %v1890_v59, %v1569_v6  ;;  %vm2499_vm4 = vcmp.eq.s32.totalorder %v2435_v55, 0  ;;  %v2555_v59 = vsel %vm2491_vm6, 1, %v6637_v0  ;;  %v6745_v55 = vld [vmem:[#allocation94_spill] sm:$0xff] }
 0x2a9   : > { %v2889_v3 = vmax.f32 %v2824_v34, %v2888_v39  ;;  %v2229_v18 = vpop.f32.mrf.mxu1  ;;  %v2587_v31 = vpop.permute.xlu1 %2586  ;;  %v1109_v39 = vadd.f32 %v6741_v61, %v868_v52  ;;  %v2064_v34 = vmax.f32 %v2000_v28, 0.0  ;;  %v2021_v52 = vadd.f32 %v5326_v15, %v1953_v29  ;;  %v2431_v29 = vld [vmem:[%s4973_s23 + $0x1d8] sm:$0xff] }
 0x2aa   : > { %v5604_v23 = vadd.f32 %v5510_v26, %v2229_v18  ;;  %v5606_v63 = vpop.permute.xlu2 %2616  ;;  %vm2763_vm3 = vcmp.eq.s32.totalorder %v2587_v31, 1  ;;  %v6742_v18 = vld [vmem:[#allocation91_spill] sm:$0xff]  ;;  %v1869_v21 = vmul.f32 %v4801_v46, %v6745_v55  ;;  %vm2495_vm9 = vcmp.eq.s32.totalorder %v2431_v29, 0 }
 0x2ab   : > { %v1485_v17 = vmul.f32 %v4787_v12, %v6742_v18  ;;  %v6743_v31 = vld [vmem:[#allocation7_spill] sm:$0xff]  ;;  %v2115_v28 = vpack.c.bf16 %v2064_v34, %v2063_v56  ;;  %v2085_v51 = vmax.f32 %v2021_v52, 0.0 }
 0x2ac   : > { %v2827_v37 = vsel %vm2763_vm3, %v5604_v23, -inf  ;;  %2321 = vmatmul.bf16.gmra.mxu2 %v2125_v20  ;;  %v1107_v5 = vadd.f32 %v6743_v31, %v867_v4  ;;  %v6744_v20 = vld [vmem:[#allocation26_spill] sm:$0xff]  ;;  %vm2767_vm3 = vcmp.eq.s32.totalorder %v5527_v1, 1  ;;  %v6755_v1 = vld [vmem:[#allocation32_spill] sm:$0xff] }
 0x2ad   : > { %v2887_v60 = vmax.f32 %v2823_v36, %v2827_v37  ;;  %v2563_v36 = vsel %vm2499_vm4, 1, %v6637_v0  ;;  %v2022_v37 = vadd.f32 %v5326_v15, %v1954_v42  ;;  %v2430_v56 = vld [vmem:[%s4973_s23 + $0x1d0] sm:$0xff] }
 0x2ae   : > { %2745 = vperm.xlu0 %3742, %v2560_v24   ;;  %v1548_v24 = vadd.f32 %v1484_v35, %v1107_v5  ;;  %v3753_v35 = vld [vmem:[%s4973_s23 + $0x10] sm:$0xff]  ;;  %vm2494_vm10 = vcmp.eq.s32.totalorder %v2430_v56, 0  ;;  %v2559_v5 = vsel %vm2495_vm9, 1, %v6637_v0 }
 0x2af   : > { %v2890_v13 = vmax.f32 %v2887_v60, %v2889_v3  ;;  %2724 = vperm.xlu2 %3743, %v2553_v38   ;;  %2721 = vperm.xlu1 %3744, %v2552_v33   ;;  %v1870_v3 = vmul.f32 %v4801_v46, %v6744_v20  ;;  %v1549_v38 = vadd.f32 %v1485_v17, %v1109_v39  ;;  %v2086_v11 = vmax.f32 %v2022_v37, 0.0  ;;  %v2434_v52 = vld [vmem:[%s4973_s23 + $0x1f0] sm:$0xff]  ;;  %v3754_v37 = vld [vmem:[%s4973_s23 + $0x28] sm:$0xff] }
 0x2b0   : > { %v5626_v16 = vpop.permute.xlu0 %2619  ;;  %v1933_v22 = vadd.f32 %v1869_v21, %v1548_v24  ;;  %vm2955_vm8 = vcmp.eq.s32.totalorder %v3753_v35, 1  ;;  %v2433_v24 = vld [vmem:[%s4973_s23 + $0x1e8] sm:$0xff]  ;;  %vm2958_vm12 = vcmp.eq.s32.totalorder %v3754_v37, 1  ;;  %vm2498_vm13 = vcmp.eq.s32.totalorder %v2434_v52, 0  ;;  %v6748_v56 = vld [vmem:[#allocation47_spill] sm:$0xff] }
 0x2b1   : > { %v2232_v44 = vpop.f32.mrf.mxu1  ;;  %v5631_v27 = vpop.permute.xlu1 %2595  ;;  %v1934_v4 = vadd.f32 %v1870_v3, %v1549_v38  ;;  %v2126_v18 = vpack.c.bf16 %v2086_v11, %v2085_v51  ;;  %v3019_v17 = vsel %vm2955_vm8, 1, %v6637_v0  ;;  %vm2497_vm14 = vcmp.eq.s32.totalorder %v2433_v24, 0  ;;  %v6749_v11 = vld [vmem:[#allocation121_spill] sm:$0xff]  ;;  %v6752_v52 = vld [vmem:[#allocation86_spill] sm:$0xff]  ;;  %v6753_v37 = vld [vmem:[#allocation111_spill] sm:$0xff] }
 0x2b2   : > { %v5636_v6 = vadd.f32 %v5510_v26, %v2232_v44  ;;  %v5638_v19 = vpop.permute.xlu2 %2625  ;;  %v2558_v44 = vsel %vm2494_vm10, 1, %v6637_v0  ;;  %v2001_v20 = vadd.f32 %v5326_v15, %v1933_v22  ;;  %vm2766_vm15 = vcmp.eq.s32.totalorder %v5631_v27, 1  ;;  %v6750_v27 = vld [vmem:[#allocation6_spill] sm:$0xff] }
 0x2b3   : > { %v3022_v55 = vsel %vm2958_vm12, 1, %v6637_v0  ;;  %v2561_v51 = vsel %vm2497_vm14, 1, %v6637_v0  ;;  %v891_v22 = vmul.f32 %v4785_v54, %v6748_v56  ;;  %v1508_v35 = vmul.f32 %v4787_v12, %v6749_v11 }
 0x2b4   : > { %v2828_v33 = vsel %vm2764_vm7, %v5636_v6, -inf  ;;  %2271 = vmatmul.bf16.gmra.mxu1 %v2115_v28  ;;  %v871_v24 = vmul.f32 %v4785_v54, %v6752_v52  ;;  %v1489_v11 = vmul.f32 %v4787_v12, %v6755_v1  ;;  %vm2768_vm7 = vcmp.eq.s32.totalorder %v5558_v49, 1 }
 0x2b5   : > { %v2891_v60 = vmax.f32 %v2828_v33, %v2890_v13  ;;  %v2002_v13 = vadd.f32 %v5326_v15, %v1934_v4  ;;  %v2562_v4 = vsel %vm2498_vm13, 1, %v6637_v0 }
 0x2b6   : > { %2754 = vperm.xlu0 %3742, %v2563_v36   ;;  %v2065_v36 = vmax.f32 %v2001_v20, 0.0 }
 0x2b7   : > { %2733 = vperm.xlu2 %3743, %v2556_v7   ;;  %2730 = vperm.xlu1 %3744, %v2555_v59   ;;  %v2066_v28 = vmax.f32 %v2002_v13, 0.0 }
 0x2b8   : > { %v5651_v8 = vpop.permute.xlu0 %2628 }
 0x2b9   : > { %v2234_v42 = vpop.f32.mrf.mxu1  ;;  %v5654_v61 = vpop.permute.xlu1 %2604 }
 0x2ba   : > { %v5658_v39 = vadd.f32 %v5510_v26, %v2234_v42  ;;  %v5660_v34 = vpop.permute.xlu2 %2634  ;;  %v1167_v42 = vadd.f32 %v6750_v27, %v891_v22  ;;  %vm2769_vm13 = vcmp.eq.s32.totalorder %v5654_v61, 1 }
 0x2bc   : > { %6746 = vst [vmem:[#allocation9_spill] sm:$0xff] %v5658_v39  ;;  %v2829_v31 = vsel %vm2765_vm11, %v5658_v39, -inf  ;;  %2326 = vmatmul.bf16.gmra.mxu2 %v2126_v18  ;;  %v3755_v18 = vld [vmem:[%s4973_s23 + $0x40] sm:$0xff]  ;;  %v1572_v20 = vadd.f32 %v1508_v35, %v1167_v42  ;;  %v6757_v42 = vld [vmem:[#allocation42_spill] sm:$0xff] }
 0x2bd   : > { %v2892_v3 = vmax.f32 %v2829_v31, %v2891_v60  ;;  %v2116_v60 = vpack.c.bf16 %v2066_v28, %v2065_v36  ;;  %vm2961_vm0 = vcmp.eq.s32.totalorder %v3755_v18, 1  ;;  %v6756_v35 = vld [vmem:[#allocation36_spill] sm:$0xff] }
 0x2be   : > { %3088 = vperm.xlu0 %3742, %v3019_v17   ;;  %v3025_v36 = vsel %vm2961_vm0, 1, %v6637_v0  ;;  %v872_v27 = vmul.f32 %v4785_v54, %v6756_v35  ;;  %v3760_v35 = vld [vmem:[%s4973_s23 + $0x18] sm:$0xff] }
 0x2bf   : > { %2742 = vperm.xlu2 %3743, %v2559_v5   ;;  %2739 = vperm.xlu1 %3744, %v2558_v44   ;;  %v3756_v5 = vld [vmem:[%s4973_s23 + $0x8] sm:$0xff]  ;;  %v3757_v44 = vld [vmem:[%s4973_s23] sm:$0xff]  ;;  %vm2956_vm6 = vcmp.eq.s32.totalorder %v3760_v35, 1 }
 0x2c0   : > { %v5670_v10 = vpop.permute.xlu0 %2637  ;;  %vm2954_vm1 = vcmp.eq.s32.totalorder %v3756_v5, 1  ;;  %vm2953_vm2 = vcmp.eq.s32.totalorder %v3757_v44, 1  ;;  %v6759_v5 = vld [vmem:[#allocation11_spill] sm:$0xff]  ;;  %v6769_v39 = vld [vmem:[#allocation16_spill] sm:$0xff] }
 0x2c1   : > { %v2237_v38 = vpop.f32.mrf.mxu1  ;;  %v5673_v33 = vpop.permute.xlu1 %2613 }
 0x2c2   : > { %v5676_v7 = vadd.f32 %v5510_v26, %v2237_v38  ;;  %v5678_v59 = vpop.permute.xlu2 %2643  ;;  %v1893_v38 = vmul.f32 %v4801_v46, %v6753_v37  ;;  %v3758_v37 = vld [vmem:[%s4973_s23 + $0x58] sm:$0xff] }
 0x2c3   : > { %vm2964_vm4 = vcmp.eq.s32.totalorder %v3758_v37, 1 }
 0x2c4   : > { %6747 = vst [vmem:[#allocation28_spill] sm:$0xff] %v5676_v7  ;;  %v2830_v21 = vsel %vm2766_vm15, %v5676_v7, -inf  ;;  %2276 = vmatmul.bf16.gmra.mxu1 %v2116_v60  ;;  %v1957_v22 = vadd.f32 %v1893_v38, %v1572_v20  ;;  %v6760_v20 = vld [vmem:[#allocation93_spill] sm:$0xff]  ;;  %v6762_v38 = vld [vmem:[#allocation15_spill] sm:$0xff] }
 0x2c5   : > { %v2893_v29 = vmax.f32 %v2830_v21, %v2892_v3  ;;  %v3017_v21 = vsel %vm2953_vm2, 1, %v6637_v0  ;;  %v1488_v52 = vmul.f32 %v4787_v12, %v6760_v20 }
 0x2c6   : > { %3097 = vperm.xlu0 %3742, %v3022_v55   ;;  %v3018_v55 = vsel %vm2954_vm1, 1, %v6637_v0  ;;  %v2025_v20 = vadd.f32 %v5326_v15, %v1957_v22  ;;  %v3020_v22 = vsel %vm2956_vm6, 1, %v6637_v0  ;;  %vm2770_vm1 = vcmp.eq.s32.totalorder %v5567_v9, 1 }
 0x2c7   : > { %2751 = vperm.xlu2 %3743, %v2562_v4   ;;  %2748 = vperm.xlu1 %3744, %v2561_v51   ;;  %v6754_v51 = vld [vmem:[#allocation65_spill] sm:$0xff]  ;;  %vm2771_vm6 = vcmp.eq.s32.totalorder %v5598_v2, 1 }
 0x2c8   : > { %v5690_v13 = vpop.permute.xlu0 %2646  ;;  %v893_v56 = vmul.f32 %v4785_v54, %v6754_v51  ;;  %v6763_v51 = vld [vmem:[#allocation22_spill] sm:$0xff] }
 0x2c9   : > { %v2239_v17 = vpop.f32.mrf.mxu1  ;;  %v5693_v31 = vpop.permute.xlu1 %2622 }
 0x2ca   : > { %v5698_v3 = vadd.f32 %v5510_v26, %v2239_v17  ;;  %v5700_v28 = vpop.permute.xlu2 %2652  ;;  %v6758_v17 = vld [vmem:[#allocation60_spill] sm:$0xff]  ;;  %v1172_v44 = vadd.f32 %v6759_v5, %v893_v56 }
 0x2cb   : > { %6751 = vst [vmem:[#allocation27_spill] sm:$0xff] %v5700_v28  ;;  %v6764_v56 = vld [vmem:[#allocation20_spill] sm:$0xff]  ;;  %v6770_v28 = vld [vmem:[#allocation125_spill] sm:$0xff] }
 0x2cc   : > { %v2831_v60 = vsel %vm2767_vm3, %v5698_v3, -inf  ;;  %2331 = vmatmul.bf16.gmra.mxu2 %v5342_v30  ;;  %v1117_v30 = vadd.f32 %v6757_v42, %v871_v24  ;;  %v1873_v24 = vmul.f32 %v4801_v46, %v6763_v51  ;;  %v1874_v42 = vmul.f32 %v4801_v46, %v6764_v56 }
 0x2cd   : > { %v2894_v4 = vmax.f32 %v2831_v60, %v2893_v29  ;;  %v1510_v29 = vmul.f32 %v4787_v12, %v6758_v17  ;;  %v1119_v60 = vadd.f32 %v6762_v38, %v872_v27  ;;  %v2026_v27 = vadd.f32 %v5326_v15, %v5350_v32 }
 0x2ce   : > { %3106 = vperm.xlu0 %3742, %v3025_v36   ;;  %v1552_v38 = vadd.f32 %v1488_v52, %v1117_v30  ;;  %v3028_v51 = vsel %vm2964_vm4, 1, %v6637_v0 }
 0x2cf   : > { %v2292_v18 = vpop.f32.mrf.mxu2  ;;  %3085 = vperm.xlu2 %3743, %v3018_v55   ;;  %3082 = vperm.xlu1 %3744, %v3017_v21   ;;  %v3759_v21 = vld [vmem:[%s4973_s23 + $0x20] sm:$0xff]  ;;  %v1574_v52 = vadd.f32 %v1510_v29, %v1172_v44  ;;  %v1553_v37 = vadd.f32 %v1489_v11, %v1119_v60  ;;  %v2089_v29 = vmax.f32 %v2025_v20, 0.0  ;;  %v3761_v44 = vld [vmem:[%s4973_s23 + $0x70] sm:$0xff] }
 0x2d0   : > { %v5724_v36 = vpop.permute.xlu0 %2655  ;;  %vm2957_vm5 = vcmp.eq.s32.totalorder %v3759_v21, 1  ;;  %v5746_v21 = vadd.f32 %v5510_v26, %v2292_v18  ;;  %v1937_v30 = vadd.f32 %v1873_v24, %v1552_v38  ;;  %v2090_v18 = vmax.f32 %v2026_v27, 0.0  ;;  %v3763_v27 = vld [vmem:[%s4973_s23 + $0x30] sm:$0xff] }
 0x2d1   : > { %6761 = vst [vmem:[#allocation5_spill] sm:$0xff] %v5724_v36  ;;  %v2242_v1 = vpop.f32.mrf.mxu1  ;;  %v5730_v55 = vpop.permute.xlu1 %2631  ;;  %v3021_v56 = vsel %vm2957_vm5, 1, %v6637_v0  ;;  %v6768_v36 = vld [vmem:[#allocation50_spill] sm:$0xff]  ;;  %vm2967_vm9 = vcmp.eq.s32.totalorder %v3761_v44, 1  ;;  %vm2959_vm12 = vcmp.eq.s32.totalorder %v3763_v27, 1 }
 0x2d2   : > { %v5737_v17 = vadd.f32 %v5510_v26, %v2242_v1  ;;  %v2662_v5 = vpop.permute.xlu2 %2661  ;;  %6766 = vst [vmem:[#allocation82_spill] sm:$0xff] %v5746_v21  ;;  %v6767_v1 = vld [vmem:[#allocation83_spill] sm:$0xff]  ;;  %v894_v32 = vmul.f32 %v4785_v54, %v6768_v36  ;;  %v1938_v36 = vadd.f32 %v1874_v42, %v1553_v37  ;;  %v2005_v60 = vadd.f32 %v5326_v15, %v1937_v30  ;;  %v6772_v38 = vld [vmem:[#allocation58_spill] sm:$0xff] }
 0x2d3   : > { %vm2788_vm8 = vcmp.eq.s32.totalorder %v2662_v5, 1  ;;  %v1895_v42 = vmul.f32 %v4801_v46, %v6772_v38  ;;  %v3764_v44 = vld [vmem:[%s4973_s23 + $0x88] sm:$0xff]  ;;  %v3765_v27 = vld [vmem:[%s4973_s23 + $0x50] sm:$0xff] }
 0x2d4   : > { %6765 = vst [vmem:[#allocation37_spill] sm:$0xff] %v5737_v17  ;;  %v2832_v35 = vsel %vm2768_vm7, %v5737_v17, -inf  ;;  %2281 = vmatmul.bf16.gmra.mxu1 %v6767_v1  ;;  %v2852_v5 = vsel %vm2788_vm8, %v5746_v21, -inf  ;;  %v1174_v17 = vadd.f32 %v6769_v39, %v894_v32  ;;  %v1511_v1 = vmul.f32 %v4787_v12, %v6770_v28  ;;  %v3762_v28 = vld [vmem:[%s4973_s23 + $0x38] sm:$0xff]  ;;  %v3766_v38 = vld [vmem:[%s4973_s23 + $0x48] sm:$0xff] }
 0x2d5   : > { %v2895_v49 = vmax.f32 %v2832_v35, %v2894_v4  ;;  %vm2960_vm11 = vcmp.eq.s32.totalorder %v3762_v28, 1  ;;  %v2128_v35 = vpack.c.bf16 %v2090_v18, %v2089_v29  ;;  %v3031_v32 = vsel %vm2967_vm9, 1, %v6637_v0  ;;  %v6773_v18 = vld [vmem:[#allocation115_spill] sm:$0xff] }
 0x2d6   : > { %3115 = vperm.xlu0 %3742, %v3028_v51   ;;  %v2006_v30 = vadd.f32 %v5326_v15, %v1938_v36  ;;  %v3024_v37 = vsel %vm2960_vm11, 1, %v6637_v0  ;;  %v1959_v61 = vadd.f32 %v1895_v42, %v1574_v52  ;;  %vm2970_vm14 = vcmp.eq.s32.totalorder %v3764_v44, 1 }
 0x2d7   : > { %v2896_v7 = vmax.f32 %v2852_v5, %v2895_v49  ;;  %v2294_v50 = vpop.f32.mrf.mxu2  ;;  %3094 = vperm.xlu2 %3743, %v3021_v56   ;;  %3091 = vperm.xlu1 %3744, %v3020_v22   ;;  %v1575_v56 = vadd.f32 %v1511_v1, %v1174_v17  ;;  %v3023_v5 = vsel %vm2959_vm12, 1, %v6637_v0  ;;  %v1896_v17 = vmul.f32 %v4801_v46, %v6773_v18 }
 0x2d8   : > { %v5759_v4 = vadd.f32 %v5510_v26, %v2294_v50  ;;  %v2665_v11 = vpop.permute.xlu0 %2664  ;;  %v2070_v29 = vmax.f32 %v2006_v30, 0.0  ;;  %vm2963_vm15 = vcmp.eq.s32.totalorder %v3765_v27, 1  ;;  %vm2962_vm0 = vcmp.eq.s32.totalorder %v3766_v38, 1 }
 0x2d9   : > { %vm2789_vm10 = vcmp.eq.s32.totalorder %v2665_v11, 1  ;;  %v2244_v39 = vpop.f32.mrf.mxu1  ;;  %v5763_v24 = vpop.permute.xlu1 %2640  ;;  %v1960_v15 = vadd.f32 %v1896_v17, %v1575_v56  ;;  %v3034_v56 = vsel %vm2970_vm14, 1, %v6637_v0  ;;  %v3026_v30 = vsel %vm2962_vm0, 1, %v6637_v0 }
 0x2da   : > { %6771 = vst [vmem:[#allocation71_spill] sm:$0xff] %v5759_v4  ;;  %v2853_v50 = vsel %vm2789_vm10, %v5759_v4, -inf  ;;  %v5771_v51 = vadd.f32 %v5510_v26, %v2244_v39  ;;  %v2671_v20 = vpop.permute.xlu2 %2670  ;;  %vm2772_vm11 = vcmp.eq.s32.totalorder %v5673_v33, 1  ;;  %v6786_v4 = vld [vmem:[#allocation59_spill] sm:$0xff] }
 0x2db   : > { %v2897_v22 = vmax.f32 %v2853_v50, %v2896_v7  ;;  %v2069_v7 = vmax.f32 %v2005_v60, 0.0  ;;  %v5799_v50 = vld [vmem:[%s6445_s5] ss:$0 sm:$0xff]  ;;  %vm2791_vm3 = vcmp.eq.s32.totalorder %v2671_v20, 1 }
 0x2dc   : > { %v2833_v49 = vsel %vm2769_vm13, %v5771_v51, -inf  ;;  %2336 = vmatmul.bf16.gmra.mxu2 %v2128_v35  ;;  %v2027_v35 = vadd.f32 %v5799_v50, %v1959_v61 }
 0x2dd   : > { %v2898_v11 = vmax.f32 %v2833_v49, %v2897_v22  ;;  %v2118_v42 = vpack.c.bf16 %v2070_v29, %v2069_v7  ;;  %v2028_v49 = vadd.f32 %v5799_v50, %v1960_v15  ;;  %v3768_v7 = vld [vmem:[%s4973_s23 + $0xa0] sm:$0xff]  ;;  %v3769_v15 = vld [vmem:[%s4973_s23 + $0x68] sm:$0xff] }
 0x2de   : > { %3124 = vperm.xlu0 %3742, %v3031_v32   ;;  %v3027_v32 = vsel %vm2963_vm15, 1, %v6637_v0  ;;  %vm2973_vm2 = vcmp.eq.s32.totalorder %v3768_v7, 1  ;;  %vm2966_vm4 = vcmp.eq.s32.totalorder %v3769_v15, 1  ;;  %v3772_v7 = vld [vmem:[%s4973_s23 + $0x80] sm:$0xff] }
 0x2df   : > { %v5782_v1 = vpop.f32.mrf.mxu2  ;;  %3103 = vperm.xlu2 %3743, %v3024_v37   ;;  %3100 = vperm.xlu1 %3744, %v3023_v5   ;;  %v2091_v5 = vmax.f32 %v2027_v35, 0.0  ;;  %v2092_v61 = vmax.f32 %v2028_v49, 0.0  ;;  %v3037_v20 = vsel %vm2973_vm2, 1, %v6637_v0  ;;  %vm2969_vm9 = vcmp.eq.s32.totalorder %v3772_v7, 1 }
 0x2e0   : > { %v5784_v36 = vpop.permute.xlu0 %2673 }
 0x2e1   : > { %v2247_v39 = vpop.f32.mrf.mxu1  ;;  %v5787_v28 = vpop.permute.xlu1 %2649  ;;  %vm2792_vm8 = vcmp.eq.s32.totalorder %v5784_v36, 1 }
 0x2e2   : > { %v5792_v52 = vadd.f32 %v5510_v26, %v2247_v39  ;;  %v5794_v60 = vpop.permute.xlu2 %2679 }
 0x2e4   : > { %v2834_v22 = vsel %vm2770_vm1, %v5792_v52, -inf  ;;  %2286 = vmatmul.bf16.gmra.mxu1 %v2118_v42  ;;  %v2129_v42 = vpack.c.bf16 %v2092_v61, %v2091_v5  ;;  %vm2773_vm1 = vcmp.eq.s32.totalorder %v5606_v63, 1 }
 0x2e5   : > { %v2899_v37 = vmax.f32 %v2834_v22, %v2898_v11  ;;  %v3770_v11 = vld [vmem:[%s4973_s23 + $0x60] sm:$0xff]  ;;  %v3030_v22 = vsel %vm2966_vm4, 1, %v6637_v0 }
 0x2e6   : > { %3133 = vperm.xlu0 %3742, %v3034_v56   ;;  %vm2965_vm5 = vcmp.eq.s32.totalorder %v3770_v11, 1 }
 0x2e7   : > { %v2299_v18 = vpop.f32.mrf.mxu2  ;;  %3112 = vperm.xlu2 %3743, %v3027_v32   ;;  %3109 = vperm.xlu1 %3744, %v3026_v30   ;;  %v3029_v32 = vsel %vm2965_vm5, 1, %v6637_v0 }
 0x2e8   : > { %v5809_v9 = vadd.f32 %v5510_v26, %v2299_v18  ;;  %v5811_v17 = vpop.permute.xlu0 %2682 }
 0x2e9   : > { %v2249_v29 = vpop.f32.mrf.mxu1  ;;  %v5814_v44 = vpop.permute.xlu1 %2658 }
 0x2ea   : > { %6774 = vst [vmem:[#allocation40_spill] sm:$0xff] %v5809_v9  ;;  %v2855_v39 = vsel %vm2791_vm3, %v5809_v9, -inf  ;;  %v5820_v27 = vadd.f32 %v5510_v26, %v2249_v29  ;;  %v5822_v38 = vpop.permute.xlu2 %2688  ;;  %v3773_v29 = vld [vmem:[%s4973_s23 + $0x78] sm:$0xff]  ;;  %vm2794_vm3 = vcmp.eq.s32.totalorder %v5794_v60, 1 }
 0x2eb   : > { %v2900_v35 = vmax.f32 %v2855_v39, %v2899_v37  ;;  %v3771_v37 = vld [vmem:[%s4973_s23 + $0xb8] sm:$0xff]  ;;  %vm2968_vm10 = vcmp.eq.s32.totalorder %v3773_v29, 1  ;;  %v3774_v29 = vld [vmem:[%s4973_s23 + $0xd0] sm:$0xff] }
 0x2ec   : > { %6775 = vst [vmem:[#allocation66_spill] sm:$0xff] %v5820_v27  ;;  %v2835_v56 = vsel %vm2771_vm6, %v5820_v27, -inf  ;;  %2341 = vmatmul.bf16.gmra.mxu2 %v2129_v42  ;;  %vm2976_vm7 = vcmp.eq.s32.totalorder %v3771_v37, 1  ;;  %v6778_v37 = vld [vmem:[#allocation54_spill] sm:$0xff]  ;;  %vm2979_vm13 = vcmp.eq.s32.totalorder %v3774_v29, 1  ;;  %vm2774_vm6 = vcmp.eq.s32.totalorder %v5626_v16, 1 }
 0x2ed   : > { %v2901_v30 = vmax.f32 %v2835_v56, %v2900_v35  ;;  %v3040_v36 = vsel %vm2976_vm7, 1, %v6637_v0  ;;  %v5848_v35 = vadd.f32 %v5510_v26, %v5782_v1  ;;  %v3033_v56 = vsel %vm2969_vm9, 1, %v6637_v0 }
 0x2ee   : > { %3142 = vperm.xlu0 %3742, %v3037_v20   ;;  %v897_v1 = vmul.f32 %v4785_v54, %v6778_v37  ;;  %v900_v16 = vmul.f32 %v4785_v54, %v6786_v4  ;;  %v3780_v4 = vld [vmem:[%s4973_s23 + $0x100] sm:$0xff] }
 0x2ef   : > { %v2302_v49 = vpop.f32.mrf.mxu2  ;;  %3121 = vperm.xlu2 %3743, %v3030_v22   ;;  %3118 = vperm.xlu1 %3744, %v3029_v32   ;;  %6777 = vst [vmem:[#allocation30_spill] sm:$0xff] %v5848_v35  ;;  %v3032_v22 = vsel %vm2968_vm10, 1, %v6637_v0  ;;  %vm2985_vm7 = vcmp.eq.s32.totalorder %v3780_v4, 1 }
 0x2f0   : > { %v5830_v5 = vadd.f32 %v5510_v26, %v2302_v49  ;;  %v5832_v2 = vpop.permute.xlu0 %2691 }
 0x2f1   : > { %v2252_v18 = vpop.f32.mrf.mxu1  ;;  %v2668_v61 = vpop.permute.xlu1 %2667 }
 0x2f2   : > { %6776 = vst [vmem:[#allocation74_spill] sm:$0xff] %v5830_v5  ;;  %v2856_v15 = vsel %vm2792_vm8, %v5830_v5, -inf  ;;  %v5840_v11 = vadd.f32 %v5510_v26, %v2252_v18  ;;  %v5842_v39 = vpop.permute.xlu2 %2697  ;;  %vm2790_vm12 = vcmp.eq.s32.totalorder %v2668_v61, 1  ;;  %v6779_v18 = vld [vmem:[#allocation128_spill] sm:$0xff]  ;;  %v3777_v5 = vld [vmem:[%s4973_s23 + $0xe8] sm:$0xff]  ;;  %vm2795_vm8 = vcmp.eq.s32.totalorder %v5811_v17, 1 }
 0x2f3   : > { %v2902_v42 = vmax.f32 %v2856_v15, %v2901_v30  ;;  %v2854_v49 = vsel %vm2790_vm12, %v5848_v35, -inf  ;;  %v1514_v61 = vmul.f32 %v4787_v12, %v6779_v18  ;;  %vm2982_vm2 = vcmp.eq.s32.totalorder %v3777_v5, 1 }
 0x2f4   : > { %v2836_v20 = vsel %vm2772_vm11, %v5840_v11, -inf  ;;  %v3046_v5 = vsel %vm2982_vm2, 1, %v6637_v0  ;;  %vm2775_vm11 = vcmp.eq.s32.totalorder %v5693_v31, 1  ;;  %vm2797_vm2 = vcmp.eq.s32.totalorder %v5822_v38, 1 }
 0x2f5   : > { %v2903_v32 = vmax.f32 %v2836_v20, %v2902_v42 }
 0x2f6   : > { %3151 = vperm.xlu0 %3742, %v3040_v36   ;;  %v3775_v36 = vld [vmem:[%s4973_s23 + $0x98] sm:$0xff] }
 0x2f7   : > { %v2904_v33 = vmax.f32 %v2854_v49, %v2903_v32  ;;  %v2304_v30 = vpop.f32.mrf.mxu2  ;;  %3130 = vperm.xlu2 %3743, %v3033_v56   ;;  %3127 = vperm.xlu1 %3744, %v3032_v22   ;;  %vm2972_vm14 = vcmp.eq.s32.totalorder %v3775_v36, 1  ;;  %v3776_v32 = vld [vmem:[%s4973_s23 + $0x90] sm:$0xff]  ;;  %v6781_v56 = vld [vmem:[#allocation21_spill] sm:$0xff] }
 0x2f8   : > { %v5858_v7 = vpop.permute.xlu0 %2700  ;;  %v5862_v15 = vadd.f32 %v5510_v26, %v2304_v30  ;;  %vm2971_vm15 = vcmp.eq.s32.totalorder %v3776_v32, 1  ;;  %v1182_v22 = vadd.f32 %v6781_v56, %v897_v1  ;;  %v3043_v30 = vsel %vm2979_vm13, 1, %v6637_v0  ;;  %v6782_v56 = vld [vmem:[#allocation120_spill] sm:$0xff] }
 0x2f9   : > { %v2254_v42 = vpop.f32.mrf.mxu1  ;;  %v2677_v20 = vpop.permute.xlu1 %2676  ;;  %v3036_v1 = vsel %vm2972_vm14, 1, %v6637_v0 }
 0x2fa   : > { %6780 = vst [vmem:[#allocation76_spill] sm:$0xff] %v5862_v15  ;;  %v5868_v49 = vadd.f32 %v5510_v26, %v2254_v42  ;;  %v5870_v37 = vpop.permute.xlu2 %2706  ;;  %vm2793_vm0 = vcmp.eq.s32.totalorder %v2677_v20, 1  ;;  %v1578_v29 = vadd.f32 %v1514_v61, %v1182_v22  ;;  %v3035_v42 = vsel %vm2971_vm15, 1, %v6637_v0 }
 0x2fb   : > { %v2857_v18 = vsel %vm2793_vm0, %v5862_v15, -inf  ;;  %v1899_v20 = vmul.f32 %v4801_v46, %v6782_v56  ;;  %v3778_v56 = vld [vmem:[%s4973_s23 + $0xb0] sm:$0xff]  ;;  %vm2776_vm0 = vcmp.eq.s32.totalorder %v5638_v19, 1 }
 0x2fc   : > { %v2837_v36 = vsel %vm2773_vm1, %v5868_v49, -inf  ;;  %2346 = vmatmul.bf16.gmra.mxu2 %v5413_v41  ;;  %vm2975_vm4 = vcmp.eq.s32.totalorder %v3778_v56, 1  ;;  %v6785_v56 = vld [vmem:[#allocation70_spill] sm:$0xff] }
 0x2fd   : > { %v2905_v32 = vmax.f32 %v2837_v36, %v2904_v33  ;;  %v1963_v61 = vadd.f32 %v1899_v20, %v1578_v29 }
 0x2fe   : > { %3160 = vperm.xlu0 %3742, %v3043_v30   ;;  %v3779_v30 = vld [vmem:[%s4973_s23 + $0xa8] sm:$0xff] }
 0x2ff   : > { %v2906_v63 = vmax.f32 %v2857_v18, %v2905_v32  ;;  %v2307_v9 = vpop.f32.mrf.mxu2  ;;  %3139 = vperm.xlu2 %3743, %v3036_v1   ;;  %3136 = vperm.xlu1 %3744, %v3035_v42   ;;  %vm2974_vm5 = vcmp.eq.s32.totalorder %v3779_v30, 1  ;;  %v2032_v18 = vadd.f32 %v5799_v50, %v5424_v43  ;;  %v3039_v32 = vsel %vm2975_vm4, 1, %v6637_v0 }
 0x300   : > { %v5882_v22 = vadd.f32 %v5510_v26, %v2307_v9  ;;  %v5884_v41 = vpop.permute.xlu0 %2709  ;;  %v3038_v20 = vsel %vm2974_vm5, 1, %v6637_v0  ;;  %v2031_v43 = vadd.f32 %v5799_v50, %v1963_v61  ;;  %v6789_v61 = vld [vmem:[#allocation129_spill] sm:$0xff]  ;;  %vm2777_vm5 = vcmp.eq.s32.totalorder %v5651_v8, 1  ;;  %v5992_v8 = vld [vmem:[%s6447_s7] ss:$0 sm:$0xff] }
 0x301   : > { %v2257_v33 = vpop.f32.mrf.mxu1  ;;  %v5888_v36 = vpop.permute.xlu1 %2685  ;;  %v2096_v15 = vmax.f32 %v2032_v18, 0.0 }
 0x302   : > { %6783 = vst [vmem:[#allocation35_spill] sm:$0xff] %v5882_v22  ;;  %v2858_v29 = vsel %vm2794_vm3, %v5882_v22, -inf  ;;  %v5896_v9 = vadd.f32 %v5510_v26, %v2257_v33  ;;  %v5898_v1 = vpop.permute.xlu2 %2715  ;;  %v899_v33 = vmul.f32 %v4785_v54, %v6785_v56  ;;  %v6788_v22 = vld [vmem:[#allocation62_spill] sm:$0xff]  ;;  %vm2796_vm13 = vcmp.eq.s32.totalorder %v5888_v36, 1 }
 0x303   : > { %v2907_v60 = vmax.f32 %v2858_v29, %v2906_v63  ;;  %v6787_v63 = vld [vmem:[#allocation67_spill] sm:$0xff] }
 0x304   : > { %6784 = vst [vmem:[#allocation24_spill] sm:$0xff] %v5896_v9  ;;  %v2838_v42 = vsel %vm2774_vm6, %v5896_v9, -inf  ;;  %v1516_v29 = vmul.f32 %v4787_v12, %v6787_v63  ;;  %v1187_v35 = vadd.f32 %v6788_v22, %v899_v33  ;;  %v1517_v9 = vmul.f32 %v4787_v12, %v6789_v61 }
 0x305   : > { %v2908_v30 = vmax.f32 %v2838_v42, %v2907_v60  ;;  %v6791_v42 = vld [vmem:[#allocation73_spill] sm:$0xff] }
 0x306   : > { %3169 = vperm.xlu0 %3742, %v3046_v5   ;;  %v2095_v5 = vmax.f32 %v2031_v43, 0.0  ;;  %v1189_v56 = vadd.f32 %v6791_v42, %v900_v16  ;;  %v1580_v42 = vadd.f32 %v1516_v29, %v1187_v35 }
 0x307   : > { %v2309_v21 = vpop.f32.mrf.mxu2  ;;  %3148 = vperm.xlu2 %3743, %v3039_v32   ;;  %3145 = vperm.xlu1 %3744, %v3038_v20   ;;  %v3781_v32 = vld [vmem:[%s4973_s23 + $0xc8] sm:$0xff]  ;;  %v3782_v20 = vld [vmem:[%s4973_s23 + $0xc0] sm:$0xff] }
 0x308   : > { %v5916_v60 = vadd.f32 %v5510_v26, %v2309_v21  ;;  %v5918_v18 = vpop.permute.xlu0 %2718  ;;  %vm2978_vm9 = vcmp.eq.s32.totalorder %v3781_v32, 1  ;;  %vm2977_vm10 = vcmp.eq.s32.totalorder %v3782_v20, 1  ;;  %v1901_v21 = vmul.f32 %v4801_v46, %v5294_v57 }
 0x309   : > { %v2259_v22 = vpop.f32.mrf.mxu1  ;;  %v5923_v33 = vpop.permute.xlu1 %2694  ;;  %v2131_v16 = vpack.c.bf16 %v2096_v15, %v2095_v5  ;;  %v3049_v32 = vsel %vm2985_vm7, 1, %v6637_v0  ;;  %v1581_v20 = vadd.f32 %v1517_v9, %v1189_v56  ;;  %v3042_v57 = vsel %vm2978_vm9, 1, %v6637_v0  ;;  %v3783_v5 = vld [vmem:[%s4973_s23 + $0x118] sm:$0xff]  ;;  %v3784_v56 = vld [vmem:[%s4973_s23 + $0xe0] sm:$0xff] }
 0x30a   : > { %6790 = vst [vmem:[#allocation17_spill] sm:$0xff] %v5916_v60  ;;  %v2859_v63 = vsel %vm2795_vm8, %v5916_v60, -inf  ;;  %v5931_v43 = vadd.f32 %v5510_v26, %v2259_v22  ;;  %v5933_v61 = vpop.permute.xlu2 %2724  ;;  %v3041_v22 = vsel %vm2977_vm10, 1, %v6637_v0  ;;  %v1965_v31 = vadd.f32 %v1901_v21, %v1580_v42  ;;  %v3785_v21 = vld [vmem:[%s4973_s23 + $0xd8] sm:$0xff] }
 0x30b   : > { %6792 = vst [vmem:[#allocation90_spill] sm:$0xff] %v5933_v61  ;;  %v2912_v17 = vmax.f32 %v2908_v30, %v2859_v63  ;;  %v6793_v61 = vld [vmem:[#allocation124_spill] sm:$0xff]  ;;  %vm2988_vm12 = vcmp.eq.s32.totalorder %v3783_v5, 1  ;;  %vm2981_vm14 = vcmp.eq.s32.totalorder %v3784_v56, 1  ;;  %vm2980_vm15 = vcmp.eq.s32.totalorder %v3785_v21, 1 }
 0x30c   : > { %v2839_v27 = vsel %vm2775_vm11, %v5931_v43, -inf  ;;  %2351 = vmatmul.bf16.gmra.mxu2 %v2131_v16  ;;  %v1902_v35 = vmul.f32 %v4801_v46, %v6793_v61  ;;  %v2033_v63 = vadd.f32 %v5799_v50, %v1965_v31  ;;  %vm2798_vm7 = vcmp.eq.s32.totalorder %v5832_v2, 1 }
 0x30d   : > { %v2916_v60 = vmax.f32 %v2912_v17, %v2839_v27  ;;  %v3052_v17 = vsel %vm2988_vm12, 1, %v6637_v0  ;;  %vm2778_vm10 = vcmp.eq.s32.totalorder %v5730_v55, 1  ;;  %vm2799_vm12 = vcmp.eq.s32.totalorder %v5923_v33, 1 }
 0x30e   : > { %3178 = vperm.xlu0 %3742, %v3049_v32   ;;  %v1966_v30 = vadd.f32 %v1902_v35, %v1581_v20  ;;  %v3045_v20 = vsel %vm2981_vm14, 1, %v6637_v0  ;;  %v2097_v31 = vmax.f32 %v2033_v63, 0.0  ;;  %v3788_v63 = vld [vmem:[%s4973_s23 + $0xf0] sm:$0xff] }
 0x30f   : > { %v2312_v15 = vpop.f32.mrf.mxu2  ;;  %3157 = vperm.xlu2 %3743, %v3042_v57   ;;  %3154 = vperm.xlu1 %3744, %v3041_v22   ;;  %v3044_v57 = vsel %vm2980_vm15, 1, %v6637_v0  ;;  %vm2983_vm4 = vcmp.eq.s32.totalorder %v3788_v63, 1  ;;  %v3791_v63 = vld [vmem:[%s4973_s23 + $0x110] sm:$0xff]  ;;  %vm2779_vm15 = vcmp.eq.s32.totalorder %v5660_v34, 1 }
 0x310   : > { %v5944_v9 = vadd.f32 %v5510_v26, %v2312_v15  ;;  %v5946_v29 = vpop.permute.xlu0 %2727  ;;  %v2034_v22 = vadd.f32 %v5799_v50, %v1966_v30  ;;  %v3787_v30 = vld [vmem:[%s4973_s23 + $0xf8] sm:$0xff]  ;;  %vm2987_vm8 = vcmp.eq.s32.totalorder %v3791_v63, 1 }
 0x311   : > { %v2262_v27 = vpop.f32.mrf.mxu1  ;;  %v5950_v4 = vpop.permute.xlu1 %2703  ;;  %vm2984_vm3 = vcmp.eq.s32.totalorder %v3787_v30, 1  ;;  %v6797_v63 = vld [vmem:[#allocation63_spill] sm:$0xff] }
 0x312   : > { %v2860_v61 = vsel %vm2796_vm13, %v5944_v9, -inf  ;;  %v5957_v16 = vadd.f32 %v5510_v26, %v2262_v27  ;;  %v5959_v42 = vpop.permute.xlu2 %2733  ;;  %v2098_v5 = vmax.f32 %v2034_v22, 0.0  ;;  %v3786_v27 = vld [vmem:[%s4973_s23 + $0x130] sm:$0xff]  ;;  %v3048_v22 = vsel %vm2984_vm3, 1, %v6637_v0 }
 0x313   : > { %v2909_v36 = vmax.f32 %v2860_v61, %v2916_v60  ;;  %vm2991_vm1 = vcmp.eq.s32.totalorder %v3786_v27, 1 }
 0x314   : > { %v2840_v32 = vsel %vm2776_vm0, %v5957_v16, -inf  ;;  %v3055_v38 = vsel %vm2991_vm1, 1, %v6637_v0  ;;  %vm2800_vm1 = vcmp.eq.s32.totalorder %v5842_v39, 1 }
 0x315   : > { %v2913_v35 = vmax.f32 %v2909_v36, %v2840_v32  ;;  %v2132_v32 = vpack.c.bf16 %v2098_v5, %v2097_v31  ;;  %v3790_v5 = vld [vmem:[%s4973_s23 + $0x148] sm:$0xff] }
 0x316   : > { %3187 = vperm.xlu0 %3742, %v3052_v17   ;;  %vm2994_vm6 = vcmp.eq.s32.totalorder %v3790_v5, 1 }
 0x317   : > { %v2314_v15 = vpop.f32.mrf.mxu2  ;;  %3166 = vperm.xlu2 %3743, %v3045_v20   ;;  %3163 = vperm.xlu1 %3744, %v3044_v57   ;;  %v3058_v2 = vsel %vm2994_vm6, 1, %v6637_v0 }
 0x318   : > { %v5968_v19 = vadd.f32 %v5510_v26, %v2314_v15  ;;  %v5970_v60 = vpop.permute.xlu0 %2736  ;;  %v3047_v15 = vsel %vm2983_vm4, 1, %v6637_v0  ;;  %vm2780_vm4 = vcmp.eq.s32.totalorder %v5670_v10, 1 }
 0x319   : > { %v2264_v56 = vpop.f32.mrf.mxu1  ;;  %v5974_v21 = vpop.permute.xlu1 %2712 }
 0x31a   : > { %v2861_v61 = vsel %vm2797_vm2, %v5968_v19, -inf  ;;  %v5980_v36 = vadd.f32 %v5510_v26, %v2264_v56  ;;  %v5982_v17 = vpop.permute.xlu2 %2742 }
 0x31b   : > { %v2917_v20 = vmax.f32 %v2913_v35, %v2861_v61  ;;  %v3792_v61 = vld [vmem:[%s4973_s23 + $0x108] sm:$0xff] }
 0x31c   : > { %v2841_v57 = vsel %vm2777_vm5, %v5980_v36, -inf  ;;  %2356 = vmatmul.bf16.gmra.mxu2 %v2132_v32  ;;  %vm2986_vm9 = vcmp.eq.s32.totalorder %v3792_v61, 1  ;;  %v6798_v61 = vld [vmem:[#allocation130_spill] sm:$0xff] }
 0x31d   : > { %v2910_v26 = vmax.f32 %v2841_v57, %v2917_v20 }
 0x31e   : > { %3196 = vperm.xlu0 %3742, %v3055_v38  }
 0x31f   : > { %v2317_v27 = vpop.f32.mrf.mxu2  ;;  %3175 = vperm.xlu2 %3743, %v3048_v22   ;;  %3172 = vperm.xlu1 %3744, %v3047_v15   ;;  %v3051_v15 = vsel %vm2987_vm8, 1, %v6637_v0 }
 0x320   : > { %v5995_v35 = vadd.f32 %v5992_v8, %v2317_v27  ;;  %v5997_v31 = vpop.permute.xlu0 %2745  ;;  %v3050_v27 = vsel %vm2986_vm9, 1, %v6637_v0 }
 0x321   : > { %6795 = vst [vmem:[#allocation75_spill] sm:$0xff] %v5997_v31  ;;  %v2267_v56 = vpop.f32.mrf.mxu1  ;;  %v6001_v30 = vpop.permute.xlu1 %2721  ;;  %v3793_v31 = vld [vmem:[%s4973_s23 + $0x160] sm:$0xff] }
 0x322   : > { %6794 = vst [vmem:[#allocation92_spill] sm:$0xff] %v5995_v35  ;;  %v2862_v32 = vsel %vm2798_vm7, %v5995_v35, -inf  ;;  %v6007_v20 = vadd.f32 %v5992_v8, %v2267_v56  ;;  %v6009_v38 = vpop.permute.xlu2 %2751  ;;  %v903_v56 = vmul.f32 %v4785_v54, %v6797_v63  ;;  %vm2997_vm11 = vcmp.eq.s32.totalorder %v3793_v31, 1  ;;  %v6799_v31 = vld [vmem:[#allocation127_spill] sm:$0xff] }
 0x323   : > { %6796 = vst [vmem:[#allocation14_spill] sm:$0xff] %v6009_v38  ;;  %v2914_v57 = vmax.f32 %v2910_v26, %v2862_v32  ;;  %v1520_v38 = vmul.f32 %v4787_v12, %v6798_v61  ;;  %v3795_v12 = vld [vmem:[%s4973_s23 + $0x120] sm:$0xff]  ;;  %v3061_v33 = vsel %vm2997_vm11, 1, %v6637_v0  ;;  %vm2801_vm7 = vcmp.eq.s32.totalorder %v5858_v7, 1 }
 0x324   : > { %v2842_v22 = vsel %vm2778_vm10, %v6007_v20, -inf  ;;  %v1197_v26 = vadd.f32 %v5415_v45, %v903_v56  ;;  %vm2989_vm14 = vcmp.eq.s32.totalorder %v3795_v12, 1  ;;  %v1905_v56 = vmul.f32 %v4801_v46, %v6799_v31 }
 0x325   : > { %v2918_v5 = vmax.f32 %v2914_v57, %v2842_v22  ;;  %v3794_v22 = vld [vmem:[%s4973_s23 + $0x128] sm:$0xff]  ;;  %vm2781_vm11 = vcmp.eq.s32.totalorder %v5763_v24, 1 }
 0x326   : > { %3205 = vperm.xlu0 %3742, %v3058_v2   ;;  %vm2990_vm13 = vcmp.eq.s32.totalorder %v3794_v22, 1  ;;  %v1584_v2 = vadd.f32 %v1520_v38, %v1197_v26 }
 0x327   : > { %v2319_v55 = vpop.f32.mrf.mxu2  ;;  %3184 = vperm.xlu2 %3743, %v3051_v15   ;;  %3181 = vperm.xlu1 %3744, %v3050_v27   ;;  %v3054_v38 = vsel %vm2990_vm13, 1, %v6637_v0 }
 0x328   : > { %v6022_v32 = vadd.f32 %v5992_v8, %v2319_v55  ;;  %v6024_v35 = vpop.permute.xlu0 %2754  ;;  %v3053_v55 = vsel %vm2989_vm14, 1, %v6637_v0  ;;  %vm2782_vm14 = vcmp.eq.s32.totalorder %v5678_v59, 1 }
 0x329   : > { %v2269_v54 = vpop.f32.mrf.mxu1  ;;  %v6028_v57 = vpop.permute.xlu1 %2730 }
 0x32a   : > { %v2863_v15 = vsel %vm2799_vm12, %v6022_v32, -inf  ;;  %v6034_v45 = vadd.f32 %v5992_v8, %v2269_v54  ;;  %v3086_v27 = vpop.permute.xlu2 %3085  ;;  %v1969_v54 = vadd.f32 %v1905_v56, %v1584_v2  ;;  %v3797_v2 = vld [vmem:[%s4973_s23 + $0x140] sm:$0xff] }
 0x32b   : > { %v2911_v63 = vmax.f32 %v2863_v15, %v2918_v5  ;;  %v2038_v5 = vadd.f32 %v5799_v50, %v5489_v14  ;;  %vm2993_vm2 = vcmp.eq.s32.totalorder %v3797_v2, 1  ;;  %vm3274_vm5 = vcmp.eq.s32.totalorder %v3086_v27, 1 }
 0x32c   : > { %v2843_v61 = vsel %vm2779_vm15, %v6034_v45, -inf  ;;  %2361 = vmatmul.bf16.gmra.mxu2 %v5480_v47  ;;  %v3796_v47 = vld [vmem:[%s4973_s23 + $0x178] sm:$0xff]  ;;  %v2037_v56 = vadd.f32 %v5799_v50, %v1969_v54  ;;  %vm2802_vm15 = vcmp.eq.s32.totalorder %v5950_v4, 1 }
 0x32d   : > { %v2915_v26 = vmax.f32 %v2911_v63, %v2843_v61  ;;  %vm3000_vm0 = vcmp.eq.s32.totalorder %v3796_v47, 1  ;;  %v3798_v63 = vld [vmem:[%s4973_s23 + $0x138] sm:$0xff] }
 0x32e   : > { %3214 = vperm.xlu0 %3742, %v3061_v33   ;;  %vm2992_vm3 = vcmp.eq.s32.totalorder %v3798_v63, 1  ;;  %v3064_v39 = vsel %vm3000_vm0, 1, %v6637_v0 }
 0x32f   : > { %v2322_v34 = vpop.f32.mrf.mxu2  ;;  %3193 = vperm.xlu2 %3743, %v3054_v38   ;;  %3190 = vperm.xlu1 %3744, %v3053_v55   ;;  %v2102_v38 = vmax.f32 %v2038_v5, 0.0  ;;  %v3056_v47 = vsel %vm2992_vm3, 1, %v6637_v0  ;;  %v3799_v5 = vld [vmem:[%s4973_s23 + $0x190] sm:$0xff] }
 0x330   : > { %v6047_v46 = vadd.f32 %v5992_v8, %v2322_v34  ;;  %v6049_v22 = vpop.permute.xlu0 %3088  ;;  %v3057_v34 = vsel %vm2993_vm2, 1, %v6637_v0  ;;  %vm3003_vm6 = vcmp.eq.s32.totalorder %v3799_v5, 1 }
 0x331   : > { %v2272_v12 = vpop.f32.mrf.mxu1  ;;  %v6053_v15 = vpop.permute.xlu1 %2739 }
 0x332   : > { %v2864_v33 = vsel %vm2800_vm1, %v6047_v46, -inf  ;;  %v6059_v14 = vadd.f32 %v5992_v8, %v2272_v12  ;;  %v6061_v31 = vpop.permute.xlu2 %3094  ;;  %v2101_v12 = vmax.f32 %v2037_v56, 0.0  ;;  %v3801_v56 = vld [vmem:[%s4973_s23 + $0x150] sm:$0xff] }
 0x333   : > { %v2919_v61 = vmax.f32 %v2915_v26, %v2864_v33  ;;  %vm2995_vm10 = vcmp.eq.s32.totalorder %v3801_v56, 1  ;;  %vm3277_vm12 = vcmp.eq.s32.totalorder %v6061_v31, 1  ;;  %v3803_v56 = vld [vmem:[%s4973_s23 + $0x170] sm:$0xff] }
 0x334   : > { %v2844_v55 = vsel %vm2780_vm4, %v6059_v14, -inf  ;;  %v2134_v54 = vpack.c.bf16 %v2102_v38, %v2101_v12  ;;  %vm2999_vm0 = vcmp.eq.s32.totalorder %v3803_v56, 1 }
 0x335   : > { %v2920_v2 = vmax.f32 %v2844_v55, %v2919_v61  ;;  %v3800_v61 = vld [vmem:[%s4973_s23 + $0x158] sm:$0xff]  ;;  %v3063_v56 = vsel %vm2999_vm0, 1, %v6637_v0  ;;  %vm2804_vm0 = vcmp.eq.s32.totalorder %v5884_v41, 1 }
 0x336   : > { %3223 = vperm.xlu0 %3742, %v3064_v39   ;;  %vm2996_vm9 = vcmp.eq.s32.totalorder %v3800_v61, 1  ;;  %v6080_v39 = vsel %vm3274_vm5, %v5522_v58, -inf  ;;  %v3067_v58 = vsel %vm3003_vm6, 1, %v6637_v0  ;;  %vm2783_vm6 = vcmp.eq.s32.totalorder %v5690_v13, 1 }
 0x337   : > { %v2324_v50 = vpop.f32.mrf.mxu2  ;;  %3202 = vperm.xlu2 %3743, %v3057_v34   ;;  %3199 = vperm.xlu1 %3744, %v3056_v47  }
 0x338   : > { %v6070_v10 = vadd.f32 %v5992_v8, %v2324_v50  ;;  %v3098_v26 = vpop.permute.xlu0 %3097  ;;  %v3059_v50 = vsel %vm2995_vm10, 1, %v6637_v0 }
 0x339   : > { %vm3278_vm8 = vcmp.eq.s32.totalorder %v3098_v26, 1  ;;  %v2274_v63 = vpop.f32.mrf.mxu1  ;;  %v6074_v33 = vpop.permute.xlu1 %2748 }
 0x33a   : > { %v2865_v55 = vsel %vm2801_vm7, %v6070_v10, -inf  ;;  %v6084_v38 = vsel %vm3278_vm8, %v5525_v25, -inf  ;;  %v6087_v34 = vadd.f32 %v5992_v8, %v2274_v63  ;;  %v6089_v7 = vpop.permute.xlu2 %3103  ;;  %v3060_v25 = vsel %vm2996_vm9, 1, %v6637_v0  ;;  %v3802_v63 = vld [vmem:[%s4973_s23 + $0x1a8] sm:$0xff] }
 0x33b   : > { %v2924_v47 = vmax.f32 %v2920_v2, %v2865_v55  ;;  %v3402_v12 = vmax.f32 %v6080_v39, %v6084_v38  ;;  %vm3006_vm13 = vcmp.eq.s32.totalorder %v3802_v63, 1  ;;  %v3804_v55 = vld [vmem:[%s4973_s23 + $0x168] sm:$0xff]  ;;  %vm3280_vm4 = vcmp.eq.s32.totalorder %v6089_v7, 1  ;;  %v3805_v63 = vld [vmem:[%s4973_s23 + $0x1c0] sm:$0xff] }
 0x33c   : > { %v2845_v27 = vsel %vm2781_vm11, %v6087_v34, -inf  ;;  %2366 = vmatmul.bf16.gmra.mxu2 %v2134_v54  ;;  %vm2998_vm1 = vcmp.eq.s32.totalorder %v3804_v55, 1  ;;  %vm3009_vm5 = vcmp.eq.s32.totalorder %v3805_v63, 1  ;;  %vm2803_vm7 = vcmp.eq.s32.totalorder %v5870_v37, 1 }
 0x33d   : > { %v2928_v26 = vmax.f32 %v2924_v47, %v2845_v27 }
 0x33e   : > { %3232 = vperm.xlu0 %3742, %v3067_v58  }
 0x33f   : > { %v2327_v24 = vpop.f32.mrf.mxu2  ;;  %3211 = vperm.xlu2 %3743, %v3060_v25   ;;  %3208 = vperm.xlu1 %3744, %v3059_v50   ;;  %v3341_v25 = vsel %vm3277_vm12, %v5585_v53, -inf  ;;  %vm3275_vm12 = vcmp.eq.s32.totalorder %v6049_v22, 1 }
 0x340   : > { %v6101_v2 = vadd.f32 %v5992_v8, %v2327_v24  ;;  %v3107_v5 = vpop.permute.xlu0 %3106  ;;  %v3070_v24 = vsel %vm3006_vm13, 1, %v6637_v0 }
 0x341   : > { %v2277_v54 = vpop.f32.mrf.mxu1  ;;  %v3083_v61 = vpop.permute.xlu1 %3082  ;;  %vm3281_vm2 = vcmp.eq.s32.totalorder %v3107_v5, 1 }
 0x342   : > { %v2866_v47 = vsel %vm2802_vm15, %v6101_v2, -inf  ;;  %v6110_v58 = vadd.f32 %v5992_v8, %v2277_v54  ;;  %v6112_v27 = vpop.permute.xlu2 %3112  ;;  %vm3273_vm3 = vcmp.eq.s32.totalorder %v3083_v61, 1  ;;  %v3062_v61 = vsel %vm2998_vm1, 1, %v6637_v0 }
 0x343   : > { %v2932_v4 = vmax.f32 %v2928_v26, %v2866_v47  ;;  %v3337_v50 = vsel %vm3273_vm3, %v5531_v62, -inf  ;;  %v3345_v55 = vsel %vm3281_vm2, %v5636_v6, -inf  ;;  %vm2784_vm15 = vcmp.eq.s32.totalorder %v5787_v28, 1 }
 0x344   : > { %v2846_v5 = vsel %vm2782_vm14, %v6110_v58, -inf  ;;  %v3401_v54 = vmax.f32 %v3337_v50, %v3341_v25  ;;  %v3806_v25 = vld [vmem:[%s4973_s23 + $0x188] sm:$0xff]  ;;  %vm3283_vm2 = vcmp.eq.s32.totalorder %v6112_v27, 1 }
 0x345   : > { %v2921_v53 = vmax.f32 %v2846_v5, %v2932_v4  ;;  %vm3002_vm8 = vcmp.eq.s32.totalorder %v3806_v25, 1  ;;  %v3807_v4 = vld [vmem:[%s4973_s23 + $0x180] sm:$0xff] }
 0x346   : > { %3241 = vperm.xlu0 %3742, %v3070_v24   ;;  %v6126_v62 = vmax.f32 %v3401_v54, %v3345_v55  ;;  %vm3001_vm9 = vcmp.eq.s32.totalorder %v3807_v4, 1  ;;  %v3344_v54 = vsel %vm3280_vm4, %v5604_v23, -inf  ;;  %v3809_v25 = vld [vmem:[%s4973_s23 + $0x1a0] sm:$0xff] }
 0x347   : > { %v2329_v31 = vpop.f32.mrf.mxu2  ;;  %3220 = vperm.xlu2 %3743, %v3063_v56   ;;  %3217 = vperm.xlu1 %3744, %v3062_v61   ;;  %v3073_v61 = vsel %vm3009_vm5, 1, %v6637_v0  ;;  %vm3005_vm14 = vcmp.eq.s32.totalorder %v3809_v25, 1 }
 0x348   : > { %v6130_v59 = vadd.f32 %v5992_v8, %v2329_v31  ;;  %v3116_v26 = vpop.permute.xlu0 %3115  ;;  %v3069_v41 = vsel %vm3005_vm14, 1, %v6637_v0  ;;  %vm2806_vm14 = vcmp.eq.s32.totalorder %v5898_v1, 1 }
 0x349   : > { %v2279_v6 = vpop.f32.mrf.mxu1  ;;  %v3092_v47 = vpop.permute.xlu1 %3091  ;;  %vm3284_vm10 = vcmp.eq.s32.totalorder %v3116_v26, 1  ;;  %v3066_v26 = vsel %vm3002_vm8, 1, %v6637_v0  ;;  %vm2805_vm8 = vcmp.eq.s32.totalorder %v5974_v21, 1 }
 0x34a   : > { %v2867_v50 = vsel %vm2803_vm7, %v6130_v59, -inf  ;;  %v6139_v24 = vadd.f32 %v5992_v8, %v2279_v6  ;;  %v6141_v5 = vpop.permute.xlu2 %3121  ;;  %vm3276_vm11 = vcmp.eq.s32.totalorder %v3092_v47, 1  ;;  %v3065_v6 = vsel %vm3001_vm9, 1, %v6637_v0  ;;  %v3808_v47 = vld [vmem:[%s4973_s23 + $0x1d8] sm:$0xff] }
 0x34b   : > { %v2925_v37 = vmax.f32 %v2921_v53, %v2867_v50  ;;  %v3340_v56 = vsel %vm3276_vm11, %v5594_v40, -inf  ;;  %v3348_v7 = vsel %vm3284_vm10, %v5698_v3, -inf  ;;  %vm3012_vm13 = vcmp.eq.s32.totalorder %v3808_v47, 1  ;;  %v3810_v50 = vld [vmem:[%s4973_s23 + $0x198] sm:$0xff] }
 0x34c   : > { %v2847_v55 = vsel %vm2783_vm6, %v6139_v24, -inf  ;;  %v3404_v31 = vmax.f32 %v3340_v56, %v3344_v54  ;;  %v3339_v3 = vsel %vm3275_vm12, %v5562_v48, -inf  ;;  %vm3004_vm1 = vcmp.eq.s32.totalorder %v3810_v50, 1 }
 0x34d   : > { %v2929_v23 = vmax.f32 %v2925_v37, %v2847_v55  ;;  %v6800_v55 = vld [vmem:[#allocation33_spill] sm:$0xff]  ;;  %v3076_v48 = vsel %vm3012_vm13, 1, %v6637_v0  ;;  %vm3286_vm10 = vcmp.eq.s32.totalorder %v6141_v5, 1 }
 0x34e   : > { %3250 = vperm.xlu0 %3742, %v3073_v61   ;;  %v6156_v40 = vmax.f32 %v3404_v31, %v3348_v7  ;;  %v6801_v7 = vld [vmem:[#allocation28_spill] sm:$0xff] }
 0x34f   : > { %v2332_v53 = vpop.f32.mrf.mxu2  ;;  %3229 = vperm.xlu2 %3743, %v3066_v26   ;;  %3226 = vperm.xlu1 %3744, %v3065_v6   ;;  %v3068_v6 = vsel %vm3004_vm1, 1, %v6637_v0 }
 0x350   : > { %v6159_v13 = vadd.f32 %v5992_v8, %v2332_v53  ;;  %v3125_v63 = vpop.permute.xlu0 %3124 }
 0x351   : > { %v2282_v22 = vpop.f32.mrf.mxu1  ;;  %v3101_v4 = vpop.permute.xlu1 %3100  ;;  %vm3287_vm4 = vcmp.eq.s32.totalorder %v3125_v63, 1 }
 0x352   : > { %v2868_v54 = vsel %vm2804_vm0, %v6159_v13, -inf  ;;  %v6170_v37 = vadd.f32 %v5992_v8, %v2282_v22  ;;  %v6172_v56 = vpop.permute.xlu2 %3130  ;;  %vm3279_vm3 = vcmp.eq.s32.totalorder %v3101_v4, 1  ;;  %v6187_v47 = vsel %vm3287_vm4, %v5792_v52, -inf  ;;  %v3812_v4 = vld [vmem:[%s4973_s23 + $0x1b8] sm:$0xff] }
 0x353   : > { %v2933_v61 = vmax.f32 %v2929_v23, %v2868_v54  ;;  %v3343_v31 = vsel %vm3279_vm3, %v6800_v55, -inf  ;;  %v3347_v23 = vsel %vm3283_vm2, %v6801_v7, -inf  ;;  %vm3008_vm6 = vcmp.eq.s32.totalorder %v3812_v4, 1  ;;  %v6802_v54 = vld [vmem:[#allocation27_spill] sm:$0xff] }
 0x354   : > { %v2848_v27 = vsel %vm2784_vm15, %v6170_v37, -inf  ;;  %v3403_v26 = vmax.f32 %v3339_v3, %v3343_v31  ;;  %v3811_v3 = vld [vmem:[%s4973_s23 + $0x1f0] sm:$0xff]  ;;  %vm2785_vm7 = vcmp.eq.s32.totalorder %v6802_v54, 1  ;;  %v3072_v7 = vsel %vm3008_vm6, 1, %v6637_v0 }
 0x355   : > { %v2922_v53 = vmax.f32 %v2848_v27, %v2933_v61  ;;  %vm3015_vm5 = vcmp.eq.s32.totalorder %v3811_v3, 1  ;;  %v3813_v55 = vld [vmem:[%s4973_s23 + $0x1b0] sm:$0xff]  ;;  %vm3289_vm0 = vcmp.eq.s32.totalorder %v6172_v56, 1 }
 0x356   : > { %v6184_v22 = vmax.f32 %v3403_v26, %v3347_v23  ;;  %3259 = vperm.xlu0 %3742, %v3076_v48   ;;  %vm3007_vm9 = vcmp.eq.s32.totalorder %v3813_v55, 1  ;;  %v6803_v26 = vld [vmem:[#allocation9_spill] sm:$0xff]  ;;  %v3079_v21 = vsel %vm3015_vm5, 1, %v6637_v0  ;;  %v3814_v55 = vld [vmem:[%s4973_s23 + $0x1d0] sm:$0xff]  ;;  %vm2807_vm5 = vcmp.eq.s32.totalorder %v5918_v18, 1 }
 0x357   : > { %v2334_v25 = vpop.f32.mrf.mxu2  ;;  %3238 = vperm.xlu2 %3743, %v3069_v41   ;;  %3235 = vperm.xlu1 %3744, %v3068_v6   ;;  %vm3011_vm13 = vcmp.eq.s32.totalorder %v3814_v55, 1  ;;  %v3816_v55 = vld [vmem:[%s4973_s23 + $0x1e8] sm:$0xff] }
 0x358   : > { %v6190_v28 = vadd.f32 %v5992_v8, %v2334_v25  ;;  %v3134_v63 = vpop.permute.xlu0 %3133  ;;  %v3411_v50 = vmax.f32 %v6184_v22, %v6187_v47  ;;  %v3350_v25 = vsel %vm3286_vm10, %v5771_v51, -inf  ;;  %vm3014_vm4 = vcmp.eq.s32.totalorder %v3816_v55, 1 }
 0x359   : > { %v2284_v52 = vpop.f32.mrf.mxu1  ;;  %v3110_v61 = vpop.permute.xlu1 %3109  ;;  %vm3290_vm12 = vcmp.eq.s32.totalorder %v3134_v63, 1  ;;  %v3078_v18 = vsel %vm3014_vm4, 1, %v6637_v0  ;;  %vm2810_vm4 = vcmp.eq.s32.totalorder %v5946_v29, 1 }
 0x35a   : > { %v2869_v31 = vsel %vm2805_vm8, %v6190_v28, -inf  ;;  %v6202_v48 = vadd.f32 %v5992_v8, %v2284_v52  ;;  %v6204_v41 = vpop.permute.xlu2 %3139  ;;  %vm3282_vm11 = vcmp.eq.s32.totalorder %v3110_v61, 1  ;;  %v3354_v4 = vsel %vm3290_vm12, %v5868_v49, -inf }
 0x35b   : > { %v2926_v27 = vmax.f32 %v2922_v53, %v2869_v31  ;;  %v3346_v6 = vsel %vm3282_vm11, %v6803_v26, -inf  ;;  %v3071_v53 = vsel %vm3007_vm9, 1, %v6637_v0  ;;  %v6804_v26 = vld [vmem:[#allocation5_spill] sm:$0xff]  ;;  %vm2787_vm9 = vcmp.eq.s32.totalorder %v5814_v44, 1 }
 0x35c   : > { %v2849_v5 = vsel %vm2785_vm7, %v6202_v48, -inf  ;;  %v3406_v23 = vmax.f32 %v3402_v12, %v3346_v6  ;;  %v3815_v12 = vld [vmem:[%s4973_s23 + $0x1c8] sm:$0xff]  ;;  %vm2786_vm2 = vcmp.eq.s32.totalorder %v6804_v26, 1  ;;  %vm3292_vm7 = vcmp.eq.s32.totalorder %v6204_v41, 1 }
 0x35d   : > { %v2930_v3 = vmax.f32 %v2926_v27, %v2849_v5  ;;  %vm3010_vm15 = vcmp.eq.s32.totalorder %v3815_v12, 1  ;;  %vm2808_vm11 = vcmp.eq.s32.totalorder %v6001_v30, 1 }
 0x35e   : > { %v3410_v52 = vmax.f32 %v3406_v23, %v3350_v25  ;;  %3268 = vperm.xlu0 %3742, %v3079_v21   ;;  %v6805_v21 = vld [vmem:[#allocation37_spill] sm:$0xff]  ;;  %v3074_v23 = vsel %vm3010_vm15, 1, %v6637_v0 }
 0x35f   : > { %v2337_v61 = vpop.f32.mrf.mxu2  ;;  %3247 = vperm.xlu2 %3743, %v3072_v7   ;;  %3244 = vperm.xlu1 %3744, %v3071_v53   ;;  %v3075_v7 = vsel %vm3011_vm13, 1, %v6637_v0  ;;  %v3353_v53 = vsel %vm3289_vm0, %v5840_v11, -inf }
 0x360   : > { %v6221_v63 = vadd.f32 %v5992_v8, %v2337_v61  ;;  %v3143_v54 = vpop.permute.xlu0 %3142  ;;  %v6224_v39 = vmax.f32 %v3410_v52, %v3354_v4 }
 0x361   : > { %v2287_v51 = vpop.f32.mrf.mxu1  ;;  %v3119_v38 = vpop.permute.xlu1 %3118  ;;  %vm3293_vm3 = vcmp.eq.s32.totalorder %v3143_v54, 1 }
 0x362   : > { %v2870_v49 = vsel %vm2806_vm14, %v6221_v63, -inf  ;;  %v6231_v31 = vadd.f32 %v5992_v8, %v2287_v51  ;;  %v6233_v27 = vpop.permute.xlu2 %3148  ;;  %vm3285_vm1 = vcmp.eq.s32.totalorder %v3119_v38, 1  ;;  %v3817_v38 = vld [vmem:[%s4973_s23 + $0x1e0] sm:$0xff] }
 0x363   : > { %v2934_v6 = vmax.f32 %v2930_v3, %v2870_v49  ;;  %v3349_v1 = vsel %vm3285_vm1, %v6805_v21, -inf  ;;  %v6245_v3 = vsel %vm3293_vm3, %v5957_v16, -inf  ;;  %vm3013_vm6 = vcmp.eq.s32.totalorder %v3817_v38, 1 }
 0x364   : > { %v2850_v5 = vsel %vm2786_vm2, %v6231_v31, -inf  ;;  %v3409_v56 = vmax.f32 %v6126_v62, %v3349_v1  ;;  %vm3295_vm13 = vcmp.eq.s32.totalorder %v6233_v27, 1 }
 0x365   : > { %v2923_v25 = vmax.f32 %v2850_v5, %v2934_v6  ;;  %v6806_v6 = vld [vmem:[#allocation66_spill] sm:$0xff]  ;;  %v3356_v5 = vsel %vm3292_vm7, %v5931_v43, -inf  ;;  %v3818_v43 = vld [vmem:[%s4973_s23 + $0x1f8] sm:$0xff]  ;;  %v3359_v30 = vsel %vm3295_vm13, %v6007_v20, -inf }
 0x366   : > { %v6242_v52 = vmax.f32 %v3409_v56, %v3353_v53  ;;  %vm3016_vm12 = vcmp.eq.s32.totalorder %v3818_v43, 1 }
 0x367   : > { %v2339_v4 = vpop.f32.mrf.mxu2  ;;  %3256 = vperm.xlu2 %3743, %v3075_v7   ;;  %3253 = vperm.xlu1 %3744, %v3074_v23   ;;  %v3077_v7 = vsel %vm3013_vm6, 1, %v6637_v0 }
 0x368   : > { %v6248_v61 = vadd.f32 %v5992_v8, %v2339_v4  ;;  %v3152_v54 = vpop.permute.xlu0 %3151  ;;  %v3417_v62 = vmax.f32 %v6242_v52, %v6245_v3 }
 0x369   : > { %v2289_v11 = vpop.f32.mrf.mxu1  ;;  %v3128_v51 = vpop.permute.xlu1 %3127  ;;  %vm3296_vm10 = vcmp.eq.s32.totalorder %v3152_v54, 1 }
 0x36a   : > { %v2871_v16 = vsel %vm2807_vm5, %v6248_v61, -inf  ;;  %v6258_v12 = vadd.f32 %v5992_v8, %v2289_v11  ;;  %v3158_v49 = vpop.permute.xlu2 %3157  ;;  %vm3288_vm8 = vcmp.eq.s32.totalorder %v3128_v51, 1  ;;  %v6270_v44 = vsel %vm3296_vm10, %v6034_v45, -inf  ;;  %v6807_v51 = vld [vmem:[#allocation24_spill] sm:$0xff] }
 0x36b   : > { %v2927_v26 = vmax.f32 %v2923_v25, %v2871_v16  ;;  %v3352_v21 = vsel %vm3288_vm8, %v6806_v6, -inf  ;;  %vm3298_vm1 = vcmp.eq.s32.totalorder %v3158_v49, 1  ;;  %vm2811_vm8 = vcmp.eq.s32.totalorder %v6028_v57, 1 }
 0x36c   : > { %v2851_v1 = vsel %vm2787_vm9, %v6258_v12, -inf  ;;  %v3412_v41 = vmax.f32 %v6156_v40, %v3352_v21 }
 0x36d   : > { %v2931_v56 = vmax.f32 %v2927_v26, %v2851_v1  ;;  %v3080_v26 = vsel %vm3016_vm12, 1, %v6637_v0 }
 0x36e   : > { %v6267_v23 = vmax.f32 %v3412_v41, %v3356_v5 }
 0x36f   : > { %v2342_v53 = vpop.f32.mrf.mxu2  ;;  %3265 = vperm.xlu2 %3743, %v3078_v18   ;;  %3262 = vperm.xlu1 %3744, %v3077_v7   ;;  %v6808_v7 = vld [vmem:[#allocation90_spill] sm:$0xff] }
 0x370   : > { %v6273_v25 = vadd.f32 %v5992_v8, %v2342_v53  ;;  %v3161_v4 = vpop.permute.xlu0 %3160  ;;  %v3420_v40 = vmax.f32 %v6267_v23, %v6270_v44  ;;  %vm2809_vm0 = vcmp.eq.s32.totalorder %v6808_v7, 1 }
 0x371   : > { %v3137_v54 = vpop.permute.xlu1 %3136  ;;  %vm3299_vm15 = vcmp.eq.s32.totalorder %v3161_v4, 1 }
 0x372   : > { %v2872_v45 = vsel %vm2808_vm11, %v6273_v25, -inf  ;;  %v3167_v55 = vpop.permute.xlu2 %3166  ;;  %vm3291_vm14 = vcmp.eq.s32.totalorder %v3137_v54, 1  ;;  %v3363_v21 = vsel %vm3299_vm15, %v6110_v58, -inf  ;;  %vm2812_vm11 = vcmp.eq.s32.totalorder %v5959_v42, 1 }
 0x373   : > { %v2935_v11 = vmax.f32 %v2931_v56, %v2872_v45  ;;  %v3355_v38 = vsel %vm3291_vm14, %v6807_v51, -inf  ;;  %vm3301_vm5 = vcmp.eq.s32.totalorder %v3167_v55, 1  ;;  %vm2813_vm15 = vcmp.eq.s32.totalorder %v5970_v60, 1 }
 0x374   : > { %v3415_v16 = vmax.f32 %v3411_v50, %v3355_v38  ;;  %v3362_v50 = vsel %vm3298_vm1, %v6087_v34, -inf  ;;  %v3365_v51 = vsel %vm3301_vm5, %v6170_v37, -inf }
 0x376   : > { %v3419_v6 = vmax.f32 %v3415_v16, %v3359_v30  ;;  %v6809_v16 = vld [vmem:[#allocation82_spill] sm:$0xff] }
 0x377   : > { %v2344_v27 = vpop.f32.mrf.mxu2  ;;  %3271 = vperm.xlu1 %3744, %v3080_v26  }
 0x378   : > { %v6289_v18 = vadd.f32 %v5992_v8, %v2344_v27  ;;  %v3170_v1 = vpop.permute.xlu0 %3169  ;;  %v3423_v41 = vmax.f32 %v3419_v6, %v3363_v21 }
 0x379   : > { %v3146_v5 = vpop.permute.xlu1 %3145  ;;  %vm3302_vm3 = vcmp.eq.s32.totalorder %v3170_v1, 1 }
 0x37a   : > { %v2873_v22 = vsel %vm2809_vm0, %v6289_v18, -inf  ;;  %v3176_v47 = vpop.permute.xlu2 %3175  ;;  %vm3294_vm2 = vcmp.eq.s32.totalorder %v3146_v5, 1  ;;  %v3366_v53 = vsel %vm3302_vm3, %v6202_v48, -inf  ;;  %vm2814_vm3 = vcmp.eq.s32.totalorder %v6053_v15, 1 }
 0x37b   : > { %v2936_v0 = vmax.f32 %v2873_v22, %v2935_v11  ;;  %v3358_v20 = vsel %vm3294_vm2, %v5980_v36, -inf  ;;  %vm3304_vm9 = vcmp.eq.s32.totalorder %v3176_v47, 1  ;;  %v6810_v22 = vld [vmem:[#allocation30_spill] sm:$0xff] }
 0x37c   : > { %v3418_v58 = vmax.f32 %v6224_v39, %v3358_v20  ;;  %v6811_v20 = vld [vmem:[#allocation35_spill] sm:$0xff] }
 0x37e   : > { %v6296_v56 = vmax.f32 %v3418_v58, %v3362_v50 }
 0x37f   : > { %v2347_v4 = vpop.f32.mrf.mxu2 }
 0x380   : > { %v6300_v54 = vadd.f32 %v5992_v8, %v2347_v4  ;;  %v3179_v49 = vpop.permute.xlu0 %3178  ;;  %v3426_v43 = vmax.f32 %v6296_v56, %v3366_v53 }
 0x381   : > { %v3155_v45 = vpop.permute.xlu1 %3154  ;;  %vm3305_vm7 = vcmp.eq.s32.totalorder %v3179_v49, 1 }
 0x382   : > { %v2874_v36 = vsel %vm2810_vm4, %v6300_v54, -inf  ;;  %vm3297_vm6 = vcmp.eq.s32.totalorder %v3155_v45, 1  ;;  %v3185_v34 = vpop.permute.xlu2 %3184  ;;  %v3369_v26 = vsel %vm3305_vm7, %v6809_v16, -inf  ;;  %v6812_v45 = vld [vmem:[#allocation71_spill] sm:$0xff] }
 0x383   : > { %v2937_v39 = vmax.f32 %v2874_v36, %v2936_v0  ;;  %v3361_v11 = vsel %vm3297_vm6, %v6059_v14, -inf  ;;  %vm3307_vm12 = vcmp.eq.s32.totalorder %v3185_v34, 1  ;;  %v6813_v34 = vld [vmem:[#allocation76_spill] sm:$0xff] }
 0x384   : > { %v3421_v48 = vmax.f32 %v3417_v62, %v3361_v11  ;;  %v6325_v62 = vsel %vm3304_vm9, %v6258_v12, -inf  ;;  %v3371_v47 = vsel %vm3307_vm12, %v6810_v22, -inf }
 0x386   : > { %v3425_v38 = vmax.f32 %v3421_v48, %v3365_v51 }
 0x387   : > { %v2349_v29 = vpop.f32.mrf.mxu2 }
 0x388   : > { %v6312_v55 = vadd.f32 %v5992_v8, %v2349_v29  ;;  %v6314_v30 = vpop.permute.xlu0 %3187  ;;  %v3429_v6 = vmax.f32 %v3425_v38, %v3369_v26 }
 0x389   : > { %v3164_v14 = vpop.permute.xlu1 %3163  ;;  %vm3308_vm7 = vcmp.eq.s32.totalorder %v6314_v30, 1 }
 0x38a   : > { %v2875_v21 = vsel %vm2811_vm8, %v6312_v55, -inf  ;;  %vm3300_vm10 = vcmp.eq.s32.totalorder %v3164_v14, 1  ;;  %v3194_v27 = vpop.permute.xlu2 %3193  ;;  %vm2815_vm8 = vcmp.eq.s32.totalorder %v5982_v17, 1 }
 0x38b   : > { %v2938_v52 = vmax.f32 %v2875_v21, %v2937_v39  ;;  %v3364_v37 = vsel %vm3300_vm10, %v6139_v24, -inf  ;;  %vm3310_vm0 = vcmp.eq.s32.totalorder %v3194_v27, 1 }
 0x38c   : > { %v6322_v3 = vmax.f32 %v3420_v40, %v3364_v37  ;;  %v3374_v11 = vsel %vm3310_vm0, %v6813_v34, -inf  ;;  %vm2817_vm0 = vcmp.eq.s32.totalorder %v6074_v33, 1 }
 0x38e   : > { %v3428_v57 = vmax.f32 %v6322_v3, %v6325_v62 }
 0x38f   : > { %v2352_v1 = vpop.f32.mrf.mxu2 }
 0x390   : > { %v6330_v7 = vadd.f32 %v5992_v8, %v2352_v1  ;;  %v3197_v5 = vpop.permute.xlu0 %3196 }
 0x391   : > { %v3173_v24 = vpop.permute.xlu1 %3172  ;;  %vm3311_vm14 = vcmp.eq.s32.totalorder %v3197_v5, 1 }
 0x392   : > { %v2876_v23 = vsel %vm2812_vm11, %v6330_v7, -inf  ;;  %vm3303_vm13 = vcmp.eq.s32.totalorder %v3173_v24, 1  ;;  %v6339_v58 = vsel %vm3311_vm14, %v6811_v20, -inf  ;;  %v3203_v50 = vpop.permute.xlu2 %3202 }
 0x393   : > { %v2939_v44 = vmax.f32 %v2876_v23, %v2938_v52  ;;  %v3367_v12 = vsel %vm3303_vm13, %v6231_v31, -inf  ;;  %vm3313_vm4 = vcmp.eq.s32.totalorder %v3203_v50, 1  ;;  %v6814_v52 = vld [vmem:[#allocation74_spill] sm:$0xff] }
 0x394   : > { %v3427_v40 = vmax.f32 %v3423_v41, %v3367_v12  ;;  %v3377_v3 = vsel %vm3313_vm4, %v5944_v9, -inf }
 0x396   : > { %v6336_v0 = vmax.f32 %v3427_v40, %v3371_v47  ;;  %v6816_v40 = vld [vmem:[#allocation17_spill] sm:$0xff] }
 0x397   : > { %v2354_v56 = vpop.f32.mrf.mxu2 }
 0x398   : > { %v6342_v42 = vadd.f32 %v5992_v8, %v2354_v56  ;;  %v3206_v53 = vpop.permute.xlu0 %3205  ;;  %v3435_v4 = vmax.f32 %v6336_v0, %v6339_v58 }
 0x399   : > { %v3182_v31 = vpop.permute.xlu1 %3181  ;;  %vm3314_vm2 = vcmp.eq.s32.totalorder %v3206_v53, 1 }
 0x39a   : > { %v2877_v41 = vsel %vm2813_vm15, %v6342_v42, -inf  ;;  %vm3306_vm1 = vcmp.eq.s32.totalorder %v3182_v31, 1  ;;  %v3378_v51 = vsel %vm3314_vm2, %v5968_v19, -inf  ;;  %v3212_v29 = vpop.permute.xlu2 %3211  ;;  %v6817_v31 = vld [vmem:[#allocation75_spill] sm:$0xff] }
 0x39b   : > { %v2940_v49 = vmax.f32 %v2877_v41, %v2939_v44  ;;  %v3370_v36 = vsel %vm3306_vm1, %v6812_v45, -inf  ;;  %vm3316_vm9 = vcmp.eq.s32.totalorder %v3212_v29, 1  ;;  %vm2816_vm12 = vcmp.eq.s32.totalorder %v6817_v31, 1  ;;  %v6818_v45 = vld [vmem:[#allocation92_spill] sm:$0xff] }
 0x39c   : > { %v3430_v39 = vmax.f32 %v3426_v43, %v3370_v36  ;;  %v3380_v0 = vsel %vm3316_vm9, %v6022_v32, -inf }
 0x39e   : > { %v3434_v48 = vmax.f32 %v3430_v39, %v3374_v11 }
 0x39f   : > { %v2357_v38 = vpop.f32.mrf.mxu2 }
 0x3a0   : > { %v6352_v16 = vadd.f32 %v5992_v8, %v2357_v38  ;;  %v3215_v60 = vpop.permute.xlu0 %3214  ;;  %v6354_v26 = vmax.f32 %v3434_v48, %v3378_v51 }
 0x3a1   : > { %v3191_v14 = vpop.permute.xlu1 %3190  ;;  %vm3317_vm6 = vcmp.eq.s32.totalorder %v3215_v60, 1 }
 0x3a2   : > { %v2878_v21 = vsel %vm2814_vm3, %v6352_v16, -inf  ;;  %vm3309_vm5 = vcmp.eq.s32.totalorder %v3191_v14, 1  ;;  %v6364_v27 = vsel %vm3317_vm6, %v6047_v46, -inf  ;;  %v3221_v46 = vpop.permute.xlu2 %3220 }
 0x3a3   : > { %v2941_v43 = vmax.f32 %v2878_v21, %v2940_v49  ;;  %v3373_v37 = vsel %vm3309_vm5, %v6814_v52, -inf  ;;  %vm3319_vm13 = vcmp.eq.s32.totalorder %v3221_v46, 1 }
 0x3a4   : > { %v3433_v19 = vmax.f32 %v3429_v6, %v3373_v37  ;;  %v6815_v6 = vld [vmem:[#allocation40_spill] sm:$0xff] }
 0x3a5   : > { %v3372_v23 = vsel %vm3308_vm7, %v6815_v6, -inf  ;;  %vm2819_vm7 = vcmp.eq.s32.totalorder %v6024_v35, 1 }
 0x3a6   : > { %v6361_v62 = vmax.f32 %v3433_v19, %v3377_v3  ;;  %v3432_v44 = vmax.f32 %v3428_v57, %v3372_v23 }
 0x3a7   : > { %v2359_v15 = vpop.f32.mrf.mxu2 }
 0x3a8   : > { %v6367_v1 = vadd.f32 %v5992_v8, %v2359_v15  ;;  %v3224_v5 = vpop.permute.xlu0 %3223  ;;  %v3441_v24 = vmax.f32 %v6361_v62, %v6364_v27  ;;  %v6819_v62 = vld [vmem:[#allocation14_spill] sm:$0xff] }
 0x3a9   : > { %v3200_v9 = vpop.permute.xlu1 %3199  ;;  %vm3320_vm11 = vcmp.eq.s32.totalorder %v3224_v5, 1  ;;  %vm2818_vm4 = vcmp.eq.s32.totalorder %v6819_v62, 1 }
 0x3aa   : > { %v2879_v30 = vsel %vm2815_vm8, %v6367_v1, -inf  ;;  %vm3312_vm10 = vcmp.eq.s32.totalorder %v3200_v9, 1  ;;  %v3384_v58 = vsel %vm3320_vm11, %v6130_v59, -inf  ;;  %v3383_v59 = vsel %vm3319_vm13, %v6101_v2, -inf  ;;  %v3230_v39 = vpop.permute.xlu2 %3229 }
 0x3ab   : > { %v2944_v12 = vmax.f32 %v2879_v30, %v2941_v43  ;;  %v3376_v22 = vsel %vm3312_vm10, %v6816_v40, -inf  ;;  %vm3322_vm1 = vcmp.eq.s32.totalorder %v3230_v39, 1 }
 0x3ac   : > { %v3436_v47 = vmax.f32 %v3432_v44, %v3376_v22 }
 0x3ae   : > { %v3440_v20 = vmax.f32 %v3436_v47, %v3380_v0 }
 0x3af   : > { %v2362_v17 = vpop.f32.mrf.mxu2 }
 0x3b0   : > { %v6378_v50 = vadd.f32 %v5992_v8, %v2362_v17  ;;  %v3233_v56 = vpop.permute.xlu0 %3232  ;;  %v3444_v53 = vmax.f32 %v3440_v20, %v3384_v58 }
 0x3b1   : > { %v3209_v57 = vpop.permute.xlu1 %3208  ;;  %vm3323_vm15 = vcmp.eq.s32.totalorder %v3233_v56, 1 }
 0x3b2   : > { %v2880_v41 = vsel %vm2816_vm12, %v6378_v50, -inf  ;;  %vm3315_vm14 = vcmp.eq.s32.totalorder %v3209_v57, 1  ;;  %v3387_v11 = vsel %vm3323_vm15, %v6221_v63, -inf  ;;  %v3386_v63 = vsel %vm3322_vm1, %v6190_v28, -inf  ;;  %v3239_v52 = vpop.permute.xlu2 %3238 }
 0x3b3   : > { %v2942_v49 = vmax.f32 %v2880_v41, %v2944_v12  ;;  %v3379_v36 = vsel %vm3315_vm14, %v6818_v45, -inf  ;;  %vm3325_vm5 = vcmp.eq.s32.totalorder %v3239_v52, 1 }
 0x3b4   : > { %v3439_v32 = vmax.f32 %v3435_v4, %v3379_v36  ;;  %v3389_v28 = vsel %vm3325_vm5, %v6273_v25, -inf }
 0x3b6   : > { %v3443_v34 = vmax.f32 %v3439_v32, %v3383_v59 }
 0x3b7   : > { %v2364_v48 = vpop.f32.mrf.mxu2 }
 0x3b8   : > { %v2365_v51 = vadd.f32 %v5992_v8, %v2364_v48  ;;  %v6386_v38 = vmax.f32 %v3443_v34, %v3387_v11  ;;  %v3242_v60 = vpop.permute.xlu0 %3241 }
 0x3b9   : > { %v3218_v29 = vpop.permute.xlu1 %3217  ;;  %vm3326_vm3 = vcmp.eq.s32.totalorder %v3242_v60, 1 }
 0x3ba   : > { %v2881_v14 = vsel %vm2817_vm0, %v2365_v51, -inf  ;;  %vm3318_vm2 = vcmp.eq.s32.totalorder %v3218_v29, 1  ;;  %v3390_v37 = vsel %vm3326_vm3, %v6289_v18, -inf  ;;  %v3248_v9 = vpop.permute.xlu2 %3247  ;;  %vm3470_vm3 = vcmask 1040384  }
 0x3bb   : > { %v2943_v21 = vmax.f32 %v2881_v14, %v2942_v49  ;;  %v3382_v4 = vsel %vm3318_vm2, %v6070_v10, -inf  ;;  %vm3328_vm13 = vcmp.eq.s32.totalorder %v3248_v9, 1 }
 0x3bc   : > { %v3442_v2 = vmax.f32 %v6354_v26, %v3382_v4  ;;  %v3392_v41 = vsel %vm3328_vm13, %v6312_v55, -inf }
 0x3be   : > { %v3446_v43 = vmax.f32 %v3442_v2, %v3386_v63 }
 0x3bf   : > { %v2367_v19 = vpop.f32.mrf.mxu2 }
 0x3c0   : > { %v2368_v33 = vadd.f32 %v5992_v8, %v2367_v19  ;;  %v3450_v3 = vmax.f32 %v3446_v43, %v3390_v37  ;;  %v3251_v22 = vpop.permute.xlu0 %3250 }
 0x3c1   : > { %v3227_v27 = vpop.permute.xlu1 %3226  ;;  %vm3329_vm10 = vcmp.eq.s32.totalorder %v3251_v22, 1 }
 0x3c2   : > { %v2882_v15 = vsel %vm2818_vm4, %v2368_v33, -inf  ;;  %vm3321_vm6 = vcmp.eq.s32.totalorder %v3227_v27, 1  ;;  %v3393_v35 = vsel %vm3329_vm10, %v6330_v7, -inf }
 0x3c3   : > { %v2945_v10 = vmax.f32 %v2882_v15, %v2943_v21  ;;  %v3385_v5 = vsel %vm3321_vm6, %v6159_v13, -inf  ;;  %v3257_v13 = vpop.permute.xlu2 %3256 }
 0x3c4   : > { %v3445_v26 = vmax.f32 %v3441_v24, %v3385_v5  ;;  %vm3331_vm15 = vcmp.eq.s32.totalorder %v3257_v13, 1 }
 0x3c6   : > { %v3449_v6 = vmax.f32 %v3445_v26, %v3389_v28 }
 0x3c7   : > { %v2369_v23 = vpop.f32.mrf.mxu2 }
 0x3c8   : > { %v2370_v18 = vadd.f32 %v5992_v8, %v2369_v23  ;;  %v3260_v25 = vpop.permute.xlu0 %3259 }
 0x3c9   : > { %v3236_v30 = vpop.permute.xlu1 %3235  ;;  %vm3332_vm0 = vcmp.eq.s32.totalorder %v3260_v25, 1 }
 0x3ca   : > { %v2883_v44 = vsel %vm2819_vm7, %v2370_v18, -inf  ;;  %vm3324_vm8 = vcmp.eq.s32.totalorder %v3236_v30, 1  ;;  %v3396_v59 = vsel %vm3332_vm0, %v6367_v1, -inf }
 0x3cb   : > { %v2946_v46 = vmax.f32 %v2883_v44, %v2945_v10  ;;  %v3388_v12 = vsel %vm3324_vm8, %v6248_v61, -inf  ;;  %v3266_v0 = vpop.permute.xlu2 %3265  ;;  %v3453_v61 = vmax.f32 %v3449_v6, %v3393_v35 }
 0x3cc   : > { %v3448_v40 = vmax.f32 %v3444_v53, %v3388_v12  ;;  %vm3334_vm12 = vcmp.eq.s32.totalorder %v3266_v0, 1 }
 0x3cd   : > { %v3398_v56 = vsel %vm3334_vm12, %v2365_v51, -inf  ;;  %v2947_v36 = vrot.slane %v2946_v46, 4 }
 0x3ce   : > { %v3452_v45 = vmax.f32 %v3448_v40, %v3392_v41 }
 0x3cf   : > { %v2948_v48 = vmax.f32 %v2946_v46, %v2947_v36 }
 0x3d0   : > { %v3269_v49 = vpop.permute.xlu0 %3268  ;;  %v3456_v39 = vmax.f32 %v3452_v45, %v3396_v59 }
 0x3d1   : > { %v3245_v47 = vpop.permute.xlu1 %3244  ;;  %vm3335_vm1 = vcmp.eq.s32.totalorder %v3269_v49, 1  ;;  %v2949_v60 = vrot.slane %v2948_v48, 2 }
 0x3d2   : > { %vm3327_vm11 = vcmp.eq.s32.totalorder %v3245_v47, 1  ;;  %v3399_v34 = vsel %vm3335_vm1, %v2368_v33, -inf }
 0x3d3   : > { %v3391_v58 = vsel %vm3327_vm11, %v6300_v54, -inf  ;;  %v3395_v54 = vsel %vm3331_vm15, %v6352_v16, -inf  ;;  %v2950_v21 = vmax.f32 %v2948_v48, %v2949_v60 }
 0x3d4   : > { %v3451_v31 = vmax.f32 %v6386_v38, %v3391_v58 }
 0x3d5   : > { %v2951_v2 = vrot.slane %v2950_v21, 1 }
 0x3d6   : > { %v3455_v32 = vmax.f32 %v3451_v31, %v3395_v54 }
 0x3d7   : > { %v2952_v43 = vmax.f32 %v2950_v21, %v2951_v2 }
 0x3d8   : > { %v3459_v55 = vmax.f32 %v3455_v32, %v3399_v34 }
 0x3d9   : > { %v3254_v24 = vpop.permute.xlu1 %3253 }
 0x3da   : > { %vm3330_vm9 = vcmp.eq.s32.totalorder %v3254_v24, 1 }
 0x3db   : > { %v3394_v20 = vsel %vm3330_vm9, %v6342_v42, -inf }
 0x3dc   : > { %v3454_v8 = vmax.f32 %v3450_v3, %v3394_v20 }
 0x3de   : > { %v3458_v57 = vmax.f32 %v3454_v8, %v3398_v56 }
 0x3e1   : > { %v3263_v17 = vpop.permute.xlu1 %3262 }
 0x3e2   : > { %vm3333_vm14 = vcmp.eq.s32.totalorder %v3263_v17, 1 }
 0x3e3   : > { %v3397_v53 = vsel %vm3333_vm14, %v6378_v50, -inf }
 0x3e4   : > { %v3457_v42 = vmax.f32 %v3453_v61, %v3397_v53 }
 0x3e6   : > { %v3461_v7 = vmax.f32 %v3457_v42, %v3458_v57 }
 0x3e9   : > { %v3272_v50 = vpop.permute.xlu1 %3271 }
 0x3ea   : > { %vm3336_vm2 = vcmp.eq.s32.totalorder %v3272_v50, 1 }
 0x3eb   : > { %v3400_v11 = vsel %vm3336_vm2, %v2370_v18, -inf }
 0x3ec   : > { %v3460_v51 = vmax.f32 %v3456_v39, %v3400_v11 }
 0x3ee   : > { %v3462_v38 = vmax.f32 %v3459_v55, %v3460_v51 }
 0x3f0   : > { %v3463_v29 = vmax.f32 %v3461_v7, %v3462_v38 }
 0x3f2   : > { %v3464_v16 = vrot.slane %v3463_v29, 4 }
 0x3f4   : > { %v3465_v14 = vmax.f32 %v3463_v29, %v3464_v16 }
 0x3f6   : > { %v3466_v4 = vrot.slane %v3465_v14, 2 }
 0x3f8   : > { %v3467_v1 = vmax.f32 %v3465_v14, %v3466_v4 }
 0x3fa   : > { %v3468_v63 = vrot.slane %v3467_v1, 1 }
 0x3fc   : > { %v3469_v52 = vmax.f32 %v3467_v1, %v3468_v63 }
 0x3fe   : > { %v3471_v37 = vsel %vm3470_vm3, %v2952_v43, %v3469_v52 }
 0x3ff   : > { %3472 = vst [vmem:[%s331_s10] sm:$0x3] %v3471_v37 }
 0x400   : > { %3846 = shalt.err (!%p3843_p3)
}
 0x401   : > { %3691 = dma.vmem_to_hbm [thread:$0]  (%p3970_p5), %s3487_s24, 32, %s3489_s25, %s3474_s9  }
 0x402 PF: > { %p3697_p4 = scmp.ge.s32.totalorder %s3881_s30, 2  ;;  %s3500_s18 = sand.u32 1, %s3869_s27  }
 0x403   : > { %s3501_s23 = scalar_lea.sflag [#allocation3], %s3500_s18 }
 0x404   : > { %p3694_p7 = pnand %p3697_p4, %p3974_p6 }
 0x406   : > { %p3695_p8 = pneg %p3694_p7 }
 0x408   : > { %3864 = dma.done.wait (%p3695_p8), %s3501_s23, 32  }
 0x409   : > { %3866 = vsyncadd (%p3695_p8), %s3501_s23, 4294967264  ;;  %p18_p9 = scmp.ge.s32.totalorder %s3957_s11, 6   ;;  %s6820_s27 = smov %s3873_s28 }
 0x40a   : > { %s6821_s28 = smov %s3877_s29  ;;  %s6822_s29 = smov %s3968_s14 }
 0x40b   : > { %s6823_s30 = smov %s3957_s11  ;;  %20 = sbr.rel (!%p18_p9) target bundleno = 3 (0x3), region = 93 }
 0x410   :  { %3507 = vsyncpa [#allocation3], 1 }
 0x411   :  { %3509 = vsyncpa [#allocation3 + $0x1], 1 }

</bundles_post_ra>
